<compile_context>
chip_gen: v5e
topology: v5e:2x2
jax: 0.10.0
libtpu: 0.0.40
codegen_flags: <defaults>
</compile_context>

<pallas_src>
import math

import jax
import jax.numpy as jnp
from jax.experimental import pallas as pl
from jax.experimental.pallas import tpu as pltpu
from jax.scipy.special import erf as jsp_erf

# ---- small-but-faithful configuration (original: 768 dims, 12 layers) ------
B = 2              # batch
D_IMG = 32         # img_feature_dim
N_EMBD = 32        # gpt2 n_embd
N_HEAD = 2
D_HEAD = N_EMBD // N_HEAD
N_LAYER = 2
N_INNER = 4 * N_EMBD
P_LEN = 10         # prompt_embedding rows
T = P_LEN + 1      # logical combined sequence length (prompt + fused feature)
T_PAD = 16         # padded per-sample length: multiple of 8 and a power of 2
S = B * T_PAD      # flattened padded rows
NUM_CLASSES = 2
LN_EPS = 1e-5
SLERP_ALPHA = 0.8
MASK_VALUE = -1e9                                  # finite mask (safe arithmetic)
NEG_INF = float(jnp.finfo(jnp.float32).min)        # pure-JAX reference only

assert T_PAD >= T and (T_PAD & (T_PAD - 1)) == 0
# Slab coalescing below relies on this (true for the toy config and for the
# real one: img_feature_dim == n_embd == 768).
assert D_IMG == N_EMBD


# ------------------------------ math helpers --------------------------------
def _erf_approx(x):
    # Abramowitz & Stegun 7.1.26 (|err| < 1.5e-7): erf from exp/abs only, so the
    # exact (erf-based) torch.nn.GELU semantics lower cleanly in Mosaic.
    a1, a2, a3, a4, a5 = 0.254829592, -0.284496736, 1.421413741, -1.453152027, 1.061405429
    p = 0.3275911
    s = jnp.where(x >= 0.0, 1.0, -1.0)
    ax = jnp.abs(x)
    t = pl.reciprocal(1.0 + p * ax, approx=True)   # EUP slot instead of VALU divide
    poly = ((((a5 * t + a4) * t + a3) * t + a2) * t + a1) * t
    return s * (1.0 - poly * jnp.exp(-ax * ax))


def _gelu_exact_kernel(x):        # torch.nn.GELU() default (erf form), in-kernel
    return 0.5 * x * (1.0 + _erf_approx(x * (1.0 / math.sqrt(2.0))))


def _gelu_exact_ref(x):           # reference uses the real erf
    return 0.5 * x * (1.0 + jsp_erf(x * (1.0 / math.sqrt(2.0))))


def _gelu_new(x):                 # GPT-2 "gelu_new" (tanh approximation)
    return 0.5 * x * (1.0 + jnp.tanh(math.sqrt(2.0 / math.pi) * (x + 0.044715 * x * x * x)))


def _layer_norm(x, g, b):
    mu = jnp.mean(x, axis=-1, keepdims=True)
    var = jnp.mean(jnp.square(x - mu), axis=-1, keepdims=True)
    return (x - mu) * jax.lax.rsqrt(var + LN_EPS) * g + b


# ------------------------------ Pallas kernel -------------------------------
def meteor_kernel(
    c_ref, img_ref, txt_ref,
    aw_ref, base_ref,
    qkv_w_ref, qkv_b_ref, atp_w_ref,
    fc_w_ref, fc_b_ref, mlp_w_ref,
    lvec_ref, gvec_ref, cls_w_ref,
    out_ref,
):
    img = img_ref[...]                               # (B, D_IMG)
    txt = txt_ref[...]                               # (B, D_IMG)
    gvec = gvec_ref[...]                             # (6, N_EMBD)

    # --- SLERP fusion (trig coefficients precomputed in glue, see wrapper) ---
    img_n = img * jax.lax.rsqrt(jnp.sum(img * img, axis=-1, keepdims=True))
    txt_n = txt * jax.lax.rsqrt(jnp.sum(txt * txt, axis=-1, keepdims=True))
    fused = c_ref[0] * img_n + c_ref[1] * txt_n      # (B, D_IMG)

    # --- adapter Linear(3*D_IMG -> D_IMG) as three row-block dots (no lane
    #     concat of [img|fused|txt]) + exact GELU, then feature projection -----
    adp = (jnp.dot(img,   aw_ref[0:D_IMG],           preferred_element_type=jnp.float32)
           + jnp.dot(fused, aw_ref[D_IMG:2 * D_IMG], preferred_element_type=jnp.float32)
           + jnp.dot(txt,  aw_ref[2 * D_IMG:3 * D_IMG], preferred_element_type=jnp.float32)
           + gvec[2:3])                                                  # adp_b
    adp = _gelu_exact_kernel(adp)
    fproj = (jnp.dot(adp, aw_ref[3 * D_IMG:4 * D_IMG], preferred_element_type=jnp.float32)
             + gvec[3:4])                                                # prj_b, (B, N_EMBD)

    # --- padded (S, N_EMBD) activations: base already holds prompt+wpe rows;
    #     the projected-feature row is injected with a tiny selection matmul ---
    rr = jax.lax.broadcasted_iota(jnp.int32, (S, B), 0)
    bb = jax.lax.broadcasted_iota(jnp.int32, (S, B), 1)
    inject = jnp.where(rr == bb * T_PAD + (T - 1), 1.0, 0.0)            # (S, B)
    x = base_ref[...] + jnp.dot(inject, fproj, preferred_element_type=jnp.float32)

    # --- block-diagonal causal additive bias built in-kernel.
    #     (i ^ j) < T_PAD  <=>  same T_PAD-aligned block (T_PAD is a power of 2).
    ri = jax.lax.broadcasted_iota(jnp.int32, (S, S), 0)
    ci = jax.lax.broadcasted_iota(jnp.int32, (S, S), 1)
    allowed = jnp.logical_and(jnp.bitwise_xor(ri, ci) < T_PAD, ci <= ri)
    bias = jnp.where(allowed, 0.0, MASK_VALUE)                           # (S, S)

    # --- GPT-2 transformer blocks (per-head dots, per-head accumulated proj) --
    for l in range(N_LAYER):
        lvec = lvec_ref[l]                                               # (6, N_EMBD)
        hn = _layer_norm(x, lvec[0:1], lvec[1:2])
        attn = jnp.zeros((S, N_EMBD), jnp.float32)
        for hh in range(N_HEAD):
            iq = (0 * N_LAYER + l) * N_HEAD + hh
            ik = (1 * N_LAYER + l) * N_HEAD + hh
            iv = (2 * N_LAYER + l) * N_HEAD + hh
            # 1/sqrt(D_HEAD) is pre-folded into the q weights/bias at pack time.
            q = jnp.dot(hn, qkv_w_ref[iq], preferred_element_type=jnp.float32) + qkv_b_ref[iq]
            k = jnp.dot(hn, qkv_w_ref[ik], preferred_element_type=jnp.float32) + qkv_b_ref[ik]
            v = jnp.dot(hn, qkv_w_ref[iv], preferred_element_type=jnp.float32) + qkv_b_ref[iv]
            s = jax.lax.dot_general(q, k, (((1,), (1,)), ((), ())),
                                    preferred_element_type=jnp.float32) + bias
            s = s - jnp.max(s, axis=-1, keepdims=True)
            p = jnp.exp(s)
            # approx reciprocal (EUP): tiny accuracy trade-off vs exact divide.
            p = p * pl.reciprocal(jnp.sum(p, axis=-1, keepdims=True), approx=True)
            ctx = jnp.dot(p, v, preferred_element_type=jnp.float32)     # (S, D_HEAD)
            attn = attn + jnp.dot(ctx, atp_w_ref[l * N_HEAD + hh],
                                  preferred_element_type=jnp.float32)
        x = x + attn + lvec[4:5]                                         # atp_b

        h2 = _layer_norm(x, lvec[2:3], lvec[3:4])
        h2 = _gelu_new(jnp.dot(h2, fc_w_ref[l], preferred_element_type=jnp.float32)
                       + fc_b_ref[l])
        x = x + jnp.dot(h2, mlp_w_ref[l], preferred_element_type=jnp.float32) + lvec[5:6]

    x = _layer_norm(x, gvec[0:1], gvec[1:2])                             # ln_f

    # --- sigmoid(scale)-gated blend of the two real tail rows via a (B, S)
    #     selection matmul (aligned, no per-batch sublane slicing) -------------
    scale = gvec[5:6, 0:1]
    alpha = pl.reciprocal(1.0 + jnp.exp(-scale), approx=False)           # sigmoid
    rb = jax.lax.broadcasted_iota(jnp.int32, (B, S), 0)
    cb = jax.lax.broadcasted_iota(jnp.int32, (B, S), 1)
    gather = (jnp.where(cb == rb * T_PAD + (T - 1), alpha, 0.0)
              + jnp.where(cb == rb * T_PAD + (T - 2), 1.0 - alpha, 0.0))  # (B, S)
    last = jnp.dot(gather, x, preferred_element_type=jnp.float32)        # (B, N_EMBD)
    out_ref[...] = (jnp.dot(last, cls_w_ref[...], preferred_element_type=jnp.float32)
                    + gvec[4:5, 0:NUM_CLASSES])


# --------------------------- weight packing (once) ---------------------------
def pack_params(p):
    """Fuse per-head / per-piece weights into MXU-friendly coalesced slabs."""
    inv = 1.0 / math.sqrt(D_HEAD)

    # head-leading q/k/v weights, flattened to one leading axis:
    # index ((qkv * N_LAYER) + layer) * N_HEAD + head
    qkv_w = jnp.stack([p['q_w'] * inv, p['k_w'], p['v_w']], axis=0)
    qkv_w = qkv_w.reshape(3 * N_LAYER * N_HEAD, N_EMBD, D_HEAD)
    qkv_b = jnp.stack([p['q_b'] * inv, p['k_b'], p['v_b']], axis=0)
    qkv_b = qkv_b.reshape(3 * N_LAYER * N_HEAD, 1, D_HEAD)
    atp_w = p['atp_w'].reshape(N_LAYER * N_HEAD, D_HEAD, N_EMBD)

    # per-layer (1, N_EMBD) vectors share one slab
    lvec = jnp.concatenate([p['ln1_g'], p['ln1_b'], p['ln2_g'], p['ln2_b'],
                            p['atp_b'], p['mlp_b']], axis=1)             # (L, 6, N_EMBD)

    # global small vectors share one slab: lnf_g, lnf_b, adp_b, prj_b, cls_b, scale
    cls_b_pad = jnp.zeros((1, N_EMBD), jnp.float32).at[:, :NUM_CLASSES].set(p['cls_b'])
    scale_pad = jnp.zeros((1, N_EMBD), jnp.float32).at[:, :1].set(p['scale'])
    gvec = jnp.concatenate([p['lnf_g'], p['lnf_b'], p['adp_b'], p['prj_b'],
                            cls_b_pad, scale_pad], axis=0)               # (6, N_EMBD)

    # adapter (3*D_IMG -> D_IMG) + feature projection (D_IMG -> N_EMBD) in one slab
    aw = jnp.concatenate([p['adp_w'].reshape(3 * D_IMG, D_IMG), p['prj_w']], axis=0)

    # padded prompt/positional base slab: rows 0..P_LEN-1 = prompt+wpe,
    # row P_LEN = wpe[P_LEN] (the feature row's position), rows P_LEN+1.. = 0.
    base_one = jnp.concatenate([p['prompt'] + p['wpe'][:P_LEN],
                                p['wpe'][P_LEN:T],
                                jnp.zeros((T_PAD - T, N_EMBD), jnp.float32)], axis=0)
    base = jnp.tile(base_one, (B, 1))                                    # (S, N_EMBD)

    return dict(aw=aw, base=base,
                qkv_w=qkv_w, qkv_b=qkv_b, atp_w=atp_w,
                fc_w=p['fc_w'], fc_b=p['fc_b'], mlp_w=p['mlp_w'],
                lvec=lvec, gvec=gvec, cls_w=p['cls_w'])


# ------------------------------ wrapper --------------------------------------
@jax.jit
def meteor_forward(packed, image_embedding, text_embedding,
                   prompt_input_ids=None, prompt_attention_mask=None):
    # prompt_input_ids / prompt_attention_mask match the PyTorch signature but,
    # exactly as in the reference forward, are never used.
    del prompt_input_ids, prompt_attention_mask

    # TODO(synk): arccos/sin have no guaranteed Mosaic lowering; these (2, B, 1)
    # SLERP trig coefficients are computed in JAX glue. Normalization and the
    # actual mixing stay inside the Pallas kernel.
    img_n = image_embedding / jnp.linalg.norm(image_embedding, axis=1, keepdims=True)
    txt_n = text_embedding / jnp.linalg.norm(text_embedding, axis=1, keepdims=True)
    cos_sim = jnp.sum(img_n * txt_n, axis=1, keepdims=True)
    omega = jnp.arccos(cos_sim) + 1e-6
    coef = jnp.stack([jnp.sin((1.0 - SLERP_ALPHA) * omega),
                      jnp.sin(SLERP_ALPHA * omega)], axis=0) / jnp.sin(omega)   # (2, B, 1)

    args = [coef, image_embedding, text_embedding,
            packed['aw'], packed['base'],
            packed['qkv_w'], packed['qkv_b'], packed['atp_w'],
            packed['fc_w'], packed['fc_b'], packed['mlp_w'],
            packed['lvec'], packed['gvec'], packed['cls_w']]

    # Single gridless invocation: all slabs fit VMEM comfortably at this size.
    # TODO(synk): at the real GPT-2 config, add a layer grid axis with per-layer
    # bf16 weight BlockSpecs (streamed HBM->VMEM, vmem_limit_bytes raised) and a
    # 'parallel' batch axis so v7x's second TensorCore is used.
    vmem_spec = pl.BlockSpec(memory_space=pltpu.MemorySpace.VMEM)
    out = pl.pallas_call(
        meteor_kernel,
        out_shape=jax.ShapeDtypeStruct((B, NUM_CLASSES), jnp.float32),
        in_specs=[vmem_spec] * len(args),
        out_specs=vmem_spec,
    )(*args)
    return out


# --------------------------- parameter init (synthetic) ----------------------
def init_params(key):
    ks = jax.random.split(key, 16)

    def nrm(k, shape, sd=0.05):
        return (sd * jax.random.normal(k, shape)).astype(jnp.float32)

    limit = math.sqrt(6.0 / (P_LEN + N_EMBD))        # xavier_uniform for prompt
    return dict(
        adp_w=nrm(ks[0], (3, D_IMG, D_IMG)),                    # rows of Linear(3*D_IMG, D_IMG)
        adp_b=nrm(ks[1], (1, D_IMG)),
        prj_w=nrm(ks[2], (D_IMG, N_EMBD)),
        prj_b=nrm(ks[3], (1, N_EMBD)),
        prompt=jax.random.uniform(ks[4], (P_LEN, N_EMBD),
                                  minval=-limit, maxval=limit).astype(jnp.float32),
        wpe=nrm(ks[5], (T, N_EMBD), 0.02),
        ln1_g=jnp.ones((N_LAYER, 1, N_EMBD), jnp.float32),
        ln1_b=jnp.zeros((N_LAYER, 1, N_EMBD), jnp.float32),
        q_w=nrm(ks[6], (N_LAYER, N_HEAD, N_EMBD, D_HEAD)),
        q_b=jnp.zeros((N_LAYER, N_HEAD, 1, D_HEAD), jnp.float32),
        k_w=nrm(ks[7], (N_LAYER, N_HEAD, N_EMBD, D_HEAD)),
        k_b=jnp.zeros((N_LAYER, N_HEAD, 1, D_HEAD), jnp.float32),
        v_w=nrm(ks[8], (N_LAYER, N_HEAD, N_EMBD, D_HEAD)),
        v_b=jnp.zeros((N_LAYER, N_HEAD, 1, D_HEAD), jnp.float32),
        atp_w=nrm(ks[9], (N_LAYER, N_HEAD, D_HEAD, N_EMBD)),
        atp_b=jnp.zeros((N_LAYER, 1, N_EMBD), jnp.float32),
        ln2_g=jnp.ones((N_LAYER, 1, N_EMBD), jnp.float32),
        ln2_b=jnp.zeros((N_LAYER, 1, N_EMBD), jnp.float32),
        fc_w=nrm(ks[10], (N_LAYER, N_EMBD, N_INNER)),
        fc_b=jnp.zeros((N_LAYER, 1, N_INNER), jnp.float32),
        mlp_w=nrm(ks[11], (N_LAYER, N_INNER, N_EMBD)),
        mlp_b=jnp.zeros((N_LAYER, 1, N_EMBD), jnp.float32),
        lnf_g=jnp.ones((1, N_EMBD), jnp.float32),
        lnf_b=jnp.zeros((1, N_EMBD), jnp.float32),
        scale=jnp.zeros((1, 1), jnp.float32),                   # sigmoid(0)=0.5, as in module
        cls_w=nrm(ks[12], (N_EMBD, NUM_CLASSES)),
        cls_b=jnp.zeros((1, NUM_CLASSES), jnp.float32),
    )


# --------------------------- pure-JAX reference ------------------------------
def reference_forward(params, image, text):
    bsz = image.shape[0]
    img_n = image / jnp.linalg.norm(image, axis=1, keepdims=True)
    txt_n = text / jnp.linalg.norm(text, axis=1, keepdims=True)
    cos_sim = jnp.sum(img_n * txt_n, axis=1, keepdims=True)
    omega = jnp.arccos(cos_sim) + 1e-6
    fused = (jnp.sin((1.0 - SLERP_ALPHA) * omega) * img_n
             + jnp.sin(SLERP_ALPHA * omega) * txt_n) / jnp.sin(omega)

    adp_w_merged = params['adp_w'].reshape(3 * D_IMG, D_IMG)
    h = jnp.concatenate([image, fused, text], axis=1) @ adp_w_merged + params['adp_b']
    h = _gelu_exact_ref(h)
    h = h @ params['prj_w'] + params['prj_b']                               # (B, N_EMBD)

    x = jnp.concatenate(
        [jnp.broadcast_to(params['prompt'][None], (bsz, P_LEN, N_EMBD)), h[:, None, :]], axis=1)
    x = x + params['wpe'][None]

    mask = jnp.tril(jnp.ones((T, T), bool))
    for l in range(N_LAYER):
        hn = _layer_norm(x, params['ln1_g'][l], params['ln1_b'][l])
        q = jnp.einsum('btd,hdk->bhtk', hn, params['q_w'][l]) + params['q_b'][l][None]
        k = jnp.einsum('btd,hdk->bhtk', hn, params['k_w'][l]) + params['k_b'][l][None]
        v = jnp.einsum('btd,hdk->bhtk', hn, params['v_w'][l]) + params['v_b'][l][None]
        s = jnp.einsum('bhqk,bhmk->bhqm', q, k) / math.sqrt(D_HEAD)
        s = jnp.where(mask, s, NEG_INF)
        s = s - jnp.max(s, axis=-1, keepdims=True)
        p = jnp.exp(s)
        p = p / jnp.sum(p, axis=-1, keepdims=True)
        ctx = jnp.einsum('bhqm,bhmk->bhqk', p, v)
        x = x + jnp.einsum('bhtk,hkd->btd', ctx, params['atp_w'][l]) + params['atp_b'][l]
        h2 = _layer_norm(x, params['ln2_g'][l], params['ln2_b'][l])
        h2 = _gelu_new(h2 @ params['fc_w'][l] + params['fc_b'][l])
        x = x + h2 @ params['mlp_w'][l] + params['mlp_b'][l]

    x = _layer_norm(x, params['lnf_g'], params['lnf_b'])
    alpha = jax.nn.sigmoid(params['scale'][0, 0])
    last = alpha * x[:, -1, :] + (1.0 - alpha) * x[:, -2, :]
    return last @ params['cls_w'] + params['cls_b']


# ---------------------------------- main --------------------------------------
if __name__ == "__main__":
    key = jax.random.PRNGKey(0)
    kp, ki, kt, kid = jax.random.split(key, 4)
    params = init_params(kp)
    packed = pack_params(params)

    image_embedding = jax.random.normal(ki, (B, D_IMG), jnp.float32)
    text_embedding = jax.random.normal(kt, (B, D_IMG), jnp.float32)
    # Present in the PyTorch forward signature but unused by it:
    prompt_input_ids = jax.random.randint(kid, (B, P_LEN), 0, 1000)
    prompt_attention_mask = jnp.ones((B, P_LEN), jnp.int32)

    logits = meteor_forward(packed, image_embedding, text_embedding,
                            prompt_input_ids, prompt_attention_mask)
    logits = jax.block_until_ready(logits)

    ref = reference_forward(params, image_embedding, text_embedding)
    assert logits.shape == (B, NUM_CLASSES)
    assert jnp.allclose(logits, ref, atol=5e-3, rtol=5e-3), (logits, ref)
    print("KERNEL_OK")
</pallas_src>

<mosaic_0001>
module attributes {stable_mosaic.version = 11 : i64} {
  func.func @meteor_kernel(%arg0: memref<2x2x1xf32, #tpu.memory_space<vmem>>, %arg1: memref<2x32xf32, #tpu.memory_space<vmem>>, %arg2: memref<2x32xf32, #tpu.memory_space<vmem>>, %arg3: memref<128x32xf32, #tpu.memory_space<vmem>>, %arg4: memref<32x32xf32, #tpu.memory_space<vmem>>, %arg5: memref<12x32x16xf32, #tpu.memory_space<vmem>>, %arg6: memref<12x1x16xf32, #tpu.memory_space<vmem>>, %arg7: memref<4x16x32xf32, #tpu.memory_space<vmem>>, %arg8: memref<2x32x128xf32, #tpu.memory_space<vmem>>, %arg9: memref<2x1x128xf32, #tpu.memory_space<vmem>>, %arg10: memref<2x128x32xf32, #tpu.memory_space<vmem>>, %arg11: memref<2x6x32xf32, #tpu.memory_space<vmem>>, %arg12: memref<6x32xf32, #tpu.memory_space<vmem>>, %arg13: memref<32x2xf32, #tpu.memory_space<vmem>>, %arg14: memref<2x2xf32, #tpu.memory_space<vmem>>) attributes {dimension_semantics = [], scalar_prefetch = 0 : i64, scratch_operands = 0 : i64, tpu.core_type = #tpu.core_type<tc>} {
    %c0 = arith.constant 0 : index
    %c0_0 = arith.constant 0 : index
    %0 = vector.load %arg1[%c0, %c0_0] : memref<2x32xf32, #tpu.memory_space<vmem>>, vector<2x32xf32>
    %c0_1 = arith.constant 0 : index
    %c0_2 = arith.constant 0 : index
    %1 = vector.load %arg2[%c0_1, %c0_2] : memref<2x32xf32, #tpu.memory_space<vmem>>, vector<2x32xf32>
    %c0_3 = arith.constant 0 : index
    %c0_4 = arith.constant 0 : index
    %2 = vector.load %arg12[%c0_3, %c0_4] : memref<6x32xf32, #tpu.memory_space<vmem>>, vector<6x32xf32>
    %3 = arith.mulf %0, %0 : vector<2x32xf32>
    %cst = arith.constant dense<0.000000e+00> : vector<2xf32>
    %4 = vector.multi_reduction <add>, %3, %cst [1] : vector<2x32xf32> to vector<2xf32>
    %5 = vector.shape_cast %4 : vector<2xf32> to vector<2x1xf32>
    %6 = math.rsqrt %5 : vector<2x1xf32>
    %7 = vector.broadcast %6 : vector<2x1xf32> to vector<2x32xf32>
    %8 = arith.mulf %0, %7 : vector<2x32xf32>
    %9 = arith.mulf %1, %1 : vector<2x32xf32>
    %cst_5 = arith.constant dense<0.000000e+00> : vector<2xf32>
    %10 = vector.multi_reduction <add>, %9, %cst_5 [1] : vector<2x32xf32> to vector<2xf32>
    %11 = vector.shape_cast %10 : vector<2xf32> to vector<2x1xf32>
    %12 = math.rsqrt %11 : vector<2x1xf32>
    %13 = vector.broadcast %12 : vector<2x1xf32> to vector<2x32xf32>
    %14 = arith.mulf %1, %13 : vector<2x32xf32>
    %c0_6 = arith.constant 0 : index
    %c0_7 = arith.constant 0 : index
    %c0_8 = arith.constant 0 : index
    %15 = vector.load %arg0[%c0_6, %c0_7, %c0_8] : memref<2x2x1xf32, #tpu.memory_space<vmem>>, vector<1x2x1xf32>
    %16 = vector.shape_cast %15 : vector<1x2x1xf32> to vector<2x1xf32>
    %17 = vector.broadcast %16 : vector<2x1xf32> to vector<2x32xf32>
    %18 = arith.mulf %17, %8 : vector<2x32xf32>
    %c1 = arith.constant 1 : index
    %c0_9 = arith.constant 0 : index
    %c0_10 = arith.constant 0 : index
    %19 = vector.load %arg0[%c1, %c0_9, %c0_10] : memref<2x2x1xf32, #tpu.memory_space<vmem>>, vector<1x2x1xf32>
    %20 = vector.shape_cast %19 : vector<1x2x1xf32> to vector<2x1xf32>
    %21 = vector.broadcast %20 : vector<2x1xf32> to vector<2x32xf32>
    %22 = arith.mulf %21, %14 : vector<2x32xf32>
    %23 = arith.addf %18, %22 : vector<2x32xf32>
    %c0_11 = arith.constant 0 : index
    %c0_12 = arith.constant 0 : index
    %24 = vector.load %arg3[%c0_11, %c0_12] : memref<128x32xf32, #tpu.memory_space<vmem>>, vector<32x32xf32>
    %cst_13 = arith.constant dense<0.000000e+00> : vector<2x32xf32>
    %25 = tpu.matmul %0, %24, %cst_13 {dimension_numbers = #tpu.dot_dimension_numbers<[1], [0], [0], [1], [0, 0, 1, 1], [], []>} : vector<2x32xf32>, vector<32x32xf32>, vector<2x32xf32> -> vector<2x32xf32>
    %c32 = arith.constant 32 : index
    %c0_14 = arith.constant 0 : index
    %26 = vector.load %arg3[%c32, %c0_14] : memref<128x32xf32, #tpu.memory_space<vmem>>, vector<32x32xf32>
    %cst_15 = arith.constant dense<0.000000e+00> : vector<2x32xf32>
    %27 = tpu.matmul %23, %26, %cst_15 {dimension_numbers = #tpu.dot_dimension_numbers<[1], [0], [0], [1], [0, 0, 1, 1], [], []>} : vector<2x32xf32>, vector<32x32xf32>, vector<2x32xf32> -> vector<2x32xf32>
    %28 = arith.addf %25, %27 : vector<2x32xf32>
    %c64 = arith.constant 64 : index
    %c0_16 = arith.constant 0 : index
    %29 = vector.load %arg3[%c64, %c0_16] : memref<128x32xf32, #tpu.memory_space<vmem>>, vector<32x32xf32>
    %cst_17 = arith.constant dense<0.000000e+00> : vector<2x32xf32>
    %30 = tpu.matmul %1, %29, %cst_17 {dimension_numbers = #tpu.dot_dimension_numbers<[1], [0], [0], [1], [0, 0, 1, 1], [], []>} : vector<2x32xf32>, vector<32x32xf32>, vector<2x32xf32> -> vector<2x32xf32>
    %31 = arith.addf %28, %30 : vector<2x32xf32>
    %32 = vector.extract_strided_slice %2 {offsets = [2, 0], sizes = [1, 32], strides = [1, 1]} : vector<6x32xf32> to vector<1x32xf32>
    %33 = vector.broadcast %32 : vector<1x32xf32> to vector<2x32xf32>
    %34 = arith.addf %31, %33 : vector<2x32xf32>
    %cst_18 = arith.constant 5.000000e-01 : f32
    %35 = vector.broadcast %cst_18 : f32 to vector<2x32xf32>
    %36 = arith.mulf %35, %34 : vector<2x32xf32>
    %cst_19 = arith.constant 0.707106769 : f32
    %37 = vector.broadcast %cst_19 : f32 to vector<2x32xf32>
    %38 = arith.mulf %34, %37 : vector<2x32xf32>
    %cst_20 = arith.constant 0.000000e+00 : f32
    %39 = vector.broadcast %cst_20 : f32 to vector<2x32xf32>
    %40 = arith.cmpf oge, %38, %39 : vector<2x32xf32>
    %cst_21 = arith.constant 1.000000e+00 : f32
    %cst_22 = arith.constant -1.000000e+00 : f32
    %41 = vector.broadcast %cst_21 : f32 to vector<2x32xf32>
    %42 = vector.broadcast %cst_22 : f32 to vector<2x32xf32>
    %43 = arith.select %40, %41, %42 : vector<2x32xi1>, vector<2x32xf32>
    %44 = math.absf %38 : vector<2x32xf32>
    %cst_23 = arith.constant 0.327591091 : f32
    %45 = vector.broadcast %cst_23 : f32 to vector<2x32xf32>
    %46 = arith.mulf %45, %44 : vector<2x32xf32>
    %cst_24 = arith.constant 1.000000e+00 : f32
    %47 = vector.broadcast %cst_24 : f32 to vector<2x32xf32>
    %48 = arith.addf %47, %46 : vector<2x32xf32>
    %49 = tpu.reciprocal %48 {approx = true} : vector<2x32xf32> -> vector<2x32xf32>
    %cst_25 = arith.constant 1.06140542 : f32
    %50 = vector.broadcast %cst_25 : f32 to vector<2x32xf32>
    %51 = arith.mulf %50, %49 : vector<2x32xf32>
    %cst_26 = arith.constant -1.45315206 : f32
    %52 = vector.broadcast %cst_26 : f32 to vector<2x32xf32>
    %53 = arith.addf %51, %52 : vector<2x32xf32>
    %54 = arith.mulf %53, %49 : vector<2x32xf32>
    %cst_27 = arith.constant 1.42141378 : f32
    %55 = vector.broadcast %cst_27 : f32 to vector<2x32xf32>
    %56 = arith.addf %54, %55 : vector<2x32xf32>
    %57 = arith.mulf %56, %49 : vector<2x32xf32>
    %cst_28 = arith.constant -0.284496725 : f32
    %58 = vector.broadcast %cst_28 : f32 to vector<2x32xf32>
    %59 = arith.addf %57, %58 : vector<2x32xf32>
    %60 = arith.mulf %59, %49 : vector<2x32xf32>
    %cst_29 = arith.constant 0.254829586 : f32
    %61 = vector.broadcast %cst_29 : f32 to vector<2x32xf32>
    %62 = arith.addf %60, %61 : vector<2x32xf32>
    %63 = arith.mulf %62, %49 : vector<2x32xf32>
    %cst_30 = arith.constant 0.000000e+00 : f32
    %64 = vector.broadcast %cst_30 : f32 to vector<2x32xf32>
    %65 = arith.subf %64, %44 : vector<2x32xf32>
    %66 = arith.mulf %65, %44 : vector<2x32xf32>
    %67 = math.exp %66 : vector<2x32xf32>
    %68 = arith.mulf %63, %67 : vector<2x32xf32>
    %cst_31 = arith.constant 1.000000e+00 : f32
    %69 = vector.broadcast %cst_31 : f32 to vector<2x32xf32>
    %70 = arith.subf %69, %68 : vector<2x32xf32>
    %71 = arith.mulf %43, %70 : vector<2x32xf32>
    %cst_32 = arith.constant 1.000000e+00 : f32
    %72 = vector.broadcast %cst_32 : f32 to vector<2x32xf32>
    %73 = arith.addf %72, %71 : vector<2x32xf32>
    %74 = arith.mulf %36, %73 : vector<2x32xf32>
    %c96 = arith.constant 96 : index
    %c0_33 = arith.constant 0 : index
    %75 = vector.load %arg3[%c96, %c0_33] : memref<128x32xf32, #tpu.memory_space<vmem>>, vector<32x32xf32>
    %cst_34 = arith.constant dense<0.000000e+00> : vector<2x32xf32>
    %76 = tpu.matmul %74, %75, %cst_34 {dimension_numbers = #tpu.dot_dimension_numbers<[1], [0], [0], [1], [0, 0, 1, 1], [], []>} : vector<2x32xf32>, vector<32x32xf32>, vector<2x32xf32> -> vector<2x32xf32>
    %77 = vector.extract_strided_slice %2 {offsets = [3, 0], sizes = [1, 32], strides = [1, 1]} : vector<6x32xf32> to vector<1x32xf32>
    %78 = vector.broadcast %77 : vector<1x32xf32> to vector<2x32xf32>
    %79 = arith.addf %76, %78 : vector<2x32xf32>
    %80 = tpu.iota {dimensions = array<i32: 0>} : vector<32x2xi32>
    %81 = tpu.iota {dimensions = array<i32: 1>} : vector<32x2xi32>
    %c16_i32 = arith.constant 16 : i32
    %82 = vector.broadcast %c16_i32 : i32 to vector<32x2xi32>
    %83 = arith.muli %81, %82 : vector<32x2xi32>
    %c10_i32 = arith.constant 10 : i32
    %84 = vector.broadcast %c10_i32 : i32 to vector<32x2xi32>
    %85 = arith.addi %83, %84 : vector<32x2xi32>
    %86 = arith.cmpi eq, %80, %85 : vector<32x2xi32>
    %cst_35 = arith.constant 1.000000e+00 : f32
    %cst_36 = arith.constant 0.000000e+00 : f32
    %87 = vector.broadcast %cst_35 : f32 to vector<32x2xf32>
    %88 = vector.broadcast %cst_36 : f32 to vector<32x2xf32>
    %89 = arith.select %86, %87, %88 : vector<32x2xi1>, vector<32x2xf32>
    %c0_37 = arith.constant 0 : index
    %c0_38 = arith.constant 0 : index
    %90 = vector.load %arg4[%c0_37, %c0_38] : memref<32x32xf32, #tpu.memory_space<vmem>>, vector<32x32xf32>
    %cst_39 = arith.constant dense<0.000000e+00> : vector<32x32xf32>
    %91 = tpu.matmul %89, %79, %cst_39 {dimension_numbers = #tpu.dot_dimension_numbers<[1], [0], [0], [1], [0, 0, 1, 1], [], []>} : vector<32x2xf32>, vector<2x32xf32>, vector<32x32xf32> -> vector<32x32xf32>
    %92 = arith.addf %90, %91 : vector<32x32xf32>
    %93 = tpu.iota {dimensions = array<i32: 0>} : vector<32x32xi32>
    %94 = tpu.iota {dimensions = array<i32: 1>} : vector<32x32xi32>
    %95 = arith.xori %93, %94 : vector<32x32xi32>
    %c16_i32_40 = arith.constant 16 : i32
    %96 = vector.broadcast %c16_i32_40 : i32 to vector<32x32xi32>
    %97 = arith.cmpi slt, %95, %96 : vector<32x32xi32>
    %98 = arith.cmpi sle, %94, %93 : vector<32x32xi32>
    %99 = arith.andi %97, %98 : vector<32x32xi1>
    %cst_41 = arith.constant 0.000000e+00 : f32
    %cst_42 = arith.constant -1.000000e+09 : f32
    %100 = vector.broadcast %cst_41 : f32 to vector<32x32xf32>
    %101 = vector.broadcast %cst_42 : f32 to vector<32x32xf32>
    %102 = arith.select %99, %100, %101 : vector<32x32xi1>, vector<32x32xf32>
    %c0_43 = arith.constant 0 : index
    %c0_44 = arith.constant 0 : index
    %c0_45 = arith.constant 0 : index
    %103 = vector.load %arg11[%c0_43, %c0_44, %c0_45] : memref<2x6x32xf32, #tpu.memory_space<vmem>>, vector<1x6x32xf32>
    %104 = vector.shape_cast %103 : vector<1x6x32xf32> to vector<6x32xf32>
    %105 = vector.extract_strided_slice %104 {offsets = [0, 0], sizes = [1, 32], strides = [1, 1]} : vector<6x32xf32> to vector<1x32xf32>
    %106 = vector.extract_strided_slice %104 {offsets = [1, 0], sizes = [1, 32], strides = [1, 1]} : vector<6x32xf32> to vector<1x32xf32>
    %cst_46 = arith.constant dense<0.000000e+00> : vector<32xf32>
    %107 = vector.multi_reduction <add>, %92, %cst_46 [1] : vector<32x32xf32> to vector<32xf32>
    %108 = vector.shape_cast %107 : vector<32xf32> to vector<32x1xf32>
    %cst_47 = arith.constant 3.200000e+01 : f32
    %109 = vector.broadcast %cst_47 : f32 to vector<32x1xf32>
    %110 = arith.divf %108, %109 : vector<32x1xf32>
    %111 = vector.broadcast %110 : vector<32x1xf32> to vector<32x32xf32>
    %112 = arith.subf %92, %111 : vector<32x32xf32>
    %113 = arith.mulf %112, %112 : vector<32x32xf32>
    %cst_48 = arith.constant dense<0.000000e+00> : vector<32xf32>
    %114 = vector.multi_reduction <add>, %113, %cst_48 [1] : vector<32x32xf32> to vector<32xf32>
    %115 = vector.shape_cast %114 : vector<32xf32> to vector<32x1xf32>
    %cst_49 = arith.constant 3.200000e+01 : f32
    %116 = vector.broadcast %cst_49 : f32 to vector<32x1xf32>
    %117 = arith.divf %115, %116 : vector<32x1xf32>
    %118 = vector.broadcast %110 : vector<32x1xf32> to vector<32x32xf32>
    %119 = arith.subf %92, %118 : vector<32x32xf32>
    %cst_50 = arith.constant 9.99999974E-6 : f32
    %120 = vector.broadcast %cst_50 : f32 to vector<32x1xf32>
    %121 = arith.addf %117, %120 : vector<32x1xf32>
    %122 = math.rsqrt %121 : vector<32x1xf32>
    %123 = vector.broadcast %122 : vector<32x1xf32> to vector<32x32xf32>
    %124 = arith.mulf %119, %123 : vector<32x32xf32>
    %125 = vector.broadcast %105 : vector<1x32xf32> to vector<32x32xf32>
    %126 = arith.mulf %124, %125 : vector<32x32xf32>
    %127 = vector.broadcast %106 : vector<1x32xf32> to vector<32x32xf32>
    %128 = arith.addf %126, %127 : vector<32x32xf32>
    %cst_51 = arith.constant 0.000000e+00 : f32
    %129 = vector.broadcast %cst_51 : f32 to vector<32x32xf32>
    %c0_52 = arith.constant 0 : index
    %c0_53 = arith.constant 0 : index
    %c0_54 = arith.constant 0 : index
    %130 = vector.load %arg5[%c0_52, %c0_53, %c0_54] : memref<12x32x16xf32, #tpu.memory_space<vmem>>, vector<1x32x16xf32>
    %131 = vector.shape_cast %130 : vector<1x32x16xf32> to vector<32x16xf32>
    %cst_55 = arith.constant dense<0.000000e+00> : vector<32x16xf32>
    %132 = tpu.matmul %128, %131, %cst_55 {dimension_numbers = #tpu.dot_dimension_numbers<[1], [0], [0], [1], [0, 0, 1, 1], [], []>} : vector<32x32xf32>, vector<32x16xf32>, vector<32x16xf32> -> vector<32x16xf32>
    %c0_56 = arith.constant 0 : index
    %c0_57 = arith.constant 0 : index
    %c0_58 = arith.constant 0 : index
    %133 = vector.load %arg6[%c0_56, %c0_57, %c0_58] : memref<12x1x16xf32, #tpu.memory_space<vmem>>, vector<1x1x16xf32>
    %134 = vector.shape_cast %133 : vector<1x1x16xf32> to vector<1x16xf32>
    %135 = vector.broadcast %134 : vector<1x16xf32> to vector<32x16xf32>
    %136 = arith.addf %132, %135 : vector<32x16xf32>
    %c4 = arith.constant 4 : index
    %c0_59 = arith.constant 0 : index
    %c0_60 = arith.constant 0 : index
    %137 = vector.load %arg5[%c4, %c0_59, %c0_60] : memref<12x32x16xf32, #tpu.memory_space<vmem>>, vector<1x32x16xf32>
    %138 = vector.shape_cast %137 : vector<1x32x16xf32> to vector<32x16xf32>
    %cst_61 = arith.constant dense<0.000000e+00> : vector<32x16xf32>
    %139 = tpu.matmul %128, %138, %cst_61 {dimension_numbers = #tpu.dot_dimension_numbers<[1], [0], [0], [1], [0, 0, 1, 1], [], []>} : vector<32x32xf32>, vector<32x16xf32>, vector<32x16xf32> -> vector<32x16xf32>
    %c4_62 = arith.constant 4 : index
    %c0_63 = arith.constant 0 : index
    %c0_64 = arith.constant 0 : index
    %140 = vector.load %arg6[%c4_62, %c0_63, %c0_64] : memref<12x1x16xf32, #tpu.memory_space<vmem>>, vector<1x1x16xf32>
    %141 = vector.shape_cast %140 : vector<1x1x16xf32> to vector<1x16xf32>
    %142 = vector.broadcast %141 : vector<1x16xf32> to vector<32x16xf32>
    %143 = arith.addf %139, %142 : vector<32x16xf32>
    %c8 = arith.constant 8 : index
    %c0_65 = arith.constant 0 : index
    %c0_66 = arith.constant 0 : index
    %144 = vector.load %arg5[%c8, %c0_65, %c0_66] : memref<12x32x16xf32, #tpu.memory_space<vmem>>, vector<1x32x16xf32>
    %145 = vector.shape_cast %144 : vector<1x32x16xf32> to vector<32x16xf32>
    %cst_67 = arith.constant dense<0.000000e+00> : vector<32x16xf32>
    %146 = tpu.matmul %128, %145, %cst_67 {dimension_numbers = #tpu.dot_dimension_numbers<[1], [0], [0], [1], [0, 0, 1, 1], [], []>} : vector<32x32xf32>, vector<32x16xf32>, vector<32x16xf32> -> vector<32x16xf32>
    %c8_68 = arith.constant 8 : index
    %c0_69 = arith.constant 0 : index
    %c0_70 = arith.constant 0 : index
    %147 = vector.load %arg6[%c8_68, %c0_69, %c0_70] : memref<12x1x16xf32, #tpu.memory_space<vmem>>, vector<1x1x16xf32>
    %148 = vector.shape_cast %147 : vector<1x1x16xf32> to vector<1x16xf32>
    %149 = vector.broadcast %148 : vector<1x16xf32> to vector<32x16xf32>
    %150 = arith.addf %146, %149 : vector<32x16xf32>
    %cst_71 = arith.constant dense<0.000000e+00> : vector<32x32xf32>
    %151 = tpu.matmul %136, %143, %cst_71 {dimension_numbers = #tpu.dot_dimension_numbers<[1], [1], [0], [0], [0, 0, 1, 0], [], []>} : vector<32x16xf32>, vector<32x16xf32>, vector<32x32xf32> -> vector<32x32xf32>
    %152 = arith.addf %151, %102 : vector<32x32xf32>
    %cst_72 = arith.constant dense<0xFF800000> : vector<32xf32>
    %153 = vector.multi_reduction <maximumf>, %152, %cst_72 [1] : vector<32x32xf32> to vector<32xf32>
    %154 = vector.shape_cast %153 : vector<32xf32> to vector<32x1xf32>
    %155 = vector.broadcast %154 : vector<32x1xf32> to vector<32x32xf32>
    %156 = arith.subf %152, %155 : vector<32x32xf32>
    %157 = math.exp %156 : vector<32x32xf32>
    %cst_73 = arith.constant dense<0.000000e+00> : vector<32xf32>
    %158 = vector.multi_reduction <add>, %157, %cst_73 [1] : vector<32x32xf32> to vector<32xf32>
    %159 = vector.shape_cast %158 : vector<32xf32> to vector<32x1xf32>
    %160 = tpu.reciprocal %159 {approx = true} : vector<32x1xf32> -> vector<32x1xf32>
    %161 = vector.broadcast %160 : vector<32x1xf32> to vector<32x32xf32>
    %162 = arith.mulf %157, %161 : vector<32x32xf32>
    %cst_74 = arith.constant dense<0.000000e+00> : vector<32x16xf32>
    %163 = tpu.matmul %162, %150, %cst_74 {dimension_numbers = #tpu.dot_dimension_numbers<[1], [0], [0], [1], [0, 0, 1, 1], [], []>} : vector<32x32xf32>, vector<32x16xf32>, vector<32x16xf32> -> vector<32x16xf32>
    %c0_75 = arith.constant 0 : index
    %c0_76 = arith.constant 0 : index
    %c0_77 = arith.constant 0 : index
    %164 = vector.load %arg7[%c0_75, %c0_76, %c0_77] : memref<4x16x32xf32, #tpu.memory_space<vmem>>, vector<1x16x32xf32>
    %165 = vector.shape_cast %164 : vector<1x16x32xf32> to vector<16x32xf32>
    %cst_78 = arith.constant dense<0.000000e+00> : vector<32x32xf32>
    %166 = tpu.matmul %163, %165, %cst_78 {dimension_numbers = #tpu.dot_dimension_numbers<[1], [0], [0], [1], [0, 0, 1, 1], [], []>} : vector<32x16xf32>, vector<16x32xf32>, vector<32x32xf32> -> vector<32x32xf32>
    %167 = arith.addf %129, %166 : vector<32x32xf32>
    %c1_79 = arith.constant 1 : index
    %c0_80 = arith.constant 0 : index
    %c0_81 = arith.constant 0 : index
    %168 = vector.load %arg5[%c1_79, %c0_80, %c0_81] : memref<12x32x16xf32, #tpu.memory_space<vmem>>, vector<1x32x16xf32>
    %169 = vector.shape_cast %168 : vector<1x32x16xf32> to vector<32x16xf32>
    %cst_82 = arith.constant dense<0.000000e+00> : vector<32x16xf32>
    %170 = tpu.matmul %128, %169, %cst_82 {dimension_numbers = #tpu.dot_dimension_numbers<[1], [0], [0], [1], [0, 0, 1, 1], [], []>} : vector<32x32xf32>, vector<32x16xf32>, vector<32x16xf32> -> vector<32x16xf32>
    %c1_83 = arith.constant 1 : index
    %c0_84 = arith.constant 0 : index
    %c0_85 = arith.constant 0 : index
    %171 = vector.load %arg6[%c1_83, %c0_84, %c0_85] : memref<12x1x16xf32, #tpu.memory_space<vmem>>, vector<1x1x16xf32>
    %172 = vector.shape_cast %171 : vector<1x1x16xf32> to vector<1x16xf32>
    %173 = vector.broadcast %172 : vector<1x16xf32> to vector<32x16xf32>
    %174 = arith.addf %170, %173 : vector<32x16xf32>
    %c5 = arith.constant 5 : index
    %c0_86 = arith.constant 0 : index
    %c0_87 = arith.constant 0 : index
    %175 = vector.load %arg5[%c5, %c0_86, %c0_87] : memref<12x32x16xf32, #tpu.memory_space<vmem>>, vector<1x32x16xf32>
    %176 = vector.shape_cast %175 : vector<1x32x16xf32> to vector<32x16xf32>
    %cst_88 = arith.constant dense<0.000000e+00> : vector<32x16xf32>
    %177 = tpu.matmul %128, %176, %cst_88 {dimension_numbers = #tpu.dot_dimension_numbers<[1], [0], [0], [1], [0, 0, 1, 1], [], []>} : vector<32x32xf32>, vector<32x16xf32>, vector<32x16xf32> -> vector<32x16xf32>
    %c5_89 = arith.constant 5 : index
    %c0_90 = arith.constant 0 : index
    %c0_91 = arith.constant 0 : index
    %178 = vector.load %arg6[%c5_89, %c0_90, %c0_91] : memref<12x1x16xf32, #tpu.memory_space<vmem>>, vector<1x1x16xf32>
    %179 = vector.shape_cast %178 : vector<1x1x16xf32> to vector<1x16xf32>
    %180 = vector.broadcast %179 : vector<1x16xf32> to vector<32x16xf32>
    %181 = arith.addf %177, %180 : vector<32x16xf32>
    %c9 = arith.constant 9 : index
    %c0_92 = arith.constant 0 : index
    %c0_93 = arith.constant 0 : index
    %182 = vector.load %arg5[%c9, %c0_92, %c0_93] : memref<12x32x16xf32, #tpu.memory_space<vmem>>, vector<1x32x16xf32>
    %183 = vector.shape_cast %182 : vector<1x32x16xf32> to vector<32x16xf32>
    %cst_94 = arith.constant dense<0.000000e+00> : vector<32x16xf32>
    %184 = tpu.matmul %128, %183, %cst_94 {dimension_numbers = #tpu.dot_dimension_numbers<[1], [0], [0], [1], [0, 0, 1, 1], [], []>} : vector<32x32xf32>, vector<32x16xf32>, vector<32x16xf32> -> vector<32x16xf32>
    %c9_95 = arith.constant 9 : index
    %c0_96 = arith.constant 0 : index
    %c0_97 = arith.constant 0 : index
    %185 = vector.load %arg6[%c9_95, %c0_96, %c0_97] : memref<12x1x16xf32, #tpu.memory_space<vmem>>, vector<1x1x16xf32>
    %186 = vector.shape_cast %185 : vector<1x1x16xf32> to vector<1x16xf32>
    %187 = vector.broadcast %186 : vector<1x16xf32> to vector<32x16xf32>
    %188 = arith.addf %184, %187 : vector<32x16xf32>
    %cst_98 = arith.constant dense<0.000000e+00> : vector<32x32xf32>
    %189 = tpu.matmul %174, %181, %cst_98 {dimension_numbers = #tpu.dot_dimension_numbers<[1], [1], [0], [0], [0, 0, 1, 0], [], []>} : vector<32x16xf32>, vector<32x16xf32>, vector<32x32xf32> -> vector<32x32xf32>
    %190 = arith.addf %189, %102 : vector<32x32xf32>
    %cst_99 = arith.constant dense<0xFF800000> : vector<32xf32>
    %191 = vector.multi_reduction <maximumf>, %190, %cst_99 [1] : vector<32x32xf32> to vector<32xf32>
    %192 = vector.shape_cast %191 : vector<32xf32> to vector<32x1xf32>
    %193 = vector.broadcast %192 : vector<32x1xf32> to vector<32x32xf32>
    %194 = arith.subf %190, %193 : vector<32x32xf32>
    %195 = math.exp %194 : vector<32x32xf32>
    %cst_100 = arith.constant dense<0.000000e+00> : vector<32xf32>
    %196 = vector.multi_reduction <add>, %195, %cst_100 [1] : vector<32x32xf32> to vector<32xf32>
    %197 = vector.shape_cast %196 : vector<32xf32> to vector<32x1xf32>
    %198 = tpu.reciprocal %197 {approx = true} : vector<32x1xf32> -> vector<32x1xf32>
    %199 = vector.broadcast %198 : vector<32x1xf32> to vector<32x32xf32>
    %200 = arith.mulf %195, %199 : vector<32x32xf32>
    %cst_101 = arith.constant dense<0.000000e+00> : vector<32x16xf32>
    %201 = tpu.matmul %200, %188, %cst_101 {dimension_numbers = #tpu.dot_dimension_numbers<[1], [0], [0], [1], [0, 0, 1, 1], [], []>} : vector<32x32xf32>, vector<32x16xf32>, vector<32x16xf32> -> vector<32x16xf32>
    %c1_102 = arith.constant 1 : index
    %c0_103 = arith.constant 0 : index
    %c0_104 = arith.constant 0 : index
    %202 = vector.load %arg7[%c1_102, %c0_103, %c0_104] : memref<4x16x32xf32, #tpu.memory_space<vmem>>, vector<1x16x32xf32>
    %203 = vector.shape_cast %202 : vector<1x16x32xf32> to vector<16x32xf32>
    %cst_105 = arith.constant dense<0.000000e+00> : vector<32x32xf32>
    %204 = tpu.matmul %201, %203, %cst_105 {dimension_numbers = #tpu.dot_dimension_numbers<[1], [0], [0], [1], [0, 0, 1, 1], [], []>} : vector<32x16xf32>, vector<16x32xf32>, vector<32x32xf32> -> vector<32x32xf32>
    %205 = arith.addf %167, %204 : vector<32x32xf32>
    %206 = arith.addf %92, %205 : vector<32x32xf32>
    %207 = vector.extract_strided_slice %104 {offsets = [4, 0], sizes = [1, 32], strides = [1, 1]} : vector<6x32xf32> to vector<1x32xf32>
    %208 = vector.broadcast %207 : vector<1x32xf32> to vector<32x32xf32>
    %209 = arith.addf %206, %208 : vector<32x32xf32>
    %210 = vector.extract_strided_slice %104 {offsets = [2, 0], sizes = [1, 32], strides = [1, 1]} : vector<6x32xf32> to vector<1x32xf32>
    %211 = vector.extract_strided_slice %104 {offsets = [3, 0], sizes = [1, 32], strides = [1, 1]} : vector<6x32xf32> to vector<1x32xf32>
    %cst_106 = arith.constant dense<0.000000e+00> : vector<32xf32>
    %212 = vector.multi_reduction <add>, %209, %cst_106 [1] : vector<32x32xf32> to vector<32xf32>
    %213 = vector.shape_cast %212 : vector<32xf32> to vector<32x1xf32>
    %cst_107 = arith.constant 3.200000e+01 : f32
    %214 = vector.broadcast %cst_107 : f32 to vector<32x1xf32>
    %215 = arith.divf %213, %214 : vector<32x1xf32>
    %216 = vector.broadcast %215 : vector<32x1xf32> to vector<32x32xf32>
    %217 = arith.subf %209, %216 : vector<32x32xf32>
    %218 = arith.mulf %217, %217 : vector<32x32xf32>
    %cst_108 = arith.constant dense<0.000000e+00> : vector<32xf32>
    %219 = vector.multi_reduction <add>, %218, %cst_108 [1] : vector<32x32xf32> to vector<32xf32>
    %220 = vector.shape_cast %219 : vector<32xf32> to vector<32x1xf32>
    %cst_109 = arith.constant 3.200000e+01 : f32
    %221 = vector.broadcast %cst_109 : f32 to vector<32x1xf32>
    %222 = arith.divf %220, %221 : vector<32x1xf32>
    %223 = vector.broadcast %215 : vector<32x1xf32> to vector<32x32xf32>
    %224 = arith.subf %209, %223 : vector<32x32xf32>
    %cst_110 = arith.constant 9.99999974E-6 : f32
    %225 = vector.broadcast %cst_110 : f32 to vector<32x1xf32>
    %226 = arith.addf %222, %225 : vector<32x1xf32>
    %227 = math.rsqrt %226 : vector<32x1xf32>
    %228 = vector.broadcast %227 : vector<32x1xf32> to vector<32x32xf32>
    %229 = arith.mulf %224, %228 : vector<32x32xf32>
    %230 = vector.broadcast %210 : vector<1x32xf32> to vector<32x32xf32>
    %231 = arith.mulf %229, %230 : vector<32x32xf32>
    %232 = vector.broadcast %211 : vector<1x32xf32> to vector<32x32xf32>
    %233 = arith.addf %231, %232 : vector<32x32xf32>
    %c0_111 = arith.constant 0 : index
    %c0_112 = arith.constant 0 : index
    %c0_113 = arith.constant 0 : index
    %234 = vector.load %arg8[%c0_111, %c0_112, %c0_113] : memref<2x32x128xf32, #tpu.memory_space<vmem>>, vector<1x32x128xf32>
    %235 = vector.shape_cast %234 : vector<1x32x128xf32> to vector<32x128xf32>
    %cst_114 = arith.constant dense<0.000000e+00> : vector<32x128xf32>
    %236 = tpu.matmul %233, %235, %cst_114 {dimension_numbers = #tpu.dot_dimension_numbers<[1], [0], [0], [1], [0, 0, 1, 1], [], []>} : vector<32x32xf32>, vector<32x128xf32>, vector<32x128xf32> -> vector<32x128xf32>
    %c0_115 = arith.constant 0 : index
    %c0_116 = arith.constant 0 : index
    %c0_117 = arith.constant 0 : index
    %237 = vector.load %arg9[%c0_115, %c0_116, %c0_117] : memref<2x1x128xf32, #tpu.memory_space<vmem>>, vector<1x1x128xf32>
    %238 = vector.shape_cast %237 : vector<1x1x128xf32> to vector<1x128xf32>
    %239 = vector.broadcast %238 : vector<1x128xf32> to vector<32x128xf32>
    %240 = arith.addf %236, %239 : vector<32x128xf32>
    %cst_118 = arith.constant 5.000000e-01 : f32
    %241 = vector.broadcast %cst_118 : f32 to vector<32x128xf32>
    %242 = arith.mulf %241, %240 : vector<32x128xf32>
    %cst_119 = arith.constant 4.471500e-02 : f32
    %243 = vector.broadcast %cst_119 : f32 to vector<32x128xf32>
    %244 = arith.mulf %243, %240 : vector<32x128xf32>
    %245 = arith.mulf %244, %240 : vector<32x128xf32>
    %246 = arith.mulf %245, %240 : vector<32x128xf32>
    %247 = arith.addf %240, %246 : vector<32x128xf32>
    %cst_120 = arith.constant 0.797884583 : f32
    %248 = vector.broadcast %cst_120 : f32 to vector<32x128xf32>
    %249 = arith.mulf %248, %247 : vector<32x128xf32>
    %250 = math.tanh %249 : vector<32x128xf32>
    %cst_121 = arith.constant 1.000000e+00 : f32
    %251 = vector.broadcast %cst_121 : f32 to vector<32x128xf32>
    %252 = arith.addf %251, %250 : vector<32x128xf32>
    %253 = arith.mulf %242, %252 : vector<32x128xf32>
    %c0_122 = arith.constant 0 : index
    %c0_123 = arith.constant 0 : index
    %c0_124 = arith.constant 0 : index
    %254 = vector.load %arg10[%c0_122, %c0_123, %c0_124] : memref<2x128x32xf32, #tpu.memory_space<vmem>>, vector<1x128x32xf32>
    %255 = vector.shape_cast %254 : vector<1x128x32xf32> to vector<128x32xf32>
    %cst_125 = arith.constant dense<0.000000e+00> : vector<32x32xf32>
    %256 = tpu.matmul %253, %255, %cst_125 {dimension_numbers = #tpu.dot_dimension_numbers<[1], [0], [0], [1], [0, 0, 1, 1], [], []>} : vector<32x128xf32>, vector<128x32xf32>, vector<32x32xf32> -> vector<32x32xf32>
    %257 = arith.addf %209, %256 : vector<32x32xf32>
    %258 = vector.extract_strided_slice %104 {offsets = [5, 0], sizes = [1, 32], strides = [1, 1]} : vector<6x32xf32> to vector<1x32xf32>
    %259 = vector.broadcast %258 : vector<1x32xf32> to vector<32x32xf32>
    %260 = arith.addf %257, %259 : vector<32x32xf32>
    %c1_126 = arith.constant 1 : index
    %c0_127 = arith.constant 0 : index
    %c0_128 = arith.constant 0 : index
    %261 = vector.load %arg11[%c1_126, %c0_127, %c0_128] : memref<2x6x32xf32, #tpu.memory_space<vmem>>, vector<1x6x32xf32>
    %262 = vector.shape_cast %261 : vector<1x6x32xf32> to vector<6x32xf32>
    %263 = vector.extract_strided_slice %262 {offsets = [0, 0], sizes = [1, 32], strides = [1, 1]} : vector<6x32xf32> to vector<1x32xf32>
    %264 = vector.extract_strided_slice %262 {offsets = [1, 0], sizes = [1, 32], strides = [1, 1]} : vector<6x32xf32> to vector<1x32xf32>
    %cst_129 = arith.constant dense<0.000000e+00> : vector<32xf32>
    %265 = vector.multi_reduction <add>, %260, %cst_129 [1] : vector<32x32xf32> to vector<32xf32>
    %266 = vector.shape_cast %265 : vector<32xf32> to vector<32x1xf32>
    %cst_130 = arith.constant 3.200000e+01 : f32
    %267 = vector.broadcast %cst_130 : f32 to vector<32x1xf32>
    %268 = arith.divf %266, %267 : vector<32x1xf32>
    %269 = vector.broadcast %268 : vector<32x1xf32> to vector<32x32xf32>
    %270 = arith.subf %260, %269 : vector<32x32xf32>
    %271 = arith.mulf %270, %270 : vector<32x32xf32>
    %cst_131 = arith.constant dense<0.000000e+00> : vector<32xf32>
    %272 = vector.multi_reduction <add>, %271, %cst_131 [1] : vector<32x32xf32> to vector<32xf32>
    %273 = vector.shape_cast %272 : vector<32xf32> to vector<32x1xf32>
    %cst_132 = arith.constant 3.200000e+01 : f32
    %274 = vector.broadcast %cst_132 : f32 to vector<32x1xf32>
    %275 = arith.divf %273, %274 : vector<32x1xf32>
    %276 = vector.broadcast %268 : vector<32x1xf32> to vector<32x32xf32>
    %277 = arith.subf %260, %276 : vector<32x32xf32>
    %cst_133 = arith.constant 9.99999974E-6 : f32
    %278 = vector.broadcast %cst_133 : f32 to vector<32x1xf32>
    %279 = arith.addf %275, %278 : vector<32x1xf32>
    %280 = math.rsqrt %279 : vector<32x1xf32>
    %281 = vector.broadcast %280 : vector<32x1xf32> to vector<32x32xf32>
    %282 = arith.mulf %277, %281 : vector<32x32xf32>
    %283 = vector.broadcast %263 : vector<1x32xf32> to vector<32x32xf32>
    %284 = arith.mulf %282, %283 : vector<32x32xf32>
    %285 = vector.broadcast %264 : vector<1x32xf32> to vector<32x32xf32>
    %286 = arith.addf %284, %285 : vector<32x32xf32>
    %cst_134 = arith.constant 0.000000e+00 : f32
    %287 = vector.broadcast %cst_134 : f32 to vector<32x32xf32>
    %c2 = arith.constant 2 : index
    %c0_135 = arith.constant 0 : index
    %c0_136 = arith.constant 0 : index
    %288 = vector.load %arg5[%c2, %c0_135, %c0_136] : memref<12x32x16xf32, #tpu.memory_space<vmem>>, vector<1x32x16xf32>
    %289 = vector.shape_cast %288 : vector<1x32x16xf32> to vector<32x16xf32>
    %cst_137 = arith.constant dense<0.000000e+00> : vector<32x16xf32>
    %290 = tpu.matmul %286, %289, %cst_137 {dimension_numbers = #tpu.dot_dimension_numbers<[1], [0], [0], [1], [0, 0, 1, 1], [], []>} : vector<32x32xf32>, vector<32x16xf32>, vector<32x16xf32> -> vector<32x16xf32>
    %c2_138 = arith.constant 2 : index
    %c0_139 = arith.constant 0 : index
    %c0_140 = arith.constant 0 : index
    %291 = vector.load %arg6[%c2_138, %c0_139, %c0_140] : memref<12x1x16xf32, #tpu.memory_space<vmem>>, vector<1x1x16xf32>
    %292 = vector.shape_cast %291 : vector<1x1x16xf32> to vector<1x16xf32>
    %293 = vector.broadcast %292 : vector<1x16xf32> to vector<32x16xf32>
    %294 = arith.addf %290, %293 : vector<32x16xf32>
    %c6 = arith.constant 6 : index
    %c0_141 = arith.constant 0 : index
    %c0_142 = arith.constant 0 : index
    %295 = vector.load %arg5[%c6, %c0_141, %c0_142] : memref<12x32x16xf32, #tpu.memory_space<vmem>>, vector<1x32x16xf32>
    %296 = vector.shape_cast %295 : vector<1x32x16xf32> to vector<32x16xf32>
    %cst_143 = arith.constant dense<0.000000e+00> : vector<32x16xf32>
    %297 = tpu.matmul %286, %296, %cst_143 {dimension_numbers = #tpu.dot_dimension_numbers<[1], [0], [0], [1], [0, 0, 1, 1], [], []>} : vector<32x32xf32>, vector<32x16xf32>, vector<32x16xf32> -> vector<32x16xf32>
    %c6_144 = arith.constant 6 : index
    %c0_145 = arith.constant 0 : index
    %c0_146 = arith.constant 0 : index
    %298 = vector.load %arg6[%c6_144, %c0_145, %c0_146] : memref<12x1x16xf32, #tpu.memory_space<vmem>>, vector<1x1x16xf32>
    %299 = vector.shape_cast %298 : vector<1x1x16xf32> to vector<1x16xf32>
    %300 = vector.broadcast %299 : vector<1x16xf32> to vector<32x16xf32>
    %301 = arith.addf %297, %300 : vector<32x16xf32>
    %c10 = arith.constant 10 : index
    %c0_147 = arith.constant 0 : index
    %c0_148 = arith.constant 0 : index
    %302 = vector.load %arg5[%c10, %c0_147, %c0_148] : memref<12x32x16xf32, #tpu.memory_space<vmem>>, vector<1x32x16xf32>
    %303 = vector.shape_cast %302 : vector<1x32x16xf32> to vector<32x16xf32>
    %cst_149 = arith.constant dense<0.000000e+00> : vector<32x16xf32>
    %304 = tpu.matmul %286, %303, %cst_149 {dimension_numbers = #tpu.dot_dimension_numbers<[1], [0], [0], [1], [0, 0, 1, 1], [], []>} : vector<32x32xf32>, vector<32x16xf32>, vector<32x16xf32> -> vector<32x16xf32>
    %c10_150 = arith.constant 10 : index
    %c0_151 = arith.constant 0 : index
    %c0_152 = arith.constant 0 : index
    %305 = vector.load %arg6[%c10_150, %c0_151, %c0_152] : memref<12x1x16xf32, #tpu.memory_space<vmem>>, vector<1x1x16xf32>
    %306 = vector.shape_cast %305 : vector<1x1x16xf32> to vector<1x16xf32>
    %307 = vector.broadcast %306 : vector<1x16xf32> to vector<32x16xf32>
    %308 = arith.addf %304, %307 : vector<32x16xf32>
    %cst_153 = arith.constant dense<0.000000e+00> : vector<32x32xf32>
    %309 = tpu.matmul %294, %301, %cst_153 {dimension_numbers = #tpu.dot_dimension_numbers<[1], [1], [0], [0], [0, 0, 1, 0], [], []>} : vector<32x16xf32>, vector<32x16xf32>, vector<32x32xf32> -> vector<32x32xf32>
    %310 = arith.addf %309, %102 : vector<32x32xf32>
    %cst_154 = arith.constant dense<0xFF800000> : vector<32xf32>
    %311 = vector.multi_reduction <maximumf>, %310, %cst_154 [1] : vector<32x32xf32> to vector<32xf32>
    %312 = vector.shape_cast %311 : vector<32xf32> to vector<32x1xf32>
    %313 = vector.broadcast %312 : vector<32x1xf32> to vector<32x32xf32>
    %314 = arith.subf %310, %313 : vector<32x32xf32>
    %315 = math.exp %314 : vector<32x32xf32>
    %cst_155 = arith.constant dense<0.000000e+00> : vector<32xf32>
    %316 = vector.multi_reduction <add>, %315, %cst_155 [1] : vector<32x32xf32> to vector<32xf32>
    %317 = vector.shape_cast %316 : vector<32xf32> to vector<32x1xf32>
    %318 = tpu.reciprocal %317 {approx = true} : vector<32x1xf32> -> vector<32x1xf32>
    %319 = vector.broadcast %318 : vector<32x1xf32> to vector<32x32xf32>
    %320 = arith.mulf %315, %319 : vector<32x32xf32>
    %cst_156 = arith.constant dense<0.000000e+00> : vector<32x16xf32>
    %321 = tpu.matmul %320, %308, %cst_156 {dimension_numbers = #tpu.dot_dimension_numbers<[1], [0], [0], [1], [0, 0, 1, 1], [], []>} : vector<32x32xf32>, vector<32x16xf32>, vector<32x16xf32> -> vector<32x16xf32>
    %c2_157 = arith.constant 2 : index
    %c0_158 = arith.constant 0 : index
    %c0_159 = arith.constant 0 : index
    %322 = vector.load %arg7[%c2_157, %c0_158, %c0_159] : memref<4x16x32xf32, #tpu.memory_space<vmem>>, vector<1x16x32xf32>
    %323 = vector.shape_cast %322 : vector<1x16x32xf32> to vector<16x32xf32>
    %cst_160 = arith.constant dense<0.000000e+00> : vector<32x32xf32>
    %324 = tpu.matmul %321, %323, %cst_160 {dimension_numbers = #tpu.dot_dimension_numbers<[1], [0], [0], [1], [0, 0, 1, 1], [], []>} : vector<32x16xf32>, vector<16x32xf32>, vector<32x32xf32> -> vector<32x32xf32>
    %325 = arith.addf %287, %324 : vector<32x32xf32>
    %c3 = arith.constant 3 : index
    %c0_161 = arith.constant 0 : index
    %c0_162 = arith.constant 0 : index
    %326 = vector.load %arg5[%c3, %c0_161, %c0_162] : memref<12x32x16xf32, #tpu.memory_space<vmem>>, vector<1x32x16xf32>
    %327 = vector.shape_cast %326 : vector<1x32x16xf32> to vector<32x16xf32>
    %cst_163 = arith.constant dense<0.000000e+00> : vector<32x16xf32>
    %328 = tpu.matmul %286, %327, %cst_163 {dimension_numbers = #tpu.dot_dimension_numbers<[1], [0], [0], [1], [0, 0, 1, 1], [], []>} : vector<32x32xf32>, vector<32x16xf32>, vector<32x16xf32> -> vector<32x16xf32>
    %c3_164 = arith.constant 3 : index
    %c0_165 = arith.constant 0 : index
    %c0_166 = arith.constant 0 : index
    %329 = vector.load %arg6[%c3_164, %c0_165, %c0_166] : memref<12x1x16xf32, #tpu.memory_space<vmem>>, vector<1x1x16xf32>
    %330 = vector.shape_cast %329 : vector<1x1x16xf32> to vector<1x16xf32>
    %331 = vector.broadcast %330 : vector<1x16xf32> to vector<32x16xf32>
    %332 = arith.addf %328, %331 : vector<32x16xf32>
    %c7 = arith.constant 7 : index
    %c0_167 = arith.constant 0 : index
    %c0_168 = arith.constant 0 : index
    %333 = vector.load %arg5[%c7, %c0_167, %c0_168] : memref<12x32x16xf32, #tpu.memory_space<vmem>>, vector<1x32x16xf32>
    %334 = vector.shape_cast %333 : vector<1x32x16xf32> to vector<32x16xf32>
    %cst_169 = arith.constant dense<0.000000e+00> : vector<32x16xf32>
    %335 = tpu.matmul %286, %334, %cst_169 {dimension_numbers = #tpu.dot_dimension_numbers<[1], [0], [0], [1], [0, 0, 1, 1], [], []>} : vector<32x32xf32>, vector<32x16xf32>, vector<32x16xf32> -> vector<32x16xf32>
    %c7_170 = arith.constant 7 : index
    %c0_171 = arith.constant 0 : index
    %c0_172 = arith.constant 0 : index
    %336 = vector.load %arg6[%c7_170, %c0_171, %c0_172] : memref<12x1x16xf32, #tpu.memory_space<vmem>>, vector<1x1x16xf32>
    %337 = vector.shape_cast %336 : vector<1x1x16xf32> to vector<1x16xf32>
    %338 = vector.broadcast %337 : vector<1x16xf32> to vector<32x16xf32>
    %339 = arith.addf %335, %338 : vector<32x16xf32>
    %c11 = arith.constant 11 : index
    %c0_173 = arith.constant 0 : index
    %c0_174 = arith.constant 0 : index
    %340 = vector.load %arg5[%c11, %c0_173, %c0_174] : memref<12x32x16xf32, #tpu.memory_space<vmem>>, vector<1x32x16xf32>
    %341 = vector.shape_cast %340 : vector<1x32x16xf32> to vector<32x16xf32>
    %cst_175 = arith.constant dense<0.000000e+00> : vector<32x16xf32>
    %342 = tpu.matmul %286, %341, %cst_175 {dimension_numbers = #tpu.dot_dimension_numbers<[1], [0], [0], [1], [0, 0, 1, 1], [], []>} : vector<32x32xf32>, vector<32x16xf32>, vector<32x16xf32> -> vector<32x16xf32>
    %c11_176 = arith.constant 11 : index
    %c0_177 = arith.constant 0 : index
    %c0_178 = arith.constant 0 : index
    %343 = vector.load %arg6[%c11_176, %c0_177, %c0_178] : memref<12x1x16xf32, #tpu.memory_space<vmem>>, vector<1x1x16xf32>
    %344 = vector.shape_cast %343 : vector<1x1x16xf32> to vector<1x16xf32>
    %345 = vector.broadcast %344 : vector<1x16xf32> to vector<32x16xf32>
    %346 = arith.addf %342, %345 : vector<32x16xf32>
    %cst_179 = arith.constant dense<0.000000e+00> : vector<32x32xf32>
    %347 = tpu.matmul %332, %339, %cst_179 {dimension_numbers = #tpu.dot_dimension_numbers<[1], [1], [0], [0], [0, 0, 1, 0], [], []>} : vector<32x16xf32>, vector<32x16xf32>, vector<32x32xf32> -> vector<32x32xf32>
    %348 = arith.addf %347, %102 : vector<32x32xf32>
    %cst_180 = arith.constant dense<0xFF800000> : vector<32xf32>
    %349 = vector.multi_reduction <maximumf>, %348, %cst_180 [1] : vector<32x32xf32> to vector<32xf32>
    %350 = vector.shape_cast %349 : vector<32xf32> to vector<32x1xf32>
    %351 = vector.broadcast %350 : vector<32x1xf32> to vector<32x32xf32>
    %352 = arith.subf %348, %351 : vector<32x32xf32>
    %353 = math.exp %352 : vector<32x32xf32>
    %cst_181 = arith.constant dense<0.000000e+00> : vector<32xf32>
    %354 = vector.multi_reduction <add>, %353, %cst_181 [1] : vector<32x32xf32> to vector<32xf32>
    %355 = vector.shape_cast %354 : vector<32xf32> to vector<32x1xf32>
    %356 = tpu.reciprocal %355 {approx = true} : vector<32x1xf32> -> vector<32x1xf32>
    %357 = vector.broadcast %356 : vector<32x1xf32> to vector<32x32xf32>
    %358 = arith.mulf %353, %357 : vector<32x32xf32>
    %cst_182 = arith.constant dense<0.000000e+00> : vector<32x16xf32>
    %359 = tpu.matmul %358, %346, %cst_182 {dimension_numbers = #tpu.dot_dimension_numbers<[1], [0], [0], [1], [0, 0, 1, 1], [], []>} : vector<32x32xf32>, vector<32x16xf32>, vector<32x16xf32> -> vector<32x16xf32>
    %c3_183 = arith.constant 3 : index
    %c0_184 = arith.constant 0 : index
    %c0_185 = arith.constant 0 : index
    %360 = vector.load %arg7[%c3_183, %c0_184, %c0_185] : memref<4x16x32xf32, #tpu.memory_space<vmem>>, vector<1x16x32xf32>
    %361 = vector.shape_cast %360 : vector<1x16x32xf32> to vector<16x32xf32>
    %cst_186 = arith.constant dense<0.000000e+00> : vector<32x32xf32>
    %362 = tpu.matmul %359, %361, %cst_186 {dimension_numbers = #tpu.dot_dimension_numbers<[1], [0], [0], [1], [0, 0, 1, 1], [], []>} : vector<32x16xf32>, vector<16x32xf32>, vector<32x32xf32> -> vector<32x32xf32>
    %363 = arith.addf %325, %362 : vector<32x32xf32>
    %364 = arith.addf %260, %363 : vector<32x32xf32>
    %365 = vector.extract_strided_slice %262 {offsets = [4, 0], sizes = [1, 32], strides = [1, 1]} : vector<6x32xf32> to vector<1x32xf32>
    %366 = vector.broadcast %365 : vector<1x32xf32> to vector<32x32xf32>
    %367 = arith.addf %364, %366 : vector<32x32xf32>
    %368 = vector.extract_strided_slice %262 {offsets = [2, 0], sizes = [1, 32], strides = [1, 1]} : vector<6x32xf32> to vector<1x32xf32>
    %369 = vector.extract_strided_slice %262 {offsets = [3, 0], sizes = [1, 32], strides = [1, 1]} : vector<6x32xf32> to vector<1x32xf32>
    %cst_187 = arith.constant dense<0.000000e+00> : vector<32xf32>
    %370 = vector.multi_reduction <add>, %367, %cst_187 [1] : vector<32x32xf32> to vector<32xf32>
    %371 = vector.shape_cast %370 : vector<32xf32> to vector<32x1xf32>
    %cst_188 = arith.constant 3.200000e+01 : f32
    %372 = vector.broadcast %cst_188 : f32 to vector<32x1xf32>
    %373 = arith.divf %371, %372 : vector<32x1xf32>
    %374 = vector.broadcast %373 : vector<32x1xf32> to vector<32x32xf32>
    %375 = arith.subf %367, %374 : vector<32x32xf32>
    %376 = arith.mulf %375, %375 : vector<32x32xf32>
    %cst_189 = arith.constant dense<0.000000e+00> : vector<32xf32>
    %377 = vector.multi_reduction <add>, %376, %cst_189 [1] : vector<32x32xf32> to vector<32xf32>
    %378 = vector.shape_cast %377 : vector<32xf32> to vector<32x1xf32>
    %cst_190 = arith.constant 3.200000e+01 : f32
    %379 = vector.broadcast %cst_190 : f32 to vector<32x1xf32>
    %380 = arith.divf %378, %379 : vector<32x1xf32>
    %381 = vector.broadcast %373 : vector<32x1xf32> to vector<32x32xf32>
    %382 = arith.subf %367, %381 : vector<32x32xf32>
    %cst_191 = arith.constant 9.99999974E-6 : f32
    %383 = vector.broadcast %cst_191 : f32 to vector<32x1xf32>
    %384 = arith.addf %380, %383 : vector<32x1xf32>
    %385 = math.rsqrt %384 : vector<32x1xf32>
    %386 = vector.broadcast %385 : vector<32x1xf32> to vector<32x32xf32>
    %387 = arith.mulf %382, %386 : vector<32x32xf32>
    %388 = vector.broadcast %368 : vector<1x32xf32> to vector<32x32xf32>
    %389 = arith.mulf %387, %388 : vector<32x32xf32>
    %390 = vector.broadcast %369 : vector<1x32xf32> to vector<32x32xf32>
    %391 = arith.addf %389, %390 : vector<32x32xf32>
    %c1_192 = arith.constant 1 : index
    %c0_193 = arith.constant 0 : index
    %c0_194 = arith.constant 0 : index
    %392 = vector.load %arg8[%c1_192, %c0_193, %c0_194] : memref<2x32x128xf32, #tpu.memory_space<vmem>>, vector<1x32x128xf32>
    %393 = vector.shape_cast %392 : vector<1x32x128xf32> to vector<32x128xf32>
    %cst_195 = arith.constant dense<0.000000e+00> : vector<32x128xf32>
    %394 = tpu.matmul %391, %393, %cst_195 {dimension_numbers = #tpu.dot_dimension_numbers<[1], [0], [0], [1], [0, 0, 1, 1], [], []>} : vector<32x32xf32>, vector<32x128xf32>, vector<32x128xf32> -> vector<32x128xf32>
    %c1_196 = arith.constant 1 : index
    %c0_197 = arith.constant 0 : index
    %c0_198 = arith.constant 0 : index
    %395 = vector.load %arg9[%c1_196, %c0_197, %c0_198] : memref<2x1x128xf32, #tpu.memory_space<vmem>>, vector<1x1x128xf32>
    %396 = vector.shape_cast %395 : vector<1x1x128xf32> to vector<1x128xf32>
    %397 = vector.broadcast %396 : vector<1x128xf32> to vector<32x128xf32>
    %398 = arith.addf %394, %397 : vector<32x128xf32>
    %cst_199 = arith.constant 5.000000e-01 : f32
    %399 = vector.broadcast %cst_199 : f32 to vector<32x128xf32>
    %400 = arith.mulf %399, %398 : vector<32x128xf32>
    %cst_200 = arith.constant 4.471500e-02 : f32
    %401 = vector.broadcast %cst_200 : f32 to vector<32x128xf32>
    %402 = arith.mulf %401, %398 : vector<32x128xf32>
    %403 = arith.mulf %402, %398 : vector<32x128xf32>
    %404 = arith.mulf %403, %398 : vector<32x128xf32>
    %405 = arith.addf %398, %404 : vector<32x128xf32>
    %cst_201 = arith.constant 0.797884583 : f32
    %406 = vector.broadcast %cst_201 : f32 to vector<32x128xf32>
    %407 = arith.mulf %406, %405 : vector<32x128xf32>
    %408 = math.tanh %407 : vector<32x128xf32>
    %cst_202 = arith.constant 1.000000e+00 : f32
    %409 = vector.broadcast %cst_202 : f32 to vector<32x128xf32>
    %410 = arith.addf %409, %408 : vector<32x128xf32>
    %411 = arith.mulf %400, %410 : vector<32x128xf32>
    %c1_203 = arith.constant 1 : index
    %c0_204 = arith.constant 0 : index
    %c0_205 = arith.constant 0 : index
    %412 = vector.load %arg10[%c1_203, %c0_204, %c0_205] : memref<2x128x32xf32, #tpu.memory_space<vmem>>, vector<1x128x32xf32>
    %413 = vector.shape_cast %412 : vector<1x128x32xf32> to vector<128x32xf32>
    %cst_206 = arith.constant dense<0.000000e+00> : vector<32x32xf32>
    %414 = tpu.matmul %411, %413, %cst_206 {dimension_numbers = #tpu.dot_dimension_numbers<[1], [0], [0], [1], [0, 0, 1, 1], [], []>} : vector<32x128xf32>, vector<128x32xf32>, vector<32x32xf32> -> vector<32x32xf32>
    %415 = arith.addf %367, %414 : vector<32x32xf32>
    %416 = vector.extract_strided_slice %262 {offsets = [5, 0], sizes = [1, 32], strides = [1, 1]} : vector<6x32xf32> to vector<1x32xf32>
    %417 = vector.broadcast %416 : vector<1x32xf32> to vector<32x32xf32>
    %418 = arith.addf %415, %417 : vector<32x32xf32>
    %419 = vector.extract_strided_slice %2 {offsets = [0, 0], sizes = [1, 32], strides = [1, 1]} : vector<6x32xf32> to vector<1x32xf32>
    %420 = vector.extract_strided_slice %2 {offsets = [1, 0], sizes = [1, 32], strides = [1, 1]} : vector<6x32xf32> to vector<1x32xf32>
    %cst_207 = arith.constant dense<0.000000e+00> : vector<32xf32>
    %421 = vector.multi_reduction <add>, %418, %cst_207 [1] : vector<32x32xf32> to vector<32xf32>
    %422 = vector.shape_cast %421 : vector<32xf32> to vector<32x1xf32>
    %cst_208 = arith.constant 3.200000e+01 : f32
    %423 = vector.broadcast %cst_208 : f32 to vector<32x1xf32>
    %424 = arith.divf %422, %423 : vector<32x1xf32>
    %425 = vector.broadcast %424 : vector<32x1xf32> to vector<32x32xf32>
    %426 = arith.subf %418, %425 : vector<32x32xf32>
    %427 = arith.mulf %426, %426 : vector<32x32xf32>
    %cst_209 = arith.constant dense<0.000000e+00> : vector<32xf32>
    %428 = vector.multi_reduction <add>, %427, %cst_209 [1] : vector<32x32xf32> to vector<32xf32>
    %429 = vector.shape_cast %428 : vector<32xf32> to vector<32x1xf32>
    %cst_210 = arith.constant 3.200000e+01 : f32
    %430 = vector.broadcast %cst_210 : f32 to vector<32x1xf32>
    %431 = arith.divf %429, %430 : vector<32x1xf32>
    %432 = vector.broadcast %424 : vector<32x1xf32> to vector<32x32xf32>
    %433 = arith.subf %418, %432 : vector<32x32xf32>
    %cst_211 = arith.constant 9.99999974E-6 : f32
    %434 = vector.broadcast %cst_211 : f32 to vector<32x1xf32>
    %435 = arith.addf %431, %434 : vector<32x1xf32>
    %436 = math.rsqrt %435 : vector<32x1xf32>
    %437 = vector.broadcast %436 : vector<32x1xf32> to vector<32x32xf32>
    %438 = arith.mulf %433, %437 : vector<32x32xf32>
    %439 = vector.broadcast %419 : vector<1x32xf32> to vector<32x32xf32>
    %440 = arith.mulf %438, %439 : vector<32x32xf32>
    %441 = vector.broadcast %420 : vector<1x32xf32> to vector<32x32xf32>
    %442 = arith.addf %440, %441 : vector<32x32xf32>
    %443 = vector.extract_strided_slice %2 {offsets = [5, 0], sizes = [1, 1], strides = [1, 1]} : vector<6x32xf32> to vector<1x1xf32>
    %cst_212 = arith.constant 0.000000e+00 : f32
    %444 = vector.broadcast %cst_212 : f32 to vector<1x1xf32>
    %445 = arith.subf %444, %443 : vector<1x1xf32>
    %446 = math.exp %445 : vector<1x1xf32>
    %cst_213 = arith.constant 1.000000e+00 : f32
    %447 = vector.broadcast %cst_213 : f32 to vector<1x1xf32>
    %448 = arith.addf %447, %446 : vector<1x1xf32>
    %449 = tpu.reciprocal %448 : vector<1x1xf32> -> vector<1x1xf32>
    %450 = tpu.iota {dimensions = array<i32: 0>} : vector<2x32xi32>
    %451 = tpu.iota {dimensions = array<i32: 1>} : vector<2x32xi32>
    %c16_i32_214 = arith.constant 16 : i32
    %452 = vector.broadcast %c16_i32_214 : i32 to vector<2x32xi32>
    %453 = arith.muli %450, %452 : vector<2x32xi32>
    %c10_i32_215 = arith.constant 10 : i32
    %454 = vector.broadcast %c10_i32_215 : i32 to vector<2x32xi32>
    %455 = arith.addi %453, %454 : vector<2x32xi32>
    %456 = arith.cmpi eq, %451, %455 : vector<2x32xi32>
    %cst_216 = arith.constant 0.000000e+00 : f32
    %457 = vector.shape_cast %449 : vector<1x1xf32> to vector<1x1xf32>
    %458 = vector.broadcast %457 : vector<1x1xf32> to vector<2x32xf32>
    %459 = vector.broadcast %cst_216 : f32 to vector<2x32xf32>
    %460 = arith.select %456, %458, %459 : vector<2x32xi1>, vector<2x32xf32>
    %c16_i32_217 = arith.constant 16 : i32
    %461 = vector.broadcast %c16_i32_217 : i32 to vector<2x32xi32>
    %462 = arith.muli %450, %461 : vector<2x32xi32>
    %c9_i32 = arith.constant 9 : i32
    %463 = vector.broadcast %c9_i32 : i32 to vector<2x32xi32>
    %464 = arith.addi %462, %463 : vector<2x32xi32>
    %465 = arith.cmpi eq, %451, %464 : vector<2x32xi32>
    %cst_218 = arith.constant 1.000000e+00 : f32
    %466 = vector.broadcast %cst_218 : f32 to vector<1x1xf32>
    %467 = arith.subf %466, %449 : vector<1x1xf32>
    %cst_219 = arith.constant 0.000000e+00 : f32
    %468 = vector.shape_cast %467 : vector<1x1xf32> to vector<1x1xf32>
    %469 = vector.broadcast %468 : vector<1x1xf32> to vector<2x32xf32>
    %470 = vector.broadcast %cst_219 : f32 to vector<2x32xf32>
    %471 = arith.select %465, %469, %470 : vector<2x32xi1>, vector<2x32xf32>
    %472 = arith.addf %460, %471 : vector<2x32xf32>
    %cst_220 = arith.constant dense<0.000000e+00> : vector<2x32xf32>
    %473 = tpu.matmul %472, %442, %cst_220 {dimension_numbers = #tpu.dot_dimension_numbers<[1], [0], [0], [1], [0, 0, 1, 1], [], []>} : vector<2x32xf32>, vector<32x32xf32>, vector<2x32xf32> -> vector<2x32xf32>
    %c0_221 = arith.constant 0 : index
    %c0_222 = arith.constant 0 : index
    %474 = vector.load %arg13[%c0_221, %c0_222] : memref<32x2xf32, #tpu.memory_space<vmem>>, vector<32x2xf32>
    %cst_223 = arith.constant dense<0.000000e+00> : vector<2x2xf32>
    %475 = tpu.matmul %473, %474, %cst_223 {dimension_numbers = #tpu.dot_dimension_numbers<[1], [0], [0], [1], [0, 0, 1, 1], [], []>} : vector<2x32xf32>, vector<32x2xf32>, vector<2x2xf32> -> vector<2x2xf32>
    %476 = vector.extract_strided_slice %2 {offsets = [4, 0], sizes = [1, 2], strides = [1, 1]} : vector<6x32xf32> to vector<1x2xf32>
    %477 = vector.broadcast %476 : vector<1x2xf32> to vector<2x2xf32>
    %478 = arith.addf %475, %477 : vector<2x2xf32>
    %c0_224 = arith.constant 0 : index
    %c0_225 = arith.constant 0 : index
    %479 = vector.load %arg14[%c0_224, %c0_225] : memref<2x2xf32, #tpu.memory_space<vmem>>, vector<2x2xf32>
    tpu.vector_store %arg14[%c0_224, %c0_225], %478 {strides = array<i32>} : memref<2x2xf32, #tpu.memory_space<vmem>>, vector<2x2xf32>,
    return
  }
}

</mosaic_0001>

<bundles_post_ra>
// kernel: meteor_forward.1
= control target key start
LH: loop header
LB: loop body
LE: loop exit
PB: predicated region body
PF: predicated region fallthrough
CT: control target
= control target key end

     0   :  { %vm52_vm0 = vcmask 254976   ;;  %v2856_v3 = vmov 0   ;;  %s3962_s0 = inlined_call_operand.vmem [shape: f32[2,2,1], index: 0, kind: input, shape index: {}]   ;;  %s3963_s1 = inlined_call_operand.vmem [shape: f32[2,32], index: 1, kind: input, shape index: {}]   ;;  %s3964_s2 = inlined_call_operand.vmem [shape: f32[2,32], index: 2, kind: input, shape index: {}]   ;;  %s3965_s3 = inlined_call_operand.vmem [shape: f32[128,32], index: 3, kind: input, shape index: {}]   ;;  %s3966_s4 = inlined_call_operand.vmem [shape: f32[32,32], index: 4, kind: input, shape index: {}]   ;;  %s3967_s5 = inlined_call_operand.vmem [shape: f32[12,32,16], index: 5, kind: input, shape index: {}]   ;;  %s3968_s6 = inlined_call_operand.vmem [shape: f32[12,1,16], index: 6, kind: input, shape index: {}]   ;;  %s3969_s7 = inlined_call_operand.vmem [shape: f32[4,16,32], index: 7, kind: input, shape index: {}]   ;;  %s3970_s8 = inlined_call_operand.vmem [shape: f32[2,32,128], index: 8, kind: input, shape index: {}]   ;;  %s3971_s9 = inlined_call_operand.vmem [shape: f32[2,1,128], index: 9, kind: input, shape index: {}]   ;;  %s3972_s10 = inlined_call_operand.vmem [shape: f32[2,128,32], index: 10, kind: input, shape index: {}]   ;;  %s3973_s11 = inlined_call_operand.vmem [shape: f32[2,6,32], index: 11, kind: input, shape index: {}]   ;;  %s3974_s12 = inlined_call_operand.vmem [shape: f32[6,32], index: 12, kind: input, shape index: {}]   ;;  %s3975_s13 = inlined_call_operand.vmem [shape: f32[32,2], index: 13, kind: input, shape index: {}]   ;;  %s3976_s14 = inlined_call_operand.hbm [shape: f32[2,2], index: 14, kind: output, shape index: {}]  }
   0x1   :  { %v2940_v0 = vld [vmem:[%s3963_s1] sm:$0x3]  ;;  %2677 = vset.pattern.permute.xlu1 %v2856_v3  ;;  %2678 = vset.pattern.permute.xlu0 %v2856_v3 }
   0x2   :  { %v51_v1 = vmul.f32 %v2940_v0, %v2940_v0  ;;  %v2947_v2 = vld [vmem:[%s3964_s2] sm:$0x3] }
   0x3   :  { %v82_v4 = vld [vmem:[%s3962_s0] sm:$0x3]  ;;  %v67_v6 = vmul.f32 %v2947_v2, %v2947_v2 }
   0x4   :  { %85 = vperm.xlu1 %2677, %v82_v4   ;;  %v53_v5 = vsel %vm52_vm0, %v51_v1, 0.0 }
   0x5   :  { %54 = vadd.xlane.f32.xlu0 %v53_v5 }
   0x6   :  { %19 = vsyncpa [#allocation3], 0  ;;  %v2451_v7 = vld [vmem:[%s3962_s0 + $0x2] sm:$0x3]  ;;  %v68_v8 = vsel %vm52_vm0, %v67_v6, 0.0  ;;  %v156_v9 = vld [vmem:[%s3965_s3 + $0x58] sm:$0xff] }
   0x7   :  { %172 = vmatpush.msra.mxu2 %v156_v9  ;;  %v155_v10 = vld [vmem:[%s3965_s3 + $0x50] sm:$0xff]  ;;  %v105_v11 = vld [vmem:[%s3965_s3 + $0x38] sm:$0xff]  ;;  %v154_v13 = vld [vmem:[%s3965_s3 + $0x48] sm:$0xff]  ;;  %vm106_vm1 = vcmask 261120   ;;  %vm271_vm11 = vcmask 1041408   ;;  %vm258_vm12 = vcmask 15360  }
   0x8   :  { %v101_v12 = vld [vmem:[%s3965_s3 + $0x18] sm:$0xff]  ;;  %122 = vmatpush.msra.mxu0 %v105_v11  ;;  %v104_v14 = vld [vmem:[%s3965_s3 + $0x30] sm:$0xff]  ;;  %v153_v16 = vld [vmem:[%s3965_s3 + $0x40] sm:$0xff]  ;;  %s2861_s17 = smov [#allocation2]   ;;  %s2442_s2 = sshll.u32 %s3976_s14, 4  ;;  %s2443_s2 = int_to_ptr.hbm [resolvable:$true] %s2442_s2 }
   0x9   :  { %173 = vmatpush.msra.mxu2 %v155_v10  ;;  %145 = vmatpush.msra.mxu1 %v101_v12  ;;  %v100_v15 = vld [vmem:[%s3965_s3 + $0x10] sm:$0xff]  ;;  %v103_v17 = vld [vmem:[%s3965_s3 + $0x28] sm:$0xff]  ;;  %v102_v19 = vld [vmem:[%s3965_s3 + $0x20] sm:$0xff]  ;;  %v2857_v12 = vmov -1.0   ;;  %s2440_s18 = sshll.u32 %s2861_s17, 4  ;;  %s2441_s18 = int_to_ptr.vmem [resolvable:$true] %s2440_s18 }
   0xa   :  { %123 = vmatpush.msra.mxu0 %v104_v14  ;;  %v99_v18 = vld [vmem:[%s3965_s3 + $0x8] sm:$0xff]  ;;  %v98_v20 = vld [vmem:[%s3965_s3] sm:$0xff]  ;;  %v212_v44 = vld [vmem:[%s3965_s3 + $0x78] sm:$0xff] }
   0xb   :  { %174 = vmatpush.msra.mxu2 %v154_v13  ;;  %146 = vmatpush.msra.mxu1 %v100_v15  ;;  %v211_v45 = vld [vmem:[%s3965_s3 + $0x70] sm:$0xff]  ;;  %v210_v46 = vld [vmem:[%s3965_s3 + $0x68] sm:$0xff]  ;;  %v209_v47 = vld [vmem:[%s3965_s3 + $0x60] sm:$0xff] }
   0xc   :  { %93 = vperm.xlu1 %2677, %v2451_v7   ;;  %124 = vmatpush.msra.mxu0 %v103_v17  ;;  %v50_v49 = vld [vmem:[%s3974_s12] sm:$0x3f] }
   0xd   :  { %69 = vadd.xlane.f32.xlu0 %v68_v8  ;;  %175 = vmatpush.msra.mxu2 %v153_v16  ;;  %v181_v53 = vperm.slane %v50_v49, 2 }
   0xe   :  { %2454 = vmatmul.msk.f32.vlgmr.msra.gmra.mxu2 %vm106_vm1, %v2947_v2  ;;  %147 = vmatpush.msra.mxu1 %v99_v18  ;;  %v237_v18 = vlaneseq }
   0xf   :  { %125 = vmatpush.msra.mxu0 %v102_v19  ;;  %229 = vmatpush.msra.mxu3 %v212_v44 }
  0x10   :  { %148 = vmatpush.msra.mxu1 %v98_v20  ;;  %v3016_v19 = vand.u32 127, %v237_v18  ;;  %v3018_v20 = vshrl.u32 %v237_v18, 7  ;;  %v2476_v18 = vld [vmem:[%s3967_s5 + $0x110] sm:$0xff] }
  0x11   :  { %2453 = vmatmul.msk.f32.vlgmr.msra.gmra.mxu1 %vm106_vm1, %v2940_v0  ;;  %230 = vmatpush.msra.mxu3 %v211_v45 }
  0x13   :  { %231 = vmatpush.msra.mxu3 %v210_v46  ;;  %v257_v46 = vld [vmem:[%s3966_s4 + $0x18] sm:$0xff] }
  0x15   :  { %232 = vmatpush.msra.mxu3 %v209_v47 }
  0x76   :  { %v86_v31 = vpop.permute.xlu1 %85 }
  0x78   :  { %v55_v21 = vpop.xlane.xlu0 %54 }
  0x79   :  { %2693 = vrsqrt.f32 %v55_v21  ;;  %vm62_vm3 = vweird.f32 %v55_v21 }
  0x7e   :  { %v94_v40 = vpop.permute.xlu1 %93 }
  0x7f   :  { %v2694_v22 = vpop.eup %2693 }
  0x80   :  { %v57_v23 = vmul.f32 %v2694_v22, %v55_v21  ;;  %v70_v24 = vpop.xlane.xlu0 %69  ;;  %vm63_vm2 = vweird.f32 %v2694_v22  ;;  %v244_v21 = vmul.u32 16, %v3016_v19 }
  0x81   :  { %2695 = vrsqrt.f32 %v70_v24  ;;  %vm64_vm4 = vmor %vm62_vm3, %vm63_vm2  ;;  %vm77_vm6 = vweird.f32 %v70_v24 }
  0x82   :  { %v58_v25 = vmul.f32 %v2694_v22, %v57_v23  ;;  %v3022_v23 = vadd.s32 16, %v3018_v20 }
  0x84   :  { %v59_v26 = vmul.f32 0.5, %v58_v25 }
  0x86   :  { %v60_v27 = vsub.f32 1.5, %v59_v26 }
  0x87   :  { %v2696_v28 = vpop.eup %2695 }
  0x88   :  { %v72_v29 = vmul.f32 %v2696_v28, %v70_v24  ;;  %v61_v32 = vmul.f32 %v2694_v22, %v60_v27  ;;  %vm78_vm5 = vweird.f32 %v2696_v28  ;;  %v213_v24 = vperm.slane %v50_v49, 3 }
  0x89   :  { %vm79_vm7 = vmor %vm77_vm6, %vm78_vm5  ;;  %v2858_v27 = vmov 0.0  }
  0x8a   :  { %v73_v30 = vmul.f32 %v2696_v28, %v72_v29  ;;  %v65_v35 = vsel %vm64_vm4, %v2694_v22, %v61_v32  ;;  %v245_v22 = vadd.s32 10, %v244_v21  ;;  %v435_v21 = vld [vmem:[%s3967_s5 + $0x8] sm:$0xff] }
  0x8b   :  { %v66_v37 = vmul.f32 %v65_v35, %v2940_v0 }
  0x8c   :  { %v74_v33 = vmul.f32 0.5, %v73_v30  ;;  %vm246_vm9 = vcmp.eq.s32.totalorder %v3018_v20, %v245_v22  ;;  %vm248_vm10 = vcmp.eq.s32.totalorder %v3022_v23, %v245_v22  ;;  %v3027_v30 = vadd.s32 8, %v3018_v20 }
  0x8d   :  { %v88_v41 = vmul.f32 %v86_v31, %v66_v37  ;;  %v252_v29 = vsel %vm248_vm10, 1.0, %v2858_v27  ;;  %v3030_v31 = vadd.s32 24, %v3018_v20 }
  0x8e   :  { %v75_v34 = vsub.f32 1.5, %v74_v33  ;;  %v150_v48 = vpop.f32.mrf.mxu1  ;;  %vm247_vm13 = vcmp.eq.s32.totalorder %v3027_v30, %v245_v22 }
  0x8f   :  { %vm249_vm14 = vcmp.eq.s32.totalorder %v3030_v31, %v245_v22  ;;  %v251_v32 = vsel %vm247_vm13, 1.0, %v2858_v27  ;;  %v2466_v22 = vld [vmem:[%s3967_s5 + $0x88] sm:$0xff]  ;;  %vm561_vm13 = vcmask 130048  }
  0x90   :  { %v76_v36 = vmul.f32 %v2696_v28, %v75_v34  ;;  %v253_v33 = vsel %vm249_vm14, 1.0, %v2858_v27  ;;  %v254_v34 = vld [vmem:[%s3966_s4] sm:$0xff] }
  0x91   :  { %v177_v51 = vpop.f32.mrf.mxu2 }
  0x92   :  { %v80_v38 = vsel %vm79_vm7, %v2696_v28, %v76_v36  ;;  %v250_v28 = vsel %vm246_vm9, 1.0, %v2858_v27  ;;  %v2474_v27 = vld [vmem:[%s3967_s5 + $0x100] sm:$0xff] }
  0x93   :  { %v81_v39 = vmul.f32 %v80_v38, %v2947_v2  ;;  %v256_v38 = vld [vmem:[%s3966_s4 + $0x10] sm:$0xff] }
  0x95   :  { %v96_v42 = vmul.f32 %v94_v40, %v81_v39  ;;  %v255_v40 = vld [vmem:[%s3966_s4 + $0x8] sm:$0xff] }
  0x97   :  { %v97_v43 = vadd.f32 %v96_v42, %v88_v41 }
  0x99   :  { %2452 = vmatmul.msk.f32.vlgmr.msra.gmra.mxu0 %vm106_vm1, %v97_v43 }
 0x116   :  { %v127_v50 = vpop.f32.mrf.mxu0 }
 0x117   :  { %v151_v52 = vadd.f32 %v150_v48, %v127_v50  ;;  %v2859_v50 = vmov 32.0  }
 0x119   :  { %v180_v54 = vadd.f32 %v177_v51, %v151_v52 }
 0x11b   :  { %v182_v55 = vadd.f32 %v181_v53, %v180_v54 }
 0x11d   :  { %v184_v56 = vmul.f32 0.70710677, %v182_v55  ;;  %v183_v15 = vmul.f32 0.5, %v182_v55 }
 0x11f   :  { %v187_v57 = vand.u32 2147483647, %v184_v56  ;;  %vm185_vm8 = vcmp.ge.f32.partialorder %v184_v56, 0.0 }
 0x120   :  { %v186_v13 = vsel %vm185_vm8, 1.0, %v2857_v12 }
 0x121   :  { %v188_v58 = vmul.f32 0.3275911, %v187_v57  ;;  %v200_v61 = vsub.f32 0.0, %v187_v57 }
 0x123   :  { %v189_v59 = vadd.f32 1.0, %v188_v58  ;;  %v201_v0 = vmul.f32 %v200_v61, %v187_v57 }
 0x125   :  { %2697 = vrcp.f32 %v189_v59  ;;  %v202_v3 = vmul.f32 1.442695, %v201_v0 }
 0x127   :  { %2699 = vpow2.f32 %v202_v3 }
 0x128   :  { %2701 = vrcp.f32 %v2859_v50 }
 0x12b   :  { %v2698_v60 = vpop.eup %2697 }
 0x12c   :  { %v191_v62 = vmul.f32 1.0614054, %v2698_v60 }
 0x12d   :  { %v2700_v9 = vpop.eup %2699 }
 0x12e   :  { %v192_v63 = vadd.f32 -1.4531521, %v191_v62  ;;  %v2702_v51 = vpop.eup %2701 }
 0x12f   :  { %v342_v52 = vmul.f32 32.0, %v2702_v51  ;;  %vm346_vm15 = vweird.f32 %v2702_v51 }
 0x130   :  { %v193_v1 = vmul.f32 %v2698_v60, %v192_v63 }
 0x131   :  { %v343_v53 = vsub.f32 1.0, %v342_v52 }
 0x132   :  { %v194_v2 = vadd.f32 1.4214138, %v193_v1 }
 0x133   :  { %v344_v54 = vmul.f32 %v2702_v51, %v343_v53 }
 0x134   :  { %v195_v4 = vmul.f32 %v2698_v60, %v194_v2 }
 0x135   :  { %v345_v55 = vadd.f32 %v2702_v51, %v344_v54 }
 0x136   :  { %v196_v5 = vadd.f32 -0.28449672, %v195_v4 }
 0x137   :  { %v3062_v56 = vsel %vm346_vm15, %v2702_v51, %v345_v55  ;;  %vm316_vm15 = vcmp.le.s32.totalorder %v3016_v19, %v3018_v20 }
 0x138   :  { %v197_v6 = vmul.f32 %v2698_v60, %v196_v5 }
 0x13a   :  { %v198_v7 = vadd.f32 0.2548296, %v197_v6 }
 0x13c   :  { %v199_v8 = vmul.f32 %v2698_v60, %v198_v7 }
 0x13e   :  { %v204_v10 = vmul.f32 %v2700_v9, %v199_v8 }
 0x140   :  { %v205_v11 = vsub.f32 1.0, %v204_v10 }
 0x142   :  { %v206_v14 = vmul.f32 %v205_v11, %v186_v13  ;;  %v437_v13 = vld [vmem:[%s3967_s5 + $0x18] sm:$0xff] }
 0x143   :  { %466 = vmatpush.msrb.mxu1 %v437_v13 }
 0x144   :  { %v207_v16 = vadd.f32 1.0, %v206_v14  ;;  %v2468_v14 = vld [vmem:[%s3967_s5 + $0x98] sm:$0xff] }
 0x145   :  { %505 = vmatpush.msrb.mxu2 %v2468_v14 }
 0x146   :  { %v208_v17 = vmul.f32 %v207_v16, %v183_v15  ;;  %v2477_v15 = vld [vmem:[%s3967_s5 + $0x118] sm:$0xff]  ;;  %v436_v16 = vld [vmem:[%s3967_s5 + $0x10] sm:$0xff] }
 0x147   :  { %467 = vmatpush.msrb.mxu1 %v436_v16  ;;  %v2495_v16 = vld [vmem:[%s3967_s5 + $0x20] sm:$0xff] }
 0x148   :  { %2455 = vmatmul.msk.f32.vlgmr.msra.gmra.mxu3 %vm106_vm1, %v208_v17  ;;  %v2467_v17 = vld [vmem:[%s3967_s5 + $0x90] sm:$0xff] }
 0x149   :  { %506 = vmatpush.msrb.mxu2 %v2467_v17  ;;  %468 = vmatpush.msrb.mxu1 %v435_v21  ;;  %v2504_v21 = vld [vmem:[%s3967_s5 + $0xa0] sm:$0xff] }
 0x14b   :  { %507 = vmatpush.msrb.mxu2 %v2466_v22 }
 0x1cb   :  { %v234_v25 = vpop.f32.mrf.mxu3 }
 0x1cc   :  { %v235_v26 = vadd.f32 %v234_v25, %v213_v24  ;;  %v2475_v24 = vld [vmem:[%s3967_s5 + $0x108] sm:$0xff]  ;;  %v434_v25 = vld [vmem:[%s3967_s5] sm:$0xff] }
 0x1cd   :  { %469 = vmatpush.msrb.mxu1 %v434_v25 }
 0x1ce   :  { %2456 = vmatpush.msk.msrb.mxu0 %vm271_vm11, %v235_v26  ;;  %2666 = vmatpush.msk.msrb.mxu3 %vm271_vm11, %v235_v26  ;;  %v2465_v26 = vld [vmem:[%s3967_s5 + $0x80] sm:$0xff] }
 0x1cf   :  { %2457 = vmatmul.msk.f32.vlgmr.msrb.gmra.mxu0 %vm258_vm12, %v250_v28  ;;  %2459 = vmatmul.msk.f32.vlgmr.msrb.gmra.mxu3 %vm258_vm12, %v252_v29 }
 0x1d0   :  { %544 = vmatpush.msra.mxu3 %v2477_v15  ;;  %508 = vmatpush.msrb.mxu2 %v2465_v26 }
 0x1d2   :  { %545 = vmatpush.msra.mxu3 %v2476_v18 }
 0x1d4   :  { %546 = vmatpush.msra.mxu3 %v2475_v24 }
 0x1d6   :  { %547 = vmatpush.msra.mxu3 %v2474_v27 }
 0x1d7   :  { %2458 = vmatmul.msk.f32.gmra.mxu0 %vm258_vm12, %v251_v32  ;;  %2460 = vmatmul.msk.f32.gmra.mxu3 %vm258_vm12, %v253_v33 }
 0x24c   :  { %v292_v35 = vpop.f32.mrf.mxu0 }
 0x24d   :  { %v3037_v36 = vadd.f32 %v292_v35, %v254_v34 }
 0x24f   :  { %v329_v37 = vsel %vm106_vm1, %v3037_v36, 0.0 }
 0x250   :  { %330 = vadd.xlane.f32.xlu2 %v329_v37 }
 0x252   :  { %v298_v39 = vpop.f32.mrf.mxu3 }
 0x253   :  { %v3047_v41 = vadd.f32 %v298_v39, %v256_v38 }
 0x254   :  { %v295_v42 = vpop.f32.mrf.mxu0 }
 0x255   :  { %v3049_v43 = vadd.f32 %v295_v42, %v255_v40  ;;  %v335_v44 = vsel %vm106_vm1, %v3047_v41, 0.0 }
 0x256   :  { %336 = vadd.xlane.f32.xlu0 %v335_v44 }
 0x257   :  { %v332_v45 = vsel %vm106_vm1, %v3049_v43, 0.0 }
 0x258   :  { %333 = vadd.xlane.f32.xlu2 %v332_v45 }
 0x25a   :  { %v301_v47 = vpop.f32.mrf.mxu3 }
 0x25b   :  { %v3058_v48 = vadd.f32 %v301_v47, %v257_v46 }
 0x25d   :  { %v338_v49 = vsel %vm106_vm1, %v3058_v48, 0.0 }
 0x25e   :  { %339 = vadd.xlane.f32.xlu1 %v338_v49  ;;  %v3135_v49 = vld [vmem:[%s3973_s11] sm:$0x3f] }
 0x2c3   :  { %v331_v57 = vpop.xlane.xlu2 %330 }
 0x2c4   :  { %v348_v58 = vmul.f32 %v3062_v56, %v331_v57  ;;  %v3140_v57 = vperm.slane %v3135_v49, 0 }
 0x2c6   :  { %v3066_v59 = vsub.f32 %v3037_v36, %v348_v58 }
 0x2c8   :  { %v356_v60 = vmul.f32 %v3066_v59, %v3066_v59 }
 0x2c9   :  { %v337_v61 = vpop.xlane.xlu0 %336 }
 0x2ca   :  { %v350_v62 = vmul.f32 %v3062_v56, %v337_v61  ;;  %v360_v63 = vsel %vm106_vm1, %v356_v60, 0.0 }
 0x2cb   :  { %361 = vadd.xlane.f32.xlu2 %v360_v63  ;;  %v334_v0 = vpop.xlane.xlu2 %333  ;;  %v2507_v63 = vld [vmem:[%s3967_s5 + $0xb8] sm:$0xff] }
 0x2cc   :  { %v3073_v1 = vsub.f32 %v3047_v41, %v350_v62  ;;  %v349_v2 = vmul.f32 %v3062_v56, %v334_v0  ;;  %v2498_v62 = vld [vmem:[%s3967_s5 + $0x38] sm:$0xff]  ;;  %v429_v0 = vperm.slane %v3135_v49, 1  ;;  %763 = vmatpush.msrb.mxu3 %v2507_v63 }
 0x2cd   :  { %724 = vmatpush.msra.mxu2 %v2498_v62 }
 0x2ce   :  { %v3077_v3 = vsub.f32 %v3049_v43, %v349_v2  ;;  %v358_v4 = vmul.f32 %v3073_v1, %v3073_v1 }
 0x2d0   :  { %v357_v5 = vmul.f32 %v3077_v3, %v3077_v3  ;;  %v366_v8 = vsel %vm106_vm1, %v358_v4, 0.0 }
 0x2d1   :  { %v340_v6 = vpop.xlane.xlu1 %339 }
 0x2d2   :  { %v351_v7 = vmul.f32 %v3062_v56, %v340_v6  ;;  %v363_v9 = vsel %vm106_vm1, %v357_v5, 0.0  ;;  %v2497_v5 = vld [vmem:[%s3967_s5 + $0x30] sm:$0xff] }
 0x2d3   :  { %367 = vadd.xlane.f32.xlu2 %v366_v8  ;;  %364 = vadd.xlane.f32.xlu0 %v363_v9  ;;  %v2506_v6 = vld [vmem:[%s3967_s5 + $0xb0] sm:$0xff]  ;;  %v2496_v8 = vld [vmem:[%s3967_s5 + $0x28] sm:$0xff] }
 0x2d4   :  { %v3087_v10 = vsub.f32 %v3058_v48, %v351_v7  ;;  %725 = vmatpush.msra.mxu2 %v2497_v5  ;;  %764 = vmatpush.msrb.mxu3 %v2506_v6  ;;  %v2516_v5 = vld [vmem:[%s3967_s5 + $0x138] sm:$0xff] }
 0x2d6   :  { %v359_v11 = vmul.f32 %v3087_v10, %v3087_v10  ;;  %726 = vmatpush.msra.mxu2 %v2496_v8 }
 0x2d8   :  { %v369_v12 = vsel %vm106_vm1, %v359_v11, 0.0  ;;  %727 = vmatpush.msra.mxu2 %v2495_v16 }
 0x2db   :  { %370 = vadd.xlane.f32.xlu0 %v369_v12 }
 0x33e   :  { %v362_v28 = vpop.xlane.xlu2 %361 }
 0x33f   :  { %v372_v29 = vmul.f32 %v362_v28, %v3062_v56 }
 0x341   :  { %v376_v32 = vadd.f32 1e-05, %v372_v29 }
 0x343   :  { %2703 = vrsqrt.f32 %v376_v32  ;;  %vm386_vm2 = vweird.f32 %v376_v32 }
 0x346   :  { %v365_v33 = vpop.xlane.xlu0 %364  ;;  %v368_v34 = vpop.xlane.xlu2 %367 }
 0x347   :  { %v373_v35 = vmul.f32 %v365_v33, %v3062_v56  ;;  %v374_v37 = vmul.f32 %v368_v34, %v3062_v56 }
 0x349   :  { %v2704_v38 = vpop.eup %2703  ;;  %v377_v39 = vadd.f32 1e-05, %v373_v35  ;;  %v378_v40 = vadd.f32 1e-05, %v374_v37 }
 0x34a   :  { %v381_v42 = vmul.f32 %v2704_v38, %v376_v32  ;;  %vm387_vm0 = vweird.f32 %v2704_v38 }
 0x34b   :  { %2705 = vrsqrt.f32 %v377_v39  ;;  %vm388_vm3 = vmor %vm386_vm2, %vm387_vm0  ;;  %vm396_vm5 = vweird.f32 %v377_v39  ;;  %vm406_vm8 = vweird.f32 %v378_v40 }
 0x34c   :  { %v382_v44 = vmul.f32 %v2704_v38, %v381_v42  ;;  %2707 = vrsqrt.f32 %v378_v40 }
 0x34e   :  { %v383_v45 = vmul.f32 0.5, %v382_v44  ;;  %v371_v46 = vpop.xlane.xlu0 %370 }
 0x34f   :  { %v375_v47 = vmul.f32 %v371_v46, %v3062_v56 }
 0x350   :  { %v384_v50 = vsub.f32 1.5, %v383_v45 }
 0x351   :  { %v2706_v51 = vpop.eup %2705  ;;  %v3137_v52 = vadd.f32 1e-05, %v375_v47 }
 0x352   :  { %v2708_v53 = vpop.eup %2707  ;;  %v385_v54 = vmul.f32 %v2704_v38, %v384_v50  ;;  %v391_v55 = vmul.f32 %v2706_v51, %v377_v39  ;;  %vm397_vm4 = vweird.f32 %v2706_v51  ;;  %v2680_v50 = vld [vmem:[%s3968_s6 + $0x4] ss:$0 sm:$0xff] }
 0x353   :  { %v401_v58 = vmul.f32 %v2708_v53, %v378_v40  ;;  %2709 = vrsqrt.f32 %v3137_v52  ;;  %vm407_vm6 = vweird.f32 %v2708_v53  ;;  %vm398_vm7 = vmor %vm396_vm5, %vm397_vm4  ;;  %vm416_vm11 = vweird.f32 %v3137_v52 }
 0x354   :  { %v389_v60 = vsel %vm388_vm3, %v2704_v38, %v385_v54  ;;  %v392_v61 = vmul.f32 %v2706_v51, %v391_v55  ;;  %vm408_vm9 = vmor %vm406_vm8, %vm407_vm6  ;;  %vm317_vm3 = vcmp.le.s32.totalorder %v3016_v19, %v3027_v30  ;;  %vm318_vm6 = vcmp.le.s32.totalorder %v3016_v19, %v3022_v23 }
 0x355   :  { %v420_v2 = vmul.f32 %v389_v60, %v3066_v59  ;;  %v402_v4 = vmul.f32 %v2708_v53, %v401_v58  ;;  %v2505_v59 = vld [vmem:[%s3967_s5 + $0xa8] sm:$0xff] }
 0x356   :  { %v393_v7 = vmul.f32 0.5, %v392_v61  ;;  %765 = vmatpush.msrb.mxu3 %v2505_v59 }
 0x357   :  { %v425_v9 = vmul.f32 %v3140_v57, %v420_v2  ;;  %v403_v11 = vmul.f32 0.5, %v402_v4  ;;  %v2679_v2 = vld [vmem:[%s3968_s6] ss:$0 sm:$0xff] }
 0x358   :  { %v394_v12 = vsub.f32 1.5, %v393_v7  ;;  %766 = vmatpush.msrb.mxu3 %v2504_v21  ;;  %v2515_v7 = vld [vmem:[%s3967_s5 + $0x130] sm:$0xff] }
 0x359   :  { %v2710_v13 = vpop.eup %2709  ;;  %v3164_v14 = vadd.f32 %v429_v0, %v425_v9  ;;  %v404_v15 = vsub.f32 1.5, %v403_v11  ;;  %v2514_v9 = vld [vmem:[%s3967_s5 + $0x128] sm:$0xff]  ;;  %v2513_v11 = vld [vmem:[%s3967_s5 + $0x120] sm:$0xff] }
 0x35a   :  { %v395_v17 = vmul.f32 %v2706_v51, %v394_v12  ;;  %v411_v18 = vmul.f32 %v2710_v13, %v3137_v52  ;;  %vm417_vm10 = vweird.f32 %v2710_v13 }
 0x35b   :  { %v405_v22 = vmul.f32 %v2708_v53, %v404_v15  ;;  %2461 = vmatmul.msk.f32.vlgmr.msrb.gmra.mxu1 %vm106_vm1, %v3164_v14  ;;  %2470 = vmatmul.msk.f32.vlgmr.msrb.gmra.mxu2 %vm106_vm1, %v3164_v14  ;;  %vm418_vm12 = vmor %vm416_vm11, %vm417_vm10 }
 0x35c   :  { %v399_v24 = vsel %vm398_vm7, %v2706_v51, %v395_v17  ;;  %v412_v25 = vmul.f32 %v2710_v13, %v411_v18  ;;  %2479 = vmatmul.msk.f32.vlgmr.msra.gmra.mxu3 %vm106_vm1, %v3164_v14  ;;  %v2681_v51 = vld [vmem:[%s3968_s6 + $0x8] ss:$0 sm:$0xff]  ;;  %v2683_v17 = vld [vmem:[%s3968_s6 + $0x5] ss:$0 sm:$0xff] }
 0x35d   :  { %v421_v26 = vmul.f32 %v399_v24, %v3077_v3  ;;  %v409_v27 = vsel %vm408_vm9, %v2708_v53, %v405_v22  ;;  %vm319_vm9 = vcmp.le.s32.totalorder %v3016_v19, %v3030_v31 }
 0x35e   :  { %v413_v28 = vmul.f32 0.5, %v412_v25  ;;  %v422_v34 = vmul.f32 %v409_v27, %v3073_v1 }
 0x35f   :  { %v426_v29 = vmul.f32 %v3140_v57, %v421_v26 }
 0x360   :  { %v414_v32 = vsub.f32 1.5, %v413_v28  ;;  %v427_v3 = vmul.f32 %v3140_v57, %v422_v34  ;;  %v308_v28 = vxor.u32 %v3016_v19, %v3018_v20 }
 0x361   :  { %v3181_v33 = vadd.f32 %v429_v0, %v426_v29  ;;  %v2860_v29 = vmov -1e+09  }
 0x362   :  { %v415_v35 = vmul.f32 %v2710_v13, %v414_v32  ;;  %v3192_v38 = vadd.f32 %v429_v0, %v427_v3  ;;  %vm312_vm14 = vcmp.lt.s32.totalorder %v308_v28, 16  ;;  %v310_v3 = vxor.u32 %v3016_v19, %v3022_v23 }
 0x363   :  { %2462 = vmatmul.msk.f32.gmra.mxu1 %vm106_vm1, %v3181_v33  ;;  %2471 = vmatmul.msk.f32.gmra.mxu2 %vm106_vm1, %v3181_v33  ;;  %vm320_vm0 = vmand %vm312_vm14, %vm316_vm15 }
 0x364   :  { %2480 = vmatmul.msk.f32.gmra.mxu3 %vm106_vm1, %v3181_v33  ;;  %v419_v37 = vsel %vm418_vm12, %v2710_v13, %v415_v35  ;;  %v3276_v32 = vsel %vm320_vm0, 0.0, %v2860_v29  ;;  %vm314_vm5 = vcmp.lt.s32.totalorder %v310_v3, 16 }
 0x365   :  { %v423_v1 = vmul.f32 %v419_v37, %v3087_v10  ;;  %vm322_vm7 = vmand %vm314_vm5, %vm318_vm6 }
 0x367   :  { %v428_v39 = vmul.f32 %v3140_v57, %v423_v1 }
 0x369   :  { %v3202_v40 = vadd.f32 %v429_v0, %v428_v39  ;;  %v311_v39 = vxor.u32 %v3016_v19, %v3030_v31  ;;  %v2684_v31 = vld [vmem:[%s3968_s6 + $0x9] ss:$0 sm:$0xff] }
 0x36b   :  { %2463 = vmatmul.msk.f32.gmra.mxu1 %vm106_vm1, %v3192_v38  ;;  %2472 = vmatmul.msk.f32.gmra.mxu2 %vm106_vm1, %v3192_v38  ;;  %vm315_vm8 = vcmp.lt.s32.totalorder %v311_v39, 16 }
 0x36c   :  { %2481 = vmatmul.msk.f32.gmra.mxu3 %vm106_vm1, %v3192_v38  ;;  %vm323_vm10 = vmand %vm315_vm8, %vm319_vm9 }
 0x373   :  { %2464 = vmatmul.msk.f32.gmra.mxu1 %vm106_vm1, %v3202_v40  ;;  %2473 = vmatmul.msk.f32.gmra.mxu2 %vm106_vm1, %v3202_v40 }
 0x374   :  { %2482 = vmatmul.msk.f32.gmra.mxu3 %vm106_vm1, %v3202_v40 }
 0x37b   :  { %2500 = vmatmul.msk.f32.vlgmr.msra.gmra.mxu2 %vm106_vm1, %v3164_v14 }
 0x37c   :  { %2509 = vmatmul.msk.f32.vlgmr.msrb.gmra.mxu3 %vm106_vm1, %v3164_v14 }
 0x383   :  { %2501 = vmatmul.msk.f32.gmra.mxu2 %vm106_vm1, %v3181_v33 }
 0x384   :  { %2510 = vmatmul.msk.f32.gmra.mxu3 %vm106_vm1, %v3181_v33 }
 0x38b   :  { %2502 = vmatmul.msk.f32.gmra.mxu2 %vm106_vm1, %v3192_v38 }
 0x38c   :  { %2511 = vmatmul.msk.f32.gmra.mxu3 %vm106_vm1, %v3192_v38 }
 0x393   :  { %2503 = vmatmul.msk.f32.gmra.mxu2 %vm106_vm1, %v3202_v40 }
 0x394   :  { %2512 = vmatmul.msk.f32.gmra.mxu3 %vm106_vm1, %v3202_v40 }
 0x3d8   :  { %v471_v61 = vpop.f32.mrf.mxu1 }
 0x3d9   :  { %v472_v6 = vadd.f32 %v2679_v2, %v471_v61 }
 0x3de   :  { %v510_v10 = vpop.f32.mrf.mxu2 }
 0x3df   :  { %v549_v42 = vpop.f32.mrf.mxu3  ;;  %v511_v4 = vadd.f32 %v2680_v50, %v510_v10 }
 0x3e0   :  { %v550_v62 = vadd.f32 %v2681_v51, %v549_v42  ;;  %v474_v8 = vpop.f32.mrf.mxu1 }
 0x3e1   :  { %v475_v12 = vadd.f32 %v2679_v2, %v474_v8 }
 0x3e6   :  { %v513_v44 = vpop.f32.mrf.mxu2 }
 0x3e7   :  { %v552_v45 = vpop.f32.mrf.mxu3  ;;  %v514_v63 = vadd.f32 %v2680_v50, %v513_v44  ;;  %v3298_v44 = vsel %vm323_vm10, 0.0, %v2860_v29 }
 0x3e8   :  { %v553_v60 = vadd.f32 %v2681_v51, %v552_v45  ;;  %v477_v15 = vpop.f32.mrf.mxu1 }
 0x3e9   :  { %v478_v16 = vadd.f32 %v2679_v2, %v477_v15 }
 0x3ee   :  { %v516_v46 = vpop.f32.mrf.mxu2 }
 0x3ef   :  { %v555_v47 = vpop.f32.mrf.mxu3  ;;  %v517_v58 = vadd.f32 %v2680_v50, %v516_v46 }
 0x3f0   :  { %v556_v57 = vadd.f32 %v2681_v51, %v555_v47  ;;  %v480_v22 = vpop.f32.mrf.mxu1 }
 0x3f1   :  { %v481_v25 = vadd.f32 %v2679_v2, %v480_v22 }
 0x3f6   :  { %v519_v52 = vpop.f32.mrf.mxu2 }
 0x3f7   :  { %v520_v53 = vadd.f32 %v2680_v50, %v519_v52  ;;  %v558_v54 = vpop.f32.mrf.mxu3 }
 0x3f8   :  { %v559_v55 = vadd.f32 %v2681_v51, %v558_v54 }
 0x3f9   :  { %2483 = vmatpush.xpose.msk.msra.mxu0 %vm561_vm13, %v520_v53 }
 0x3fa   :  { %683 = vmatpush.msra.mxu1 %v559_v55 }
 0x3fc   :  { %684 = vmatpush.msra.mxu1 %v556_v57 }
 0x3fd   :  { %2484 = vmatpush.xpose.msk.msra.mxu0 %vm561_vm13, %v517_v58 }
 0x3fe   :  { %685 = vmatpush.msra.mxu1 %v553_v60 }
 0x3ff   :  { %v768_v0 = vpop.f32.mrf.mxu3 }
 0x400   :  { %686 = vmatpush.msra.mxu1 %v550_v62  ;;  %v769_v27 = vadd.f32 %v2683_v17, %v768_v0 }
 0x401   :  { %2485 = vmatpush.xpose.msk.msra.mxu0 %vm561_vm13, %v514_v63 }
 0x405   :  { %2486 = vmatpush.xpose.msk.msra.mxu0 %vm561_vm13, %v511_v4 }
 0x407   :  { %v771_v59 = vpop.f32.mrf.mxu3 }
 0x408   :  { %2487 = vmatmul.msk.f32.vlgmr.msra.gmra.mxu0 %vm561_vm13, %v472_v6  ;;  %v772_v26 = vadd.f32 %v2683_v17, %v771_v59 }
 0x409   :  { %802 = vmatpush.msrb.mxu0 %v2516_v5 }
 0x40b   :  { %803 = vmatpush.msrb.mxu0 %v2515_v7 }
 0x40d   :  { %804 = vmatpush.msrb.mxu0 %v2514_v9 }
 0x40f   :  { %805 = vmatpush.msrb.mxu0 %v2513_v11  ;;  %v774_v13 = vpop.f32.mrf.mxu3 }
 0x410   :  { %2488 = vmatmul.msk.f32.gmra.mxu0 %vm561_vm13, %v475_v12  ;;  %v775_v24 = vadd.f32 %v2683_v17, %v774_v13 }
 0x417   :  { %v777_v18 = vpop.f32.mrf.mxu3 }
 0x418   :  { %v778_v21 = vadd.f32 %v2683_v17, %v777_v18  ;;  %2489 = vmatmul.msk.f32.gmra.mxu0 %vm561_vm13, %v478_v16 }
 0x41a   :  { %2522 = vmatpush.xpose.msk.msrb.mxu1 %vm561_vm13, %v778_v21 }
 0x41e   :  { %2523 = vmatpush.xpose.msk.msrb.mxu1 %vm561_vm13, %v775_v24 }
 0x420   :  { %2490 = vmatmul.msk.f32.gmra.mxu0 %vm561_vm13, %v481_v25 }
 0x422   :  { %2524 = vmatpush.xpose.msk.msrb.mxu1 %vm561_vm13, %v772_v26 }
 0x426   :  { %2525 = vmatpush.xpose.msk.msrb.mxu1 %vm561_vm13, %v769_v27 }
 0x428   :  { %2518 = vmatmul.msk.f32.vlgmr.msrb.gmra.mxu0 %vm106_vm1, %v3164_v14  ;;  %v309_v14 = vxor.u32 %v3016_v19, %v3027_v30 }
 0x42a   :  { %vm313_vm2 = vcmp.lt.s32.totalorder %v309_v14, 16 }
 0x42b   :  { %vm321_vm4 = vmand %vm313_vm2, %vm317_vm3 }
 0x42c   :  { %v3284_v37 = vsel %vm321_vm4, 0.0, %v2860_v29 }
 0x430   :  { %2519 = vmatmul.msk.f32.gmra.mxu0 %vm106_vm1, %v3181_v33 }
 0x438   :  { %2520 = vmatmul.msk.f32.gmra.mxu0 %vm106_vm1, %v3192_v38 }
 0x440   :  { %2521 = vmatmul.msk.f32.gmra.mxu0 %vm106_vm1, %v3202_v40  ;;  %v3292_v40 = vsel %vm322_vm7, 0.0, %v2860_v29 }
 0x485   :  { %v603_v33 = vpop.f32.mrf.mxu0 }
 0x486   :  { %v604_v34 = vadd.f32 %v603_v33, %v3276_v32 }
 0x488   :  { %v615_v35 = vsel %vm106_vm1, %v604_v34, -inf }
 0x489   :  { %616 = vmax.xlane.f32.xlu2 %v615_v35  ;;  %v729_v35 = vpop.f32.mrf.mxu2 }
 0x48d   :  { %v606_v38 = vpop.f32.mrf.mxu0 }
 0x48e   :  { %v607_v1 = vadd.f32 %v606_v38, %v3284_v37  ;;  %v701_v38 = vld [vmem:[%s3969_s7 + $0x8] sm:$0xff] }
 0x48f   :  { %1027 = vmatpush.msra.mxu0 %v701_v38 }
 0x490   :  { %v618_v30 = vsel %vm106_vm1, %v607_v1, -inf }
 0x491   :  { %619 = vmax.xlane.f32.xlu0 %v618_v30  ;;  %v732_v39 = vpop.f32.mrf.mxu2 }
 0x495   :  { %v609_v10 = vpop.f32.mrf.mxu0 }
 0x496   :  { %v610_v42 = vadd.f32 %v609_v10, %v3292_v40 }
 0x498   :  { %v621_v23 = vsel %vm106_vm1, %v610_v42, -inf }
 0x499   :  { %622 = vmax.xlane.f32.xlu2 %v621_v23 }
 0x49d   :  { %v612_v45 = vpop.f32.mrf.mxu0 }
 0x49e   :  { %v613_v46 = vadd.f32 %v612_v45, %v3298_v44 }
 0x4a0   :  { %v624_v47 = vsel %vm106_vm1, %v613_v46, -inf }
 0x4a1   :  { %625 = vmax.xlane.f32.xlu0 %v624_v47  ;;  %v700_v47 = vld [vmem:[%s3969_s7] sm:$0xff] }
 0x4a2   :  { %1028 = vmatpush.msra.mxu0 %v700_v47 }
 0x4a5   :  { %v807_v50 = vpop.f32.mrf.mxu0 }
 0x4a6   :  { %v808_v58 = vadd.f32 %v2684_v31, %v807_v50 }
 0x4ad   :  { %v810_v51 = vpop.f32.mrf.mxu0 }
 0x4ae   :  { %v811_v57 = vadd.f32 %v2684_v31, %v810_v51 }
 0x4b5   :  { %v813_v52 = vpop.f32.mrf.mxu0 }
 0x4b6   :  { %v814_v55 = vadd.f32 %v2684_v31, %v813_v52 }
 0x4bd   :  { %v816_v53 = vpop.f32.mrf.mxu0 }
 0x4be   :  { %v817_v54 = vadd.f32 %v2684_v31, %v816_v53 }
 0x4c0   :  { %940 = vmatpush.msrb.mxu2 %v817_v54 }
 0x4c2   :  { %941 = vmatpush.msrb.mxu2 %v814_v55 }
 0x4c4   :  { %942 = vmatpush.msrb.mxu2 %v811_v57 }
 0x4c6   :  { %943 = vmatpush.msrb.mxu2 %v808_v58 }
 0x4fc   :  { %v617_v60 = vpop.xlane.xlu2 %616 }
 0x4fd   :  { %v627_v61 = vsub.f32 %v604_v34, %v617_v60 }
 0x4ff   :  { %v631_v62 = vmul.f32 1.442695, %v627_v61 }
 0x501   :  { %2711 = vpow2.f32 %v631_v62 }
 0x504   :  { %v620_v63 = vpop.xlane.xlu0 %619 }
 0x505   :  { %v628_v0 = vsub.f32 %v607_v1, %v620_v63  ;;  %v2682_v1 = vld [vmem:[%s3968_s6 + $0x1] ss:$0 sm:$0xff] }
 0x506   :  { %v730_v30 = vadd.f32 %v2682_v1, %v729_v35  ;;  %v733_v10 = vadd.f32 %v2682_v1, %v732_v39 }
 0x507   :  { %v2712_v2 = vpop.eup %2711  ;;  %v633_v4 = vmul.f32 1.442695, %v628_v0 }
 0x508   :  { %v639_v5 = vsel %vm106_vm1, %v2712_v2, 0.0 }
 0x509   :  { %2713 = vpow2.f32 %v633_v4  ;;  %640 = vadd.xlane.f32.xlu2 %v639_v5 }
 0x50c   :  { %v623_v6 = vpop.xlane.xlu2 %622 }
 0x50d   :  { %v629_v7 = vsub.f32 %v610_v42, %v623_v6  ;;  %v735_v42 = vpop.f32.mrf.mxu2 }
 0x50e   :  { %v736_v23 = vadd.f32 %v2682_v1, %v735_v42 }
 0x50f   :  { %v2714_v8 = vpop.eup %2713  ;;  %v635_v59 = vmul.f32 1.442695, %v629_v7 }
 0x510   :  { %v642_v9 = vsel %vm106_vm1, %v2714_v8, 0.0 }
 0x511   :  { %2715 = vpow2.f32 %v635_v59  ;;  %643 = vadd.xlane.f32.xlu0 %v642_v9 }
 0x514   :  { %v626_v11 = vpop.xlane.xlu0 %625 }
 0x515   :  { %v630_v12 = vsub.f32 %v613_v46, %v626_v11  ;;  %v738_v45 = vpop.f32.mrf.mxu2 }
 0x516   :  { %v739_v46 = vadd.f32 %v2682_v1, %v738_v45  ;;  %v2534_v45 = vld [vmem:[%s3969_s7 + $0x10] sm:$0xff] }
 0x517   :  { %v2716_v13 = vpop.eup %2715  ;;  %v637_v15 = vmul.f32 1.442695, %v630_v12 }
 0x518   :  { %v645_v16 = vsel %vm106_vm1, %v2716_v13, 0.0 }
 0x519   :  { %2717 = vpow2.f32 %v637_v15  ;;  %646 = vadd.xlane.f32.xlu2 %v645_v16 }
 0x51f   :  { %v2718_v17 = vpop.eup %2717 }
 0x520   :  { %v648_v18 = vsel %vm106_vm1, %v2718_v17, 0.0 }
 0x521   :  { %649 = vadd.xlane.f32.xlu1 %v648_v18 }
 0x57c   :  { %v641_v21 = vpop.xlane.xlu2 %640 }
 0x57d   :  { %2719 = vrcp.f32 %v641_v21 }
 0x583   :  { %v2720_v22 = vpop.eup %2719 }
 0x584   :  { %v655_v24 = vmul.f32 %v2720_v22, %v2712_v2  ;;  %v644_v25 = vpop.xlane.xlu0 %643 }
 0x585   :  { %2721 = vrcp.f32 %v644_v25 }
 0x586   :  { %2491 = vmatmul.msk.f32.vlgmr.msra.gmra.mxu1 %vm106_vm1, %v655_v24 }
 0x58b   :  { %v2722_v26 = vpop.eup %2721 }
 0x58c   :  { %v647_v27 = vpop.xlane.xlu2 %646  ;;  %v656_v28 = vmul.f32 %v2722_v26, %v2714_v8 }
 0x58d   :  { %2723 = vrcp.f32 %v647_v27 }
 0x58e   :  { %2492 = vmatmul.msk.f32.gmra.mxu1 %vm106_vm1, %v656_v28 }
 0x593   :  { %v2724_v14 = vpop.eup %2723 }
 0x594   :  { %v650_v29 = vpop.xlane.xlu1 %649  ;;  %v657_v33 = vmul.f32 %v2724_v14, %v2716_v13 }
 0x595   :  { %2725 = vrcp.f32 %v650_v29  ;;  %v2535_v29 = vld [vmem:[%s3969_s7 + $0x18] sm:$0xff] }
 0x596   :  { %2493 = vmatmul.msk.f32.gmra.mxu1 %vm106_vm1, %v657_v33  ;;  %986 = vmatpush.msra.mxu3 %v2535_v29 }
 0x598   :  { %987 = vmatpush.msra.mxu3 %v2534_v45 }
 0x59b   :  { %v2726_v34 = vpop.eup %2725 }
 0x59c   :  { %v658_v3 = vmul.f32 %v2726_v34, %v2718_v17 }
 0x59e   :  { %2494 = vmatmul.msk.f32.gmra.mxu1 %vm106_vm1, %v658_v3 }
 0x5a6   :  { %2526 = vmatmul.msk.f32.vlgmr.msrb.gmra.mxu1 %vm561_vm13, %v730_v30 }
 0x5ae   :  { %2527 = vmatmul.msk.f32.gmra.mxu1 %vm561_vm13, %v733_v10 }
 0x5b6   :  { %2528 = vmatmul.msk.f32.gmra.mxu1 %vm561_vm13, %v736_v23 }
 0x5be   :  { %2529 = vmatmul.msk.f32.gmra.mxu1 %vm561_vm13, %v739_v46 }
 0x603   :  { %v688_v50 = vpop.f32.mrf.mxu1 }
 0x604   :  { %2540 = vmatmul.msk.f32.vlgmr.msra.gmra.mxu0 %vm561_vm13, %v688_v50 }
 0x60b   :  { %v691_v51 = vpop.f32.mrf.mxu1 }
 0x60c   :  { %2541 = vmatmul.msk.f32.gmra.mxu0 %vm561_vm13, %v691_v51 }
 0x613   :  { %v694_v52 = vpop.f32.mrf.mxu1 }
 0x614   :  { %2542 = vmatmul.msk.f32.gmra.mxu0 %vm561_vm13, %v694_v52 }
 0x61b   :  { %v697_v31 = vpop.f32.mrf.mxu1 }
 0x61c   :  { %2543 = vmatmul.msk.f32.gmra.mxu0 %vm561_vm13, %v697_v31 }
 0x623   :  { %v860_v53 = vpop.f32.mrf.mxu1 }
 0x624   :  { %v861_v54 = vadd.f32 %v860_v53, %v3276_v32 }
 0x626   :  { %v872_v55 = vsel %vm106_vm1, %v861_v54, -inf }
 0x627   :  { %873 = vmax.xlane.f32.xlu0 %v872_v55 }
 0x62b   :  { %v863_v57 = vpop.f32.mrf.mxu1 }
 0x62c   :  { %v864_v58 = vadd.f32 %v863_v57, %v3284_v37 }
 0x62e   :  { %v875_v60 = vsel %vm106_vm1, %v864_v58, -inf }
 0x62f   :  { %876 = vmax.xlane.f32.xlu2 %v875_v60 }
 0x633   :  { %v866_v61 = vpop.f32.mrf.mxu1 }
 0x634   :  { %v867_v62 = vadd.f32 %v866_v61, %v3292_v40 }
 0x636   :  { %v878_v63 = vsel %vm106_vm1, %v867_v62, -inf }
 0x637   :  { %879 = vmax.xlane.f32.xlu1 %v878_v63 }
 0x63b   :  { %v869_v0 = vpop.f32.mrf.mxu1 }
 0x63c   :  { %v870_v2 = vadd.f32 %v869_v0, %v3298_v44 }
 0x63e   :  { %v881_v4 = vsel %vm106_vm1, %v870_v2, -inf }
 0x63f   :  { %882 = vmax.xlane.f32.xlu0 %v881_v4 }
 0x681   :  { %v1030_v52 = vpop.f32.mrf.mxu0 }
 0x689   :  { %v1033_v57 = vpop.f32.mrf.mxu0 }
 0x69a   :  { %v874_v5 = vpop.xlane.xlu0 %873 }
 0x69b   :  { %v884_v6 = vsub.f32 %v861_v54, %v874_v5  ;;  %v1046_v54 = vperm.slane %v3135_v49, 4 }
 0x69d   :  { %v888_v7 = vmul.f32 1.442695, %v884_v6 }
 0x69f   :  { %2727 = vpow2.f32 %v888_v7 }
 0x6a2   :  { %v877_v8 = vpop.xlane.xlu2 %876 }
 0x6a3   :  { %v885_v59 = vsub.f32 %v864_v58, %v877_v8 }
 0x6a5   :  { %v2728_v9 = vpop.eup %2727  ;;  %v890_v11 = vmul.f32 1.442695, %v885_v59 }
 0x6a6   :  { %v896_v12 = vsel %vm106_vm1, %v2728_v9, 0.0 }
 0x6a7   :  { %2729 = vpow2.f32 %v890_v11  ;;  %897 = vadd.xlane.f32.xlu2 %v896_v12 }
 0x6aa   :  { %v880_v13 = vpop.xlane.xlu1 %879 }
 0x6ab   :  { %v886_v15 = vsub.f32 %v867_v62, %v880_v13 }
 0x6ad   :  { %v2730_v16 = vpop.eup %2729  ;;  %v892_v17 = vmul.f32 1.442695, %v886_v15 }
 0x6ae   :  { %v899_v18 = vsel %vm106_vm1, %v2730_v16, 0.0 }
 0x6af   :  { %2731 = vpow2.f32 %v892_v17  ;;  %900 = vadd.xlane.f32.xlu1 %v899_v18 }
 0x6b2   :  { %v883_v21 = vpop.xlane.xlu0 %882 }
 0x6b3   :  { %v887_v22 = vsub.f32 %v870_v2, %v883_v21  ;;  %v1036_v2 = vpop.f32.mrf.mxu0 }
 0x6b5   :  { %v2732_v24 = vpop.eup %2731  ;;  %v894_v25 = vmul.f32 1.442695, %v887_v22 }
 0x6b6   :  { %v902_v26 = vsel %vm106_vm1, %v2732_v24, 0.0 }
 0x6b7   :  { %2733 = vpow2.f32 %v894_v25  ;;  %903 = vadd.xlane.f32.xlu0 %v902_v26 }
 0x6bb   :  { %v1039_v59 = vpop.f32.mrf.mxu0 }
 0x6bd   :  { %v2734_v27 = vpop.eup %2733 }
 0x6be   :  { %v905_v28 = vsel %vm106_vm1, %v2734_v27, 0.0 }
 0x6bf   :  { %906 = vadd.xlane.f32.xlu2 %v905_v28 }
 0x71a   :  { %v898_v14 = vpop.xlane.xlu2 %897 }
 0x71b   :  { %2735 = vrcp.f32 %v898_v14 }
 0x721   :  { %v2736_v33 = vpop.eup %2735 }
 0x722   :  { %v912_v34 = vmul.f32 %v2736_v33, %v2728_v9  ;;  %v901_v35 = vpop.xlane.xlu1 %900 }
 0x723   :  { %2737 = vrcp.f32 %v901_v35 }
 0x724   :  { %2530 = vmatmul.msk.f32.vlgmr.msrb.gmra.mxu2 %vm106_vm1, %v912_v34 }
 0x729   :  { %v2738_v3 = vpop.eup %2737 }
 0x72a   :  { %v904_v38 = vpop.xlane.xlu0 %903  ;;  %v913_v1 = vmul.f32 %v2738_v3, %v2730_v16 }
 0x72b   :  { %2739 = vrcp.f32 %v904_v38 }
 0x72c   :  { %2531 = vmatmul.msk.f32.gmra.mxu2 %vm106_vm1, %v913_v1  ;;  %v1152_v1 = vld [vmem:[%s3970_s8 + $0x18] sm:$0xff] }
 0x72d   :  { %1181 = vmatpush.msra.mxu1 %v1152_v1 }
 0x731   :  { %v2740_v30 = vpop.eup %2739 }
 0x732   :  { %v907_v39 = vpop.xlane.xlu2 %906  ;;  %v914_v10 = vmul.f32 %v2740_v30, %v2732_v24  ;;  %v1151_v30 = vld [vmem:[%s3970_s8 + $0x10] sm:$0xff] }
 0x733   :  { %2741 = vrcp.f32 %v907_v39  ;;  %1182 = vmatpush.msra.mxu1 %v1151_v30  ;;  %v1150_v39 = vld [vmem:[%s3970_s8 + $0x8] sm:$0xff] }
 0x734   :  { %2532 = vmatmul.msk.f32.gmra.mxu2 %vm106_vm1, %v914_v10  ;;  %v1149_v10 = vld [vmem:[%s3970_s8] sm:$0xff] }
 0x735   :  { %1183 = vmatpush.msra.mxu1 %v1150_v39 }
 0x737   :  { %1184 = vmatpush.msra.mxu1 %v1149_v10 }
 0x739   :  { %v2742_v42 = vpop.eup %2741 }
 0x73a   :  { %v915_v23 = vmul.f32 %v2742_v42, %v2734_v27 }
 0x73c   :  { %2533 = vmatmul.msk.f32.gmra.mxu2 %vm106_vm1, %v915_v23 }
 0x7a7   :  { %v945_v46 = vpop.f32.mrf.mxu2 }
 0x7a8   :  { %2536 = vmatmul.msk.f32.vlgmr.msra.gmra.mxu3 %vm561_vm13, %v945_v46 }
 0x7af   :  { %v948_v47 = vpop.f32.mrf.mxu2 }
 0x7b0   :  { %2537 = vmatmul.msk.f32.gmra.mxu3 %vm561_vm13, %v948_v47 }
 0x7b7   :  { %v951_v50 = vpop.f32.mrf.mxu2 }
 0x7b8   :  { %2538 = vmatmul.msk.f32.gmra.mxu3 %vm561_vm13, %v951_v50 }
 0x7bf   :  { %v954_v51 = vpop.f32.mrf.mxu2 }
 0x7c0   :  { %2539 = vmatmul.msk.f32.gmra.mxu3 %vm561_vm13, %v954_v51 }
 0x82b   :  { %v989_v31 = vpop.f32.mrf.mxu3 }
 0x82c   :  { %v1031_v53 = vadd.f32 %v1030_v52, %v989_v31 }
 0x82e   :  { %v1042_v55 = vadd.f32 %v1031_v53, %v3037_v36 }
 0x830   :  { %v3358_v58 = vadd.f32 %v1046_v54, %v1042_v55 }
 0x832   :  { %v1051_v60 = vsel %vm106_vm1, %v3358_v58, 0.0 }
 0x833   :  { %1052 = vadd.xlane.f32.xlu1 %v1051_v60  ;;  %v992_v61 = vpop.f32.mrf.mxu3 }
 0x834   :  { %v1034_v62 = vadd.f32 %v1033_v57, %v992_v61 }
 0x836   :  { %v1043_v63 = vadd.f32 %v1034_v62, %v3049_v43 }
 0x838   :  { %v3363_v0 = vadd.f32 %v1046_v54, %v1043_v63 }
 0x83a   :  { %v1054_v4 = vsel %vm106_vm1, %v3363_v0, 0.0 }
 0x83b   :  { %1055 = vadd.xlane.f32.xlu0 %v1054_v4  ;;  %v995_v5 = vpop.f32.mrf.mxu3  ;;  %v1249_v4 = vld [vmem:[%s3972_s10 + $0x78] sm:$0xff] }
 0x83c   :  { %v1037_v36 = vadd.f32 %v1036_v2, %v995_v5  ;;  %v1139_v2 = vperm.slane %v3135_v49, 2  ;;  %v1248_v5 = vld [vmem:[%s3972_s10 + $0x70] sm:$0xff]  ;;  %1250 = vmatpush.msra.mxu2 %v1249_v4 }
 0x83e   :  { %v1044_v6 = vadd.f32 %v1037_v36, %v3047_v41  ;;  %1251 = vmatpush.msra.mxu2 %v1248_v5 }
 0x840   :  { %v3368_v7 = vadd.f32 %v1046_v54, %v1044_v6 }
 0x842   :  { %v1057_v8 = vsel %vm106_vm1, %v3368_v7, 0.0 }
 0x843   :  { %1058 = vadd.xlane.f32.xlu2 %v1057_v8  ;;  %v998_v9 = vpop.f32.mrf.mxu3 }
 0x844   :  { %v1040_v43 = vadd.f32 %v1039_v59, %v998_v9  ;;  %v1144_v59 = vperm.slane %v3135_v49, 3  ;;  %v1247_v9 = vld [vmem:[%s3972_s10 + $0x68] sm:$0xff] }
 0x845   :  { %1252 = vmatpush.msra.mxu2 %v1247_v9 }
 0x846   :  { %v1045_v11 = vadd.f32 %v1040_v43, %v3058_v48 }
 0x848   :  { %v3373_v12 = vadd.f32 %v1046_v54, %v1045_v11 }
 0x84a   :  { %v1060_v13 = vsel %vm106_vm1, %v3373_v12, 0.0 }
 0x84b   :  { %1061 = vadd.xlane.f32.xlu1 %v1060_v13 }
 0x8a6   :  { %v1053_v15 = vpop.xlane.xlu1 %1052 }
 0x8a7   :  { %v1063_v41 = vmul.f32 %v1053_v15, %v3062_v56 }
 0x8a9   :  { %v1067_v16 = vsub.f32 %v3358_v58, %v1063_v41  ;;  %v1246_v41 = vld [vmem:[%s3972_s10 + $0x60] sm:$0xff] }
 0x8aa   :  { %1253 = vmatpush.msra.mxu2 %v1246_v41 }
 0x8ab   :  { %v1071_v17 = vmul.f32 %v1067_v16, %v1067_v16 }
 0x8ad   :  { %v1075_v18 = vsel %vm106_vm1, %v1071_v17, 0.0 }
 0x8ae   :  { %1076 = vadd.xlane.f32.xlu0 %v1075_v18  ;;  %v1056_v21 = vpop.xlane.xlu0 %1055 }
 0x8af   :  { %v1064_v22 = vmul.f32 %v1056_v21, %v3062_v56 }
 0x8b1   :  { %v3382_v48 = vsub.f32 %v3363_v0, %v1064_v22 }
 0x8b3   :  { %v1072_v24 = vmul.f32 %v3382_v48, %v3382_v48 }
 0x8b5   :  { %v1078_v25 = vsel %vm106_vm1, %v1072_v24, 0.0 }
 0x8b6   :  { %v1059_v26 = vpop.xlane.xlu2 %1058  ;;  %1079 = vadd.xlane.f32.xlu2 %v1078_v25 }
 0x8b7   :  { %v1065_v27 = vmul.f32 %v1059_v26, %v3062_v56 }
 0x8b9   :  { %v3389_v28 = vsub.f32 %v3368_v7, %v1065_v27 }
 0x8bb   :  { %v1073_v14 = vmul.f32 %v3389_v28, %v3389_v28 }
 0x8bd   :  { %v1081_v29 = vsel %vm106_vm1, %v1073_v14, 0.0 }
 0x8be   :  { %1082 = vadd.xlane.f32.xlu1 %v1081_v29  ;;  %v1062_v33 = vpop.xlane.xlu1 %1061 }
 0x8bf   :  { %v1066_v34 = vmul.f32 %v1062_v33, %v3062_v56 }
 0x8c1   :  { %v3396_v35 = vsub.f32 %v3373_v12, %v1066_v34 }
 0x8c3   :  { %v1074_v3 = vmul.f32 %v3396_v35, %v3396_v35 }
 0x8c5   :  { %v1084_v38 = vsel %vm106_vm1, %v1074_v3, 0.0 }
 0x8c6   :  { %1085 = vadd.xlane.f32.xlu0 %v1084_v38 }
 0x921   :  { %v1077_v42 = vpop.xlane.xlu0 %1076 }
 0x922   :  { %v1087_v23 = vmul.f32 %v1077_v42, %v3062_v56 }
 0x924   :  { %v1091_v45 = vadd.f32 1e-05, %v1087_v23 }
 0x926   :  { %2743 = vrsqrt.f32 %v1091_v45  ;;  %vm1101_vm12 = vweird.f32 %v1091_v45 }
 0x929   :  { %v1080_v46 = vpop.xlane.xlu2 %1079 }
 0x92a   :  { %v1088_v47 = vmul.f32 %v1080_v46, %v3062_v56 }
 0x92c   :  { %v2744_v50 = vpop.eup %2743  ;;  %v1092_v51 = vadd.f32 1e-05, %v1088_v47 }
 0x92d   :  { %v1096_v52 = vmul.f32 %v2744_v50, %v1091_v45  ;;  %vm1102_vm11 = vweird.f32 %v2744_v50 }
 0x92e   :  { %2745 = vrsqrt.f32 %v1092_v51  ;;  %vm1103_vm14 = vmor %vm1101_vm12, %vm1102_vm11  ;;  %vm1111_vm0 = vweird.f32 %v1092_v51 }
 0x92f   :  { %v1097_v31 = vmul.f32 %v2744_v50, %v1096_v52  ;;  %v1244_v52 = vld [vmem:[%s3972_s10 + $0x50] sm:$0xff] }
 0x931   :  { %v1098_v53 = vmul.f32 0.5, %v1097_v31  ;;  %v1083_v54 = vpop.xlane.xlu1 %1082  ;;  %v1243_v31 = vld [vmem:[%s3972_s10 + $0x48] sm:$0xff] }
 0x932   :  { %v1089_v55 = vmul.f32 %v1083_v54, %v3062_v56  ;;  %v1240_v54 = vld [vmem:[%s3972_s10 + $0x30] sm:$0xff] }
 0x933   :  { %v1099_v57 = vsub.f32 1.5, %v1098_v53  ;;  %v1241_v53 = vld [vmem:[%s3972_s10 + $0x38] sm:$0xff] }
 0x934   :  { %v2746_v60 = vpop.eup %2745  ;;  %v1093_v61 = vadd.f32 1e-05, %v1089_v55  ;;  %v1239_v55 = vld [vmem:[%s3972_s10 + $0x28] sm:$0xff] }
 0x935   :  { %v1100_v62 = vmul.f32 %v2744_v50, %v1099_v57  ;;  %v1106_v63 = vmul.f32 %v2746_v60, %v1092_v51  ;;  %vm1112_vm15 = vweird.f32 %v2746_v60  ;;  %v1238_v57 = vld [vmem:[%s3972_s10 + $0x20] sm:$0xff] }
 0x936   :  { %2747 = vrsqrt.f32 %v1093_v61  ;;  %vm1113_vm2 = vmor %vm1111_vm0, %vm1112_vm15  ;;  %vm1121_vm4 = vweird.f32 %v1093_v61 }
 0x937   :  { %v1104_v36 = vsel %vm1103_vm14, %v2744_v50, %v1100_v62  ;;  %v1107_v6 = vmul.f32 %v2746_v60, %v1106_v63  ;;  %v1235_v62 = vld [vmem:[%s3972_s10 + $0x8] sm:$0xff]  ;;  %v1234_v63 = vld [vmem:[%s3972_s10] sm:$0xff] }
 0x938   :  { %v1135_v8 = vmul.f32 %v1104_v36, %v1067_v16 }
 0x939   :  { %v1108_v43 = vmul.f32 0.5, %v1107_v6  ;;  %v1086_v11 = vpop.xlane.xlu0 %1085 }
 0x93a   :  { %v1140_v13 = vmul.f32 %v1139_v2, %v1135_v8  ;;  %v1090_v15 = vmul.f32 %v1086_v11, %v3062_v56 }
 0x93b   :  { %v1109_v17 = vsub.f32 1.5, %v1108_v43 }
 0x93c   :  { %v2748_v16 = vpop.eup %2747  ;;  %v1094_v18 = vadd.f32 1e-05, %v1090_v15  ;;  %v1145_v49 = vadd.f32 %v1144_v59, %v1140_v13 }
 0x93d   :  { %v1110_v21 = vmul.f32 %v2746_v60, %v1109_v17  ;;  %v1116_v22 = vmul.f32 %v2748_v16, %v1093_v61  ;;  %vm1122_vm3 = vweird.f32 %v2748_v16  ;;  %v1236_v61 = vld [vmem:[%s3972_s10 + $0x10] sm:$0xff] }
 0x93e   :  { %2749 = vrsqrt.f32 %v1094_v18  ;;  %2544 = vmatmul.msk.f32.vlgmr.msra.gmra.mxu1 %vm106_vm1, %v1145_v49  ;;  %vm1123_vm5 = vmor %vm1121_vm4, %vm1122_vm3  ;;  %vm1131_vm7 = vweird.f32 %v1094_v18 }
 0x93f   :  { %v1114_v24 = vsel %vm1113_vm2, %v2746_v60, %v1110_v21  ;;  %v1117_v25 = vmul.f32 %v2748_v16, %v1116_v22  ;;  %v1237_v60 = vld [vmem:[%s3972_s10 + $0x18] sm:$0xff] }
 0x940   :  { %v1136_v26 = vmul.f32 %v1114_v24, %v3382_v48 }
 0x941   :  { %v1118_v27 = vmul.f32 0.5, %v1117_v25 }
 0x942   :  { %v1141_v14 = vmul.f32 %v1139_v2, %v1136_v26 }
 0x943   :  { %v1119_v29 = vsub.f32 1.5, %v1118_v27 }
 0x944   :  { %v2750_v33 = vpop.eup %2749  ;;  %v1146_v34 = vadd.f32 %v1144_v59, %v1141_v14 }
 0x945   :  { %v1120_v3 = vmul.f32 %v2748_v16, %v1119_v29  ;;  %v1126_v38 = vmul.f32 %v2750_v33, %v1094_v18  ;;  %vm1132_vm6 = vweird.f32 %v2750_v33 }
 0x946   :  { %2545 = vmatmul.msk.f32.gmra.mxu1 %vm106_vm1, %v1146_v34  ;;  %vm1133_vm8 = vmor %vm1131_vm7, %vm1132_vm6 }
 0x947   :  { %v1124_v1 = vsel %vm1123_vm5, %v2748_v16, %v1120_v3  ;;  %v1127_v30 = vmul.f32 %v2750_v33, %v1126_v38 }
 0x948   :  { %v1137_v39 = vmul.f32 %v1124_v1, %v3389_v28  ;;  %v1245_v28 = vld [vmem:[%s3972_s10 + $0x58] sm:$0xff] }
 0x949   :  { %v1128_v10 = vmul.f32 0.5, %v1127_v30  ;;  %1254 = vmatpush.msra.mxu2 %v1245_v28 }
 0x94a   :  { %v1142_v42 = vmul.f32 %v1139_v2, %v1137_v39 }
 0x94b   :  { %v1129_v23 = vsub.f32 1.5, %v1128_v10  ;;  %1255 = vmatpush.msra.mxu2 %v1244_v52 }
 0x94c   :  { %v1147_v48 = vadd.f32 %v1144_v59, %v1142_v42 }
 0x94d   :  { %v1130_v45 = vmul.f32 %v2750_v33, %v1129_v23  ;;  %1256 = vmatpush.msra.mxu2 %v1243_v31 }
 0x94e   :  { %2546 = vmatmul.msk.f32.gmra.mxu1 %vm106_vm1, %v1147_v48 }
 0x94f   :  { %v1134_v46 = vsel %vm1133_vm8, %v2750_v33, %v1130_v45 }
 0x950   :  { %v1138_v47 = vmul.f32 %v1134_v46, %v3396_v35  ;;  %v1242_v35 = vld [vmem:[%s3972_s10 + $0x40] sm:$0xff] }
 0x951   :  { %1257 = vmatpush.msra.mxu2 %v1242_v35 }
 0x952   :  { %v1143_v50 = vmul.f32 %v1139_v2, %v1138_v47  ;;  %v2685_v2 = vld [vmem:[%s3971_s9] ss:$0 sm:$0xff] }
 0x953   :  { %1258 = vmatpush.msra.mxu2 %v1241_v53  ;;  %v2827_v53 = vld [vmem:[%s3973_s11] sm:$0x3f] }
 0x954   :  { %v1148_v51 = vadd.f32 %v1144_v59, %v1143_v50 }
 0x955   :  { %1259 = vmatpush.msra.mxu2 %v1240_v54  ;;  %v1283_v54 = vperm.slane %v2827_v53, 5 }
 0x956   :  { %2547 = vmatmul.msk.f32.gmra.mxu1 %vm106_vm1, %v1148_v51 }
 0x957   :  { %1260 = vmatpush.msra.mxu2 %v1239_v55 }
 0x959   :  { %1261 = vmatpush.msra.mxu2 %v1238_v57 }
 0x95b   :  { %1262 = vmatpush.msra.mxu2 %v1237_v60 }
 0x95d   :  { %1263 = vmatpush.msra.mxu2 %v1236_v61 }
 0x95f   :  { %1264 = vmatpush.msra.mxu2 %v1235_v62 }
 0x961   :  { %1265 = vmatpush.msra.mxu2 %v1234_v63 }
 0x9bb   :  { %v1186_v4 = vpop.f32.mrf.mxu1 }
 0x9bc   :  { %v1187_v5 = vadd.f32 %v2685_v2, %v1186_v4 }
 0x9be   :  { %v1202_v36 = vmul.f32 0.044715, %v1187_v5  ;;  %v1198_v24 = vmul.f32 0.5, %v1187_v5 }
 0x9c0   :  { %v1206_v6 = vmul.f32 %v1202_v36, %v1187_v5 }
 0x9c2   :  { %v1210_v8 = vmul.f32 %v1206_v6, %v1187_v5 }
 0x9c3   :  { %v1189_v59 = vpop.f32.mrf.mxu1 }
 0x9c4   :  { %v1190_v9 = vadd.f32 %v2685_v2, %v1189_v59  ;;  %v1214_v43 = vadd.f32 %v1210_v8, %v1187_v5 }
 0x9c6   :  { %v1218_v11 = vmul.f32 0.7978846, %v1214_v43  ;;  %v1203_v13 = vmul.f32 0.044715, %v1190_v9  ;;  %v1199_v30 = vmul.f32 0.5, %v1190_v9 }
 0x9c8   :  { %2751 = vtanh.f32 %v1218_v11  ;;  %v1207_v15 = vmul.f32 %v1203_v13, %v1190_v9 }
 0x9ca   :  { %v1211_v41 = vmul.f32 %v1207_v15, %v1190_v9 }
 0x9cb   :  { %v1192_v17 = vpop.f32.mrf.mxu1 }
 0x9cc   :  { %v1193_v16 = vadd.f32 %v2685_v2, %v1192_v17  ;;  %v1215_v18 = vadd.f32 %v1211_v41, %v1190_v9 }
 0x9ce   :  { %v2752_v49 = vpop.eup %2751  ;;  %v1219_v21 = vmul.f32 0.7978846, %v1215_v18  ;;  %v1204_v22 = vmul.f32 0.044715, %v1193_v16  ;;  %v1200_v47 = vmul.f32 0.5, %v1193_v16 }
 0x9cf   :  { %v1226_v25 = vadd.f32 1.0, %v2752_v49 }
 0x9d0   :  { %2753 = vtanh.f32 %v1219_v21  ;;  %v1208_v26 = vmul.f32 %v1204_v22, %v1193_v16 }
 0x9d1   :  { %v1230_v27 = vmul.f32 %v1226_v25, %v1198_v24 }
 0x9d2   :  { %v1212_v14 = vmul.f32 %v1208_v26, %v1193_v16 }
 0x9d3   :  { %v1195_v29 = vpop.f32.mrf.mxu1  ;;  %1266 = vmatmul.f32.vlgmr.msra.gmra.mxu2 %v1230_v27 }
 0x9d4   :  { %v1196_v33 = vadd.f32 %v2685_v2, %v1195_v29  ;;  %v1216_v34 = vadd.f32 %v1212_v14, %v1193_v16 }
 0x9d6   :  { %v2754_v3 = vpop.eup %2753  ;;  %v1220_v38 = vmul.f32 0.7978846, %v1216_v34  ;;  %v1205_v1 = vmul.f32 0.044715, %v1196_v33  ;;  %v1201_v52 = vmul.f32 0.5, %v1196_v33  ;;  %v2561_v34 = vld [vmem:[%s3967_s5 + $0xd8] sm:$0xff] }
 0x9d7   :  { %v1227_v39 = vadd.f32 1.0, %v2754_v3  ;;  %v2552_v3 = vld [vmem:[%s3967_s5 + $0x58] sm:$0xff]  ;;  %1461 = vmatpush.msrb.mxu0 %v2561_v34 }
 0x9d8   :  { %2755 = vtanh.f32 %v1220_v38  ;;  %v1209_v10 = vmul.f32 %v1205_v1, %v1196_v33  ;;  %v2570_v38 = vld [vmem:[%s3967_s5 + $0x158] sm:$0xff]  ;;  %1422 = vmatpush.msrb.mxu3 %v2552_v3  ;;  %v2551_v1 = vld [vmem:[%s3967_s5 + $0x50] sm:$0xff] }
 0x9d9   :  { %v1231_v42 = vmul.f32 %v1227_v39, %v1199_v30  ;;  %1500 = vmatpush.msrb.mxu1 %v2570_v38  ;;  %v2560_v30 = vld [vmem:[%s3967_s5 + $0xd0] sm:$0xff]  ;;  %v2599_v38 = vld [vmem:[%s3967_s5 + $0xe0] sm:$0xff] }
 0x9da   :  { %v1213_v23 = vmul.f32 %v1209_v10, %v1196_v33  ;;  %v2569_v39 = vld [vmem:[%s3967_s5 + $0x150] sm:$0xff]  ;;  %1423 = vmatpush.msrb.mxu3 %v2551_v1  ;;  %1462 = vmatpush.msrb.mxu0 %v2560_v30  ;;  %v2550_v10 = vld [vmem:[%s3967_s5 + $0x48] sm:$0xff] }
 0x9db   :  { %1269 = vmatmul.f32.gmra.mxu2 %v1231_v42  ;;  %1501 = vmatpush.msrb.mxu1 %v2569_v39  ;;  %v2559_v42 = vld [vmem:[%s3967_s5 + $0xc8] sm:$0xff] }
 0x9dc   :  { %v1217_v48 = vadd.f32 %v1213_v23, %v1196_v33  ;;  %v2568_v23 = vld [vmem:[%s3967_s5 + $0x148] sm:$0xff]  ;;  %1424 = vmatpush.msrb.mxu3 %v2550_v10  ;;  %1463 = vmatpush.msrb.mxu0 %v2559_v42 }
 0x9dd   :  { %1502 = vmatpush.msrb.mxu1 %v2568_v23 }
 0x9de   :  { %v2756_v45 = vpop.eup %2755  ;;  %v1221_v46 = vmul.f32 0.7978846, %v1217_v48  ;;  %v2549_v48 = vld [vmem:[%s3967_s5 + $0x40] sm:$0xff] }
 0x9df   :  { %v1228_v50 = vadd.f32 1.0, %v2756_v45  ;;  %v2558_v45 = vld [vmem:[%s3967_s5 + $0xc0] sm:$0xff]  ;;  %1425 = vmatpush.msrb.mxu3 %v2549_v48 }
 0x9e0   :  { %2757 = vtanh.f32 %v1221_v46  ;;  %v2567_v46 = vld [vmem:[%s3967_s5 + $0x140] sm:$0xff]  ;;  %1464 = vmatpush.msrb.mxu0 %v2558_v45 }
 0x9e1   :  { %v1232_v51 = vmul.f32 %v1228_v50, %v1200_v47  ;;  %1503 = vmatpush.msrb.mxu1 %v2567_v46 }
 0x9e3   :  { %1272 = vmatmul.f32.gmra.mxu2 %v1232_v51 }
 0x9e6   :  { %v2758_v28 = vpop.eup %2757 }
 0x9e7   :  { %v1229_v31 = vadd.f32 1.0, %v2758_v28 }
 0x9e9   :  { %v1233_v35 = vmul.f32 %v1229_v31, %v1201_v52 }
 0x9eb   :  { %1275 = vmatmul.f32.gmra.mxu2 %v1233_v35 }
 0xa56   :  { %v1267_v55 = vpop.f32.mrf.mxu2 }
 0xa57   :  { %v1279_v57 = vadd.f32 %v1267_v55, %v3358_v58 }
 0xa59   :  { %v3481_v60 = vadd.f32 %v1283_v54, %v1279_v57 }
 0xa5b   :  { %v1290_v61 = vsel %vm106_vm1, %v3481_v60, 0.0 }
 0xa5c   :  { %1291 = vadd.xlane.f32.xlu2 %v1290_v61 }
 0xa5e   :  { %v1270_v62 = vpop.f32.mrf.mxu2 }
 0xa5f   :  { %v1280_v63 = vadd.f32 %v1270_v62, %v3363_v0  ;;  %v3570_v62 = vld [vmem:[%s3973_s11 + $0x8] sm:$0x3f] }
 0xa61   :  { %v3486_v2 = vadd.f32 %v1283_v54, %v1280_v63 }
 0xa63   :  { %v1293_v4 = vsel %vm106_vm1, %v3486_v2, 0.0 }
 0xa64   :  { %1294 = vadd.xlane.f32.xlu1 %v1293_v4 }
 0xa66   :  { %v1273_v5 = vpop.f32.mrf.mxu2 }
 0xa67   :  { %v1281_v36 = vadd.f32 %v1273_v5, %v3368_v7 }
 0xa69   :  { %v3491_v6 = vadd.f32 %v1283_v54, %v1281_v36 }
 0xa6b   :  { %v1296_v58 = vsel %vm106_vm1, %v3491_v6, 0.0 }
 0xa6c   :  { %1297 = vadd.xlane.f32.xlu0 %v1296_v58 }
 0xa6e   :  { %v1276_v8 = vpop.f32.mrf.mxu2 }
 0xa6f   :  { %v1282_v59 = vadd.f32 %v1276_v8, %v3373_v12  ;;  %v3573_v8 = vperm.slane %v3570_v62, 0 }
 0xa71   :  { %v3496_v9 = vadd.f32 %v1283_v54, %v1282_v59 }
 0xa73   :  { %v1299_v0 = vsel %vm106_vm1, %v3496_v9, 0.0 }
 0xa74   :  { %1300 = vadd.xlane.f32.xlu2 %v1299_v0 }
 0xacf   :  { %v1292_v43 = vpop.xlane.xlu2 %1291 }
 0xad0   :  { %v1302_v11 = vmul.f32 %v1292_v43, %v3062_v56  ;;  %v2593_v43 = vld [vmem:[%s3967_s5 + $0x78] sm:$0xff] }
 0xad1   :  { %1680 = vmatpush.msra.mxu0 %v2593_v43 }
 0xad2   :  { %v3502_v7 = vsub.f32 %v3481_v60, %v1302_v11  ;;  %v2602_v11 = vld [vmem:[%s3967_s5 + $0xf8] sm:$0xff] }
 0xad3   :  { %1719 = vmatpush.msra.mxu1 %v2602_v11 }
 0xad4   :  { %v1310_v13 = vmul.f32 %v3502_v7, %v3502_v7 }
 0xad6   :  { %v1314_v15 = vsel %vm106_vm1, %v1310_v13, 0.0  ;;  %v2592_v13 = vld [vmem:[%s3967_s5 + $0x70] sm:$0xff] }
 0xad7   :  { %1315 = vadd.xlane.f32.xlu1 %v1314_v15  ;;  %v1295_v41 = vpop.xlane.xlu1 %1294  ;;  %v3585_v15 = vperm.slane %v3570_v62, 1  ;;  %1681 = vmatpush.msra.mxu0 %v2592_v13 }
 0xad8   :  { %v1303_v12 = vmul.f32 %v1295_v41, %v3062_v56 }
 0xada   :  { %v3509_v17 = vsub.f32 %v3486_v2, %v1303_v12  ;;  %v2601_v12 = vld [vmem:[%s3967_s5 + $0xf0] sm:$0xff] }
 0xadb   :  { %1720 = vmatpush.msra.mxu1 %v2601_v12 }
 0xadc   :  { %v1311_v16 = vmul.f32 %v3509_v17, %v3509_v17 }
 0xade   :  { %v1317_v18 = vsel %vm106_vm1, %v1311_v16, 0.0 }
 0xadf   :  { %1318 = vadd.xlane.f32.xlu0 %v1317_v18  ;;  %v1298_v49 = vpop.xlane.xlu0 %1297 }
 0xae0   :  { %v1304_v21 = vmul.f32 %v1298_v49, %v3062_v56  ;;  %v2591_v49 = vld [vmem:[%s3967_s5 + $0x68] sm:$0xff] }
 0xae1   :  { %1682 = vmatpush.msra.mxu0 %v2591_v49 }
 0xae2   :  { %v3516_v22 = vsub.f32 %v3491_v6, %v1304_v21  ;;  %v2600_v21 = vld [vmem:[%s3967_s5 + $0xe8] sm:$0xff] }
 0xae3   :  { %1721 = vmatpush.msra.mxu1 %v2600_v21  ;;  %v2688_v21 = vld [vmem:[%s3968_s6 + $0x2] ss:$0 sm:$0xff] }
 0xae4   :  { %v1312_v24 = vmul.f32 %v3516_v22, %v3516_v22 }
 0xae5   :  { %1722 = vmatpush.msra.mxu1 %v2599_v38 }
 0xae6   :  { %v1320_v25 = vsel %vm106_vm1, %v1312_v24, 0.0 }
 0xae7   :  { %v1301_v26 = vpop.xlane.xlu2 %1300  ;;  %1321 = vadd.xlane.f32.xlu2 %v1320_v25 }
 0xae8   :  { %v1305_v27 = vmul.f32 %v1301_v26, %v3062_v56 }
 0xaea   :  { %v3523_v14 = vsub.f32 %v3496_v9, %v1305_v27 }
 0xaec   :  { %v1313_v29 = vmul.f32 %v3523_v14, %v3523_v14 }
 0xaee   :  { %v1323_v33 = vsel %vm106_vm1, %v1313_v29, 0.0 }
 0xaef   :  { %1324 = vadd.xlane.f32.xlu1 %v1323_v33  ;;  %v2590_v33 = vld [vmem:[%s3967_s5 + $0x60] sm:$0xff] }
 0xaf0   :  { %1683 = vmatpush.msra.mxu0 %v2590_v33 }
 0xb4a   :  { %v1316_v47 = vpop.xlane.xlu1 %1315 }
 0xb4b   :  { %v1326_v50 = vmul.f32 %v1316_v47, %v3062_v56 }
 0xb4d   :  { %v1330_v51 = vadd.f32 1e-05, %v1326_v50 }
 0xb4f   :  { %2759 = vrsqrt.f32 %v1330_v51  ;;  %vm1340_vm10 = vweird.f32 %v1330_v51 }
 0xb52   :  { %v1319_v28 = vpop.xlane.xlu0 %1318 }
 0xb53   :  { %v1327_v52 = vmul.f32 %v1319_v28, %v3062_v56 }
 0xb55   :  { %v2760_v31 = vpop.eup %2759  ;;  %v1331_v35 = vadd.f32 1e-05, %v1327_v52 }
 0xb56   :  { %v1335_v53 = vmul.f32 %v2760_v31, %v1330_v51  ;;  %vm1341_vm9 = vweird.f32 %v2760_v31 }
 0xb57   :  { %2761 = vrsqrt.f32 %v1331_v35  ;;  %vm1342_vm11 = vmor %vm1340_vm10, %vm1341_vm9  ;;  %vm1350_vm14 = vweird.f32 %v1331_v35 }
 0xb58   :  { %v1336_v54 = vmul.f32 %v2760_v31, %v1335_v53 }
 0xb5a   :  { %v1337_v55 = vmul.f32 0.5, %v1336_v54  ;;  %v1322_v57 = vpop.xlane.xlu2 %1321 }
 0xb5b   :  { %v1328_v61 = vmul.f32 %v1322_v57, %v3062_v56 }
 0xb5c   :  { %v1338_v63 = vsub.f32 1.5, %v1337_v55 }
 0xb5d   :  { %v2762_v4 = vpop.eup %2761  ;;  %v1332_v5 = vadd.f32 1e-05, %v1328_v61 }
 0xb5e   :  { %v1339_v36 = vmul.f32 %v2760_v31, %v1338_v63  ;;  %v1345_v58 = vmul.f32 %v2762_v4, %v1331_v35  ;;  %vm1351_vm12 = vweird.f32 %v2762_v4 }
 0xb5f   :  { %2763 = vrsqrt.f32 %v1332_v5  ;;  %vm1352_vm15 = vmor %vm1350_vm14, %vm1351_vm12  ;;  %vm1360_vm2 = vweird.f32 %v1332_v5 }
 0xb60   :  { %v1343_v59 = vsel %vm1342_vm11, %v2760_v31, %v1339_v36  ;;  %v1346_v0 = vmul.f32 %v2762_v4, %v1345_v58  ;;  %v2686_v58 = vld [vmem:[%s3968_s6 + $0x6] ss:$0 sm:$0xff] }
 0xb61   :  { %v1374_v41 = vmul.f32 %v1343_v59, %v3502_v7 }
 0xb62   :  { %v1347_v16 = vmul.f32 0.5, %v1346_v0  ;;  %v1325_v18 = vpop.xlane.xlu1 %1324 }
 0xb63   :  { %v1379_v24 = vmul.f32 %v3573_v8, %v1374_v41  ;;  %v1329_v7 = vmul.f32 %v1325_v18, %v3062_v56 }
 0xb64   :  { %v1348_v25 = vsub.f32 1.5, %v1347_v16 }
 0xb65   :  { %v2764_v26 = vpop.eup %2763  ;;  %v3600_v27 = vadd.f32 %v3585_v15, %v1379_v24  ;;  %v1333_v29 = vadd.f32 1e-05, %v1329_v7  ;;  %v2611_v7 = vld [vmem:[%s3967_s5 + $0x178] sm:$0xff] }
 0xb66   :  { %v1349_v34 = vmul.f32 %v2762_v4, %v1348_v25  ;;  %v1355_v3 = vmul.f32 %v2764_v26, %v1332_v5  ;;  %vm1361_vm0 = vweird.f32 %v2764_v26 }
 0xb67   :  { %2765 = vrsqrt.f32 %v1333_v29  ;;  %2554 = vmatmul.msk.f32.vlgmr.msrb.gmra.mxu3 %vm106_vm1, %v3600_v27  ;;  %2563 = vmatmul.msk.f32.vlgmr.msrb.gmra.mxu0 %vm106_vm1, %v3600_v27  ;;  %vm1362_vm3 = vmor %vm1360_vm2, %vm1361_vm0  ;;  %vm1370_vm5 = vweird.f32 %v1333_v29 }
 0xb68   :  { %v1353_v1 = vsel %vm1352_vm15, %v2762_v4, %v1349_v34  ;;  %v1356_v30 = vmul.f32 %v2764_v26, %v1355_v3  ;;  %2572 = vmatmul.msk.f32.vlgmr.msrb.gmra.mxu1 %vm106_vm1, %v3600_v27  ;;  %v2609_v34 = vld [vmem:[%s3967_s5 + $0x168] sm:$0xff]  ;;  %v2608_v3 = vld [vmem:[%s3967_s5 + $0x160] sm:$0xff] }
 0xb69   :  { %v1375_v39 = vmul.f32 %v1353_v1, %v3509_v17 }
 0xb6a   :  { %v1357_v10 = vmul.f32 0.5, %v1356_v30 }
 0xb6b   :  { %v1380_v42 = vmul.f32 %v3573_v8, %v1375_v39 }
 0xb6c   :  { %v1358_v23 = vsub.f32 1.5, %v1357_v10  ;;  %v2690_v10 = vld [vmem:[%s3968_s6 + $0x7] ss:$0 sm:$0xff] }
 0xb6d   :  { %v2766_v48 = vpop.eup %2765  ;;  %v3617_v45 = vadd.f32 %v3585_v15, %v1380_v42 }
 0xb6e   :  { %v1359_v46 = vmul.f32 %v2764_v26, %v1358_v23  ;;  %v1365_v47 = vmul.f32 %v2766_v48, %v1333_v29  ;;  %vm1371_vm4 = vweird.f32 %v2766_v48 }
 0xb6f   :  { %2555 = vmatmul.msk.f32.gmra.mxu3 %vm106_vm1, %v3617_v45  ;;  %2564 = vmatmul.msk.f32.gmra.mxu0 %vm106_vm1, %v3617_v45  ;;  %vm1372_vm6 = vmor %vm1370_vm5, %vm1371_vm4 }
 0xb70   :  { %v1363_v17 = vsel %vm1362_vm3, %v2764_v26, %v1359_v46  ;;  %v1366_v50 = vmul.f32 %v2766_v48, %v1365_v47  ;;  %2573 = vmatmul.msk.f32.gmra.mxu1 %vm106_vm1, %v3617_v45  ;;  %v2610_v26 = vld [vmem:[%s3967_s5 + $0x170] sm:$0xff] }
 0xb71   :  { %v1376_v51 = vmul.f32 %v1363_v17, %v3516_v22 }
 0xb72   :  { %v1367_v28 = vmul.f32 0.5, %v1366_v50 }
 0xb73   :  { %v1381_v52 = vmul.f32 %v3573_v8, %v1376_v51 }
 0xb74   :  { %v1368_v31 = vsub.f32 1.5, %v1367_v28 }
 0xb75   :  { %v3628_v35 = vadd.f32 %v3585_v15, %v1381_v52 }
 0xb76   :  { %v1369_v53 = vmul.f32 %v2766_v48, %v1368_v31 }
 0xb77   :  { %2556 = vmatmul.msk.f32.gmra.mxu3 %vm106_vm1, %v3628_v35  ;;  %2565 = vmatmul.msk.f32.gmra.mxu0 %vm106_vm1, %v3628_v35 }
 0xb78   :  { %v1373_v54 = vsel %vm1372_vm6, %v2766_v48, %v1369_v53  ;;  %2574 = vmatmul.msk.f32.gmra.mxu1 %vm106_vm1, %v3628_v35 }
 0xb79   :  { %v1377_v22 = vmul.f32 %v1373_v54, %v3523_v14 }
 0xb7b   :  { %v1382_v55 = vmul.f32 %v3573_v8, %v1377_v22  ;;  %v2687_v8 = vld [vmem:[%s3968_s6 + $0xa] ss:$0 sm:$0xff] }
 0xb7d   :  { %v3639_v57 = vadd.f32 %v3585_v15, %v1382_v55 }
 0xb7f   :  { %2557 = vmatmul.msk.f32.gmra.mxu3 %vm106_vm1, %v3639_v57  ;;  %2566 = vmatmul.msk.f32.gmra.mxu0 %vm106_vm1, %v3639_v57 }
 0xb80   :  { %2575 = vmatmul.msk.f32.gmra.mxu1 %vm106_vm1, %v3639_v57 }
 0xb87   :  { %2595 = vmatmul.msk.f32.vlgmr.msra.gmra.mxu0 %vm106_vm1, %v3600_v27 }
 0xb88   :  { %2604 = vmatmul.msk.f32.vlgmr.msra.gmra.mxu1 %vm106_vm1, %v3600_v27 }
 0xb8f   :  { %2596 = vmatmul.msk.f32.gmra.mxu0 %vm106_vm1, %v3617_v45 }
 0xb90   :  { %2605 = vmatmul.msk.f32.gmra.mxu1 %vm106_vm1, %v3617_v45 }
 0xb97   :  { %2597 = vmatmul.msk.f32.gmra.mxu0 %vm106_vm1, %v3628_v35 }
 0xb98   :  { %2606 = vmatmul.msk.f32.gmra.mxu1 %vm106_vm1, %v3628_v35 }
 0xb9f   :  { %2598 = vmatmul.msk.f32.gmra.mxu0 %vm106_vm1, %v3639_v57 }
 0xba0   :  { %2607 = vmatmul.msk.f32.gmra.mxu1 %vm106_vm1, %v3639_v57 }
 0xbe4   :  { %v1466_v14 = vpop.f32.mrf.mxu0 }
 0xbe5   :  { %v1505_v61 = vpop.f32.mrf.mxu1  ;;  %v1467_v24 = vadd.f32 %v2686_v58, %v1466_v14 }
 0xbe6   :  { %v1506_v16 = vadd.f32 %v2687_v8, %v1505_v61 }
 0xbea   :  { %v1427_v12 = vpop.f32.mrf.mxu3 }
 0xbeb   :  { %v1428_v25 = vadd.f32 %v2688_v21, %v1427_v12 }
 0xbec   :  { %v1469_v63 = vpop.f32.mrf.mxu0 }
 0xbed   :  { %v1508_v4 = vpop.f32.mrf.mxu1  ;;  %v1470_v18 = vadd.f32 %v2686_v58, %v1469_v63 }
 0xbee   :  { %v1509_v41 = vadd.f32 %v2687_v8, %v1508_v4  ;;  %v2691_v4 = vld [vmem:[%s3968_s6 + $0xb] ss:$0 sm:$0xff] }
 0xbf2   :  { %v1430_v29 = vpop.f32.mrf.mxu3 }
 0xbf3   :  { %v1431_v38 = vadd.f32 %v2688_v21, %v1430_v29 }
 0xbf4   :  { %v1472_v5 = vpop.f32.mrf.mxu0 }
 0xbf5   :  { %v1511_v36 = vpop.f32.mrf.mxu1  ;;  %v1473_v15 = vadd.f32 %v2686_v58, %v1472_v5 }
 0xbf6   :  { %v1512_v13 = vadd.f32 %v2687_v8, %v1511_v36 }
 0xbfa   :  { %v1433_v30 = vpop.f32.mrf.mxu3 }
 0xbfb   :  { %v1434_v39 = vadd.f32 %v2688_v21, %v1433_v30 }
 0xbfc   :  { %v1475_v59 = vpop.f32.mrf.mxu0 }
 0xbfd   :  { %v1476_v0 = vadd.f32 %v2686_v58, %v1475_v59  ;;  %v1514_v43 = vpop.f32.mrf.mxu1 }
 0xbfe   :  { %v1515_v11 = vadd.f32 %v2687_v8, %v1514_v43 }
 0xbff   :  { %2576 = vmatpush.xpose.msk.msrb.mxu2 %vm561_vm13, %v1476_v0 }
 0xc00   :  { %1638 = vmatpush.msra.mxu3 %v1515_v11 }
 0xc02   :  { %1639 = vmatpush.msra.mxu3 %v1512_v13  ;;  %v1436_v48 = vpop.f32.mrf.mxu3 }
 0xc03   :  { %2577 = vmatpush.xpose.msk.msrb.mxu2 %vm561_vm13, %v1473_v15  ;;  %v1437_v47 = vadd.f32 %v2688_v21, %v1436_v48 }
 0xc04   :  { %1640 = vmatpush.msra.mxu3 %v1509_v41 }
 0xc05   :  { %v1724_v49 = vpop.f32.mrf.mxu1 }
 0xc06   :  { %1641 = vmatpush.msra.mxu3 %v1506_v16  ;;  %v1725_v50 = vadd.f32 %v2690_v10, %v1724_v49 }
 0xc07   :  { %2578 = vmatpush.xpose.msk.msrb.mxu2 %vm561_vm13, %v1470_v18 }
 0xc0b   :  { %2579 = vmatpush.xpose.msk.msrb.mxu2 %vm561_vm13, %v1467_v24 }
 0xc0d   :  { %v1727_v33 = vpop.f32.mrf.mxu1 }
 0xc0e   :  { %2580 = vmatmul.msk.f32.vlgmr.msrb.gmra.mxu2 %vm561_vm13, %v1428_v25  ;;  %v1728_v17 = vadd.f32 %v2690_v10, %v1727_v33 }
 0xc0f   :  { %1758 = vmatpush.msra.mxu2 %v2611_v7 }
 0xc11   :  { %1759 = vmatpush.msra.mxu2 %v2610_v26 }
 0xc13   :  { %1760 = vmatpush.msra.mxu2 %v2609_v34 }
 0xc15   :  { %1761 = vmatpush.msra.mxu2 %v2608_v3  ;;  %v1730_v1 = vpop.f32.mrf.mxu1 }
 0xc16   :  { %2581 = vmatmul.msk.f32.gmra.mxu2 %vm561_vm13, %v1431_v38  ;;  %v1731_v46 = vadd.f32 %v2690_v10, %v1730_v1 }
 0xc1d   :  { %v1733_v42 = vpop.f32.mrf.mxu1 }
 0xc1e   :  { %v1734_v23 = vadd.f32 %v2690_v10, %v1733_v42  ;;  %2582 = vmatmul.msk.f32.gmra.mxu2 %vm561_vm13, %v1434_v39 }
 0xc20   :  { %2617 = vmatpush.xpose.msk.msrb.mxu3 %vm561_vm13, %v1734_v23 }
 0xc24   :  { %2618 = vmatpush.xpose.msk.msrb.mxu3 %vm561_vm13, %v1731_v46 }
 0xc26   :  { %2583 = vmatmul.msk.f32.gmra.mxu2 %vm561_vm13, %v1437_v47 }
 0xc28   :  { %2619 = vmatpush.xpose.msk.msrb.mxu3 %vm561_vm13, %v1728_v17 }
 0xc2c   :  { %2620 = vmatpush.xpose.msk.msrb.mxu3 %vm561_vm13, %v1725_v50 }
 0xc2e   :  { %2613 = vmatmul.msk.f32.vlgmr.msra.gmra.mxu2 %vm106_vm1, %v3600_v27 }
 0xc36   :  { %2614 = vmatmul.msk.f32.gmra.mxu2 %vm106_vm1, %v3617_v45 }
 0xc3e   :  { %2615 = vmatmul.msk.f32.gmra.mxu2 %vm106_vm1, %v3628_v35 }
 0xc46   :  { %2616 = vmatmul.msk.f32.gmra.mxu2 %vm106_vm1, %v3639_v57 }
 0xc91   :  { %v1558_v51 = vpop.f32.mrf.mxu2 }
 0xc92   :  { %v1559_v28 = vadd.f32 %v1558_v51, %v3276_v32  ;;  %v1685_v51 = vpop.f32.mrf.mxu0 }
 0xc94   :  { %v1570_v52 = vsel %vm106_vm1, %v1559_v28, -inf }
 0xc95   :  { %1571 = vmax.xlane.f32.xlu0 %v1570_v52  ;;  %v2589_v52 = vld [vmem:[%s3969_s7 + $0x28] sm:$0xff] }
 0xc96   :  { %1983 = vmatpush.msrb.mxu2 %v2589_v52 }
 0xc99   :  { %v1561_v31 = vpop.f32.mrf.mxu2 }
 0xc9a   :  { %v1562_v53 = vadd.f32 %v1561_v31, %v3284_v37  ;;  %v2689_v31 = vld [vmem:[%s3968_s6 + $0x3] ss:$0 sm:$0xff] }
 0xc9c   :  { %v1573_v27 = vsel %vm106_vm1, %v1562_v53, -inf }
 0xc9d   :  { %1574 = vmax.xlane.f32.xlu2 %v1573_v27  ;;  %v1688_v27 = vpop.f32.mrf.mxu0 }
 0xca1   :  { %v1564_v54 = vpop.f32.mrf.mxu2 }
 0xca2   :  { %v1565_v45 = vadd.f32 %v1564_v54, %v3292_v40  ;;  %v1689_v54 = vadd.f32 %v2689_v31, %v1688_v27  ;;  %v2629_v27 = vld [vmem:[%s3969_s7 + $0x30] sm:$0xff] }
 0xca4   :  { %v1576_v35 = vsel %vm106_vm1, %v1565_v45, -inf }
 0xca5   :  { %1577 = vmax.xlane.f32.xlu1 %v1576_v35 }
 0xca9   :  { %v1567_v22 = vpop.f32.mrf.mxu2 }
 0xcaa   :  { %v1568_v55 = vadd.f32 %v1567_v22, %v3298_v44 }
 0xcac   :  { %v1579_v57 = vsel %vm106_vm1, %v1568_v55, -inf }
 0xcad   :  { %1580 = vmax.xlane.f32.xlu0 %v1579_v57  ;;  %v2588_v57 = vld [vmem:[%s3969_s7 + $0x20] sm:$0xff] }
 0xcae   :  { %1984 = vmatpush.msrb.mxu2 %v2588_v57 }
 0xcb1   :  { %v1763_v14 = vpop.f32.mrf.mxu2 }
 0xcb2   :  { %v1764_v59 = vadd.f32 %v2691_v4, %v1763_v14 }
 0xcb9   :  { %v1766_v61 = vpop.f32.mrf.mxu2 }
 0xcba   :  { %v1767_v8 = vadd.f32 %v2691_v4, %v1766_v61 }
 0xcc1   :  { %v1769_v63 = vpop.f32.mrf.mxu2 }
 0xcc2   :  { %v1770_v58 = vadd.f32 %v2691_v4, %v1769_v63 }
 0xcc9   :  { %v1772_v5 = vpop.f32.mrf.mxu2 }
 0xcca   :  { %v1773_v36 = vadd.f32 %v2691_v4, %v1772_v5 }
 0xccc   :  { %1896 = vmatpush.msrb.mxu0 %v1773_v36 }
 0xcce   :  { %1897 = vmatpush.msrb.mxu0 %v1770_v58 }
 0xcd0   :  { %1898 = vmatpush.msrb.mxu0 %v1767_v8 }
 0xcd2   :  { %1899 = vmatpush.msrb.mxu0 %v1764_v59 }
 0xd08   :  { %v1572_v0 = vpop.xlane.xlu0 %1571 }
 0xd09   :  { %v1582_v43 = vsub.f32 %v1559_v28, %v1572_v0 }
 0xd0b   :  { %v1586_v11 = vmul.f32 1.442695, %v1582_v43 }
 0xd0d   :  { %2767 = vpow2.f32 %v1586_v11 }
 0xd10   :  { %v1575_v13 = vpop.xlane.xlu2 %1574 }
 0xd11   :  { %v1583_v15 = vsub.f32 %v1562_v53, %v1575_v13  ;;  %v1686_v53 = vadd.f32 %v2689_v31, %v1685_v51 }
 0xd13   :  { %v2768_v41 = vpop.eup %2767  ;;  %v1588_v12 = vmul.f32 1.442695, %v1583_v15 }
 0xd14   :  { %v1594_v16 = vsel %vm106_vm1, %v2768_v41, 0.0 }
 0xd15   :  { %2769 = vpow2.f32 %v1588_v12  ;;  %1595 = vadd.xlane.f32.xlu2 %v1594_v16 }
 0xd18   :  { %v1578_v18 = vpop.xlane.xlu1 %1577 }
 0xd19   :  { %v1584_v49 = vsub.f32 %v1565_v45, %v1578_v18  ;;  %v1691_v45 = vpop.f32.mrf.mxu0 }
 0xd1a   :  { %v1692_v35 = vadd.f32 %v2689_v31, %v1691_v45 }
 0xd1b   :  { %v2770_v21 = vpop.eup %2769  ;;  %v1590_v24 = vmul.f32 1.442695, %v1584_v49 }
 0xd1c   :  { %v1597_v7 = vsel %vm106_vm1, %v2770_v21, 0.0 }
 0xd1d   :  { %2771 = vpow2.f32 %v1590_v24  ;;  %1598 = vadd.xlane.f32.xlu1 %v1597_v7 }
 0xd20   :  { %v1581_v25 = vpop.xlane.xlu0 %1580 }
 0xd21   :  { %v1585_v26 = vsub.f32 %v1568_v55, %v1581_v25  ;;  %v1694_v22 = vpop.f32.mrf.mxu0 }
 0xd22   :  { %v1695_v55 = vadd.f32 %v2689_v31, %v1694_v22 }
 0xd23   :  { %v2772_v29 = vpop.eup %2771  ;;  %v1592_v33 = vmul.f32 1.442695, %v1585_v26 }
 0xd24   :  { %v1600_v34 = vsel %vm106_vm1, %v2772_v29, 0.0 }
 0xd25   :  { %2773 = vpow2.f32 %v1592_v33  ;;  %1601 = vadd.xlane.f32.xlu0 %v1600_v34 }
 0xd2b   :  { %v2774_v3 = vpop.eup %2773 }
 0xd2c   :  { %v1603_v38 = vsel %vm106_vm1, %v2774_v3, 0.0 }
 0xd2d   :  { %1604 = vadd.xlane.f32.xlu2 %v1603_v38 }
 0xd88   :  { %v1596_v1 = vpop.xlane.xlu2 %1595 }
 0xd89   :  { %2775 = vrcp.f32 %v1596_v1 }
 0xd8f   :  { %v2776_v30 = vpop.eup %2775 }
 0xd90   :  { %v1610_v39 = vmul.f32 %v2776_v30, %v2768_v41  ;;  %v1599_v10 = vpop.xlane.xlu1 %1598 }
 0xd91   :  { %2777 = vrcp.f32 %v1599_v10 }
 0xd92   :  { %2584 = vmatmul.msk.f32.vlgmr.msra.gmra.mxu3 %vm106_vm1, %v1610_v39 }
 0xd97   :  { %v2778_v42 = vpop.eup %2777 }
 0xd98   :  { %v1602_v23 = vpop.xlane.xlu0 %1601  ;;  %v1611_v48 = vmul.f32 %v2778_v42, %v2770_v21  ;;  %v2630_v42 = vld [vmem:[%s3969_s7 + $0x38] sm:$0xff] }
 0xd99   :  { %2779 = vrcp.f32 %v1602_v23  ;;  %1942 = vmatpush.msrb.mxu1 %v2630_v42 }
 0xd9a   :  { %2585 = vmatmul.msk.f32.gmra.mxu3 %vm106_vm1, %v1611_v48 }
 0xd9b   :  { %1943 = vmatpush.msrb.mxu1 %v2629_v27 }
 0xd9f   :  { %v2780_v46 = vpop.eup %2779 }
 0xda0   :  { %v1605_v47 = vpop.xlane.xlu2 %1604  ;;  %v1612_v17 = vmul.f32 %v2780_v46, %v2772_v29 }
 0xda1   :  { %2781 = vrcp.f32 %v1605_v47 }
 0xda2   :  { %2586 = vmatmul.msk.f32.gmra.mxu3 %vm106_vm1, %v1612_v17 }
 0xda7   :  { %v2782_v50 = vpop.eup %2781 }
 0xda8   :  { %v1613_v28 = vmul.f32 %v2782_v50, %v2774_v3 }
 0xdaa   :  { %2587 = vmatmul.msk.f32.gmra.mxu3 %vm106_vm1, %v1613_v28 }
 0xdb2   :  { %2621 = vmatmul.msk.f32.vlgmr.msrb.gmra.mxu3 %vm561_vm13, %v1686_v53 }
 0xdba   :  { %2622 = vmatmul.msk.f32.gmra.mxu3 %vm561_vm13, %v1689_v54 }
 0xdc2   :  { %2623 = vmatmul.msk.f32.gmra.mxu3 %vm561_vm13, %v1692_v35 }
 0xdca   :  { %2624 = vmatmul.msk.f32.gmra.mxu3 %vm561_vm13, %v1695_v55 }
 0xe15   :  { %v1643_v14 = vpop.f32.mrf.mxu3 }
 0xe16   :  { %2635 = vmatmul.msk.f32.vlgmr.msrb.gmra.mxu2 %vm561_vm13, %v1643_v14 }
 0xe1d   :  { %v1646_v61 = vpop.f32.mrf.mxu3 }
 0xe1e   :  { %2636 = vmatmul.msk.f32.gmra.mxu2 %vm561_vm13, %v1646_v61  ;;  %v2002_v61 = vperm.slane %v3570_v62, 4 }
 0xe25   :  { %v1649_v63 = vpop.f32.mrf.mxu3 }
 0xe26   :  { %2637 = vmatmul.msk.f32.gmra.mxu2 %vm561_vm13, %v1649_v63 }
 0xe2d   :  { %v1652_v4 = vpop.f32.mrf.mxu3 }
 0xe2e   :  { %2638 = vmatmul.msk.f32.gmra.mxu2 %vm561_vm13, %v1652_v4 }
 0xe35   :  { %v1816_v5 = vpop.f32.mrf.mxu3 }
 0xe36   :  { %v1817_v36 = vadd.f32 %v1816_v5, %v3276_v32 }
 0xe38   :  { %v1828_v58 = vsel %vm106_vm1, %v1817_v36, -inf }
 0xe39   :  { %1829 = vmax.xlane.f32.xlu1 %v1828_v58 }
 0xe3d   :  { %v1819_v8 = vpop.f32.mrf.mxu3 }
 0xe3e   :  { %v1820_v59 = vadd.f32 %v1819_v8, %v3284_v37 }
 0xe40   :  { %v1831_v0 = vsel %vm106_vm1, %v1820_v59, -inf }
 0xe41   :  { %1832 = vmax.xlane.f32.xlu0 %v1831_v0 }
 0xe45   :  { %v1822_v43 = vpop.f32.mrf.mxu3 }
 0xe46   :  { %v1823_v11 = vadd.f32 %v1822_v43, %v3292_v40 }
 0xe48   :  { %v1834_v13 = vsel %vm106_vm1, %v1823_v11, -inf }
 0xe49   :  { %1835 = vmax.xlane.f32.xlu2 %v1834_v13 }
 0xe4d   :  { %v1825_v15 = vpop.f32.mrf.mxu3 }
 0xe4e   :  { %v1826_v41 = vadd.f32 %v1825_v15, %v3298_v44 }
 0xe50   :  { %v1837_v32 = vsel %vm106_vm1, %v1826_v41, -inf }
 0xe51   :  { %1838 = vmax.xlane.f32.xlu1 %v1837_v32 }
 0xe99   :  { %v1986_v55 = vpop.f32.mrf.mxu2 }
 0xea1   :  { %v1989_v4 = vpop.f32.mrf.mxu2 }
 0xea9   :  { %v1992_v43 = vpop.f32.mrf.mxu2 }
 0xeac   :  { %v1830_v12 = vpop.xlane.xlu1 %1829 }
 0xead   :  { %v1840_v16 = vsub.f32 %v1817_v36, %v1830_v12 }
 0xeaf   :  { %v1844_v18 = vmul.f32 1.442695, %v1840_v16 }
 0xeb1   :  { %2783 = vpow2.f32 %v1844_v18  ;;  %v1995_v12 = vpop.f32.mrf.mxu2 }
 0xeb4   :  { %v1833_v37 = vpop.xlane.xlu0 %1832 }
 0xeb5   :  { %v1841_v49 = vsub.f32 %v1820_v59, %v1833_v37 }
 0xeb7   :  { %v2784_v21 = vpop.eup %2783  ;;  %v1846_v24 = vmul.f32 1.442695, %v1841_v49 }
 0xeb8   :  { %v1852_v7 = vsel %vm106_vm1, %v2784_v21, 0.0 }
 0xeb9   :  { %2785 = vpow2.f32 %v1846_v24  ;;  %1853 = vadd.xlane.f32.xlu0 %v1852_v7 }
 0xebc   :  { %v1836_v40 = vpop.xlane.xlu2 %1835 }
 0xebd   :  { %v1842_v25 = vsub.f32 %v1823_v11, %v1836_v40 }
 0xebf   :  { %v2786_v26 = vpop.eup %2785  ;;  %v1848_v29 = vmul.f32 1.442695, %v1842_v25 }
 0xec0   :  { %v1855_v44 = vsel %vm106_vm1, %v2786_v26, 0.0 }
 0xec1   :  { %2787 = vpow2.f32 %v1848_v29  ;;  %1856 = vadd.xlane.f32.xlu2 %v1855_v44 }
 0xec4   :  { %v1839_v33 = vpop.xlane.xlu1 %1838 }
 0xec5   :  { %v1843_v34 = vsub.f32 %v1826_v41, %v1839_v33 }
 0xec7   :  { %v2788_v3 = vpop.eup %2787  ;;  %v1850_v38 = vmul.f32 1.442695, %v1843_v34 }
 0xec8   :  { %v1858_v1 = vsel %vm106_vm1, %v2788_v3, 0.0 }
 0xec9   :  { %2789 = vpow2.f32 %v1850_v38  ;;  %1859 = vadd.xlane.f32.xlu1 %v1858_v1 }
 0xecf   :  { %v2790_v30 = vpop.eup %2789 }
 0xed0   :  { %v1861_v39 = vsel %vm106_vm1, %v2790_v30, 0.0 }
 0xed1   :  { %1862 = vadd.xlane.f32.xlu0 %v1861_v39 }
 0xf2c   :  { %v1854_v10 = vpop.xlane.xlu0 %1853 }
 0xf2d   :  { %2791 = vrcp.f32 %v1854_v10 }
 0xf33   :  { %v2792_v23 = vpop.eup %2791 }
 0xf34   :  { %v1868_v48 = vmul.f32 %v2792_v23, %v2784_v21  ;;  %v1857_v46 = vpop.xlane.xlu2 %1856 }
 0xf35   :  { %2793 = vrcp.f32 %v1857_v46  ;;  %v2641_v46 = vld [vmem:[%s3970_s8 + $0x30] sm:$0xff] }
 0xf36   :  { %2625 = vmatmul.msk.f32.vlgmr.msrb.gmra.mxu0 %vm106_vm1, %v1868_v48  ;;  %v2642_v48 = vld [vmem:[%s3970_s8 + $0x38] sm:$0xff] }
 0xf37   :  { %2139 = vmatpush.msra.mxu3 %v2642_v48 }
 0xf39   :  { %2140 = vmatpush.msra.mxu3 %v2641_v46 }
 0xf3b   :  { %v2794_v47 = vpop.eup %2793 }
 0xf3c   :  { %v1860_v17 = vpop.xlane.xlu1 %1859  ;;  %v1869_v50 = vmul.f32 %v2794_v47, %v2786_v26  ;;  %v2640_v47 = vld [vmem:[%s3970_s8 + $0x28] sm:$0xff] }
 0xf3d   :  { %2795 = vrcp.f32 %v1860_v17  ;;  %2141 = vmatpush.msra.mxu3 %v2640_v47  ;;  %v2639_v17 = vld [vmem:[%s3970_s8 + $0x20] sm:$0xff] }
 0xf3e   :  { %2626 = vmatmul.msk.f32.gmra.mxu0 %vm106_vm1, %v1869_v50 }
 0xf3f   :  { %2142 = vmatpush.msra.mxu3 %v2639_v17 }
 0xf43   :  { %v2796_v51 = vpop.eup %2795 }
 0xf44   :  { %v1863_v28 = vpop.xlane.xlu0 %1862  ;;  %v1870_v52 = vmul.f32 %v2796_v51, %v2788_v3 }
 0xf45   :  { %2797 = vrcp.f32 %v1863_v28 }
 0xf46   :  { %2627 = vmatmul.msk.f32.gmra.mxu0 %vm106_vm1, %v1870_v52 }
 0xf4b   :  { %v2798_v31 = vpop.eup %2797 }
 0xf4c   :  { %v1871_v53 = vmul.f32 %v2798_v31, %v2790_v30 }
 0xf4e   :  { %2628 = vmatmul.msk.f32.gmra.mxu0 %vm106_vm1, %v1871_v53 }
 0xfb3   :  { %v1901_v54 = vpop.f32.mrf.mxu0 }
 0xfb4   :  { %2631 = vmatmul.msk.f32.vlgmr.msrb.gmra.mxu1 %vm561_vm13, %v1901_v54 }
 0xfbb   :  { %v1904_v45 = vpop.f32.mrf.mxu0 }
 0xfbc   :  { %2632 = vmatmul.msk.f32.gmra.mxu1 %vm561_vm13, %v1904_v45 }
 0xfc3   :  { %v1907_v35 = vpop.f32.mrf.mxu0 }
 0xfc4   :  { %2633 = vmatmul.msk.f32.gmra.mxu1 %vm561_vm13, %v1907_v35 }
 0xfcb   :  { %v1910_v22 = vpop.f32.mrf.mxu0 }
 0xfcc   :  { %2634 = vmatmul.msk.f32.gmra.mxu1 %vm561_vm13, %v1910_v22 }
0x1031   :  { %v1945_v57 = vpop.f32.mrf.mxu1 }
0x1032   :  { %v1987_v14 = vadd.f32 %v1986_v55, %v1945_v57 }
0x1034   :  { %v1998_v63 = vadd.f32 %v1987_v14, %v3481_v60 }
0x1036   :  { %v3771_v5 = vadd.f32 %v2002_v61, %v1998_v63 }
0x1038   :  { %v2007_v36 = vsel %vm106_vm1, %v3771_v5, 0.0 }
0x1039   :  { %2008 = vadd.xlane.f32.xlu2 %v2007_v36  ;;  %v1948_v58 = vpop.f32.mrf.mxu1  ;;  %v2095_v36 = vperm.slane %v3570_v62, 2 }
0x103a   :  { %v1990_v8 = vadd.f32 %v1989_v4, %v1948_v58  ;;  %v2663_v58 = vld [vmem:[%s3972_s10 + $0xf8] sm:$0xff] }
0x103b   :  { %2209 = vmatpush.msra.mxu0 %v2663_v58 }
0x103c   :  { %v1999_v59 = vadd.f32 %v1990_v8, %v3486_v2  ;;  %v2662_v8 = vld [vmem:[%s3972_s10 + $0xf0] sm:$0xff] }
0x103d   :  { %2210 = vmatpush.msra.mxu0 %v2662_v8 }
0x103e   :  { %v3776_v0 = vadd.f32 %v2002_v61, %v1999_v59 }
0x1040   :  { %v2010_v11 = vsel %vm106_vm1, %v3776_v0, 0.0 }
0x1041   :  { %2011 = vadd.xlane.f32.xlu1 %v2010_v11  ;;  %v1951_v13 = vpop.f32.mrf.mxu1  ;;  %v2100_v11 = vperm.slane %v3570_v62, 3 }
0x1042   :  { %v1993_v60 = vadd.f32 %v1992_v43, %v1951_v13 }
0x1044   :  { %v2000_v15 = vadd.f32 %v1993_v60, %v3491_v6  ;;  %v2661_v60 = vld [vmem:[%s3972_s10 + $0xe8] sm:$0xff] }
0x1045   :  { %2211 = vmatpush.msra.mxu0 %v2661_v60 }
0x1046   :  { %v3781_v41 = vadd.f32 %v2002_v61, %v2000_v15 }
0x1048   :  { %v2013_v32 = vsel %vm106_vm1, %v3781_v41, 0.0 }
0x1049   :  { %2014 = vadd.xlane.f32.xlu0 %v2013_v32  ;;  %v1954_v16 = vpop.f32.mrf.mxu1 }
0x104a   :  { %v1996_v2 = vadd.f32 %v1995_v12, %v1954_v16 }
0x104c   :  { %v2001_v18 = vadd.f32 %v1996_v2, %v3496_v9  ;;  %v2660_v2 = vld [vmem:[%s3972_s10 + $0xe0] sm:$0xff] }
0x104d   :  { %2212 = vmatpush.msra.mxu0 %v2660_v2 }
0x104e   :  { %v3786_v37 = vadd.f32 %v2002_v61, %v2001_v18 }
0x1050   :  { %v2016_v49 = vsel %vm106_vm1, %v3786_v37, 0.0 }
0x1051   :  { %2017 = vadd.xlane.f32.xlu2 %v2016_v49 }
0x10ac   :  { %v2009_v21 = vpop.xlane.xlu2 %2008 }
0x10ad   :  { %v2019_v6 = vmul.f32 %v2009_v21, %v3062_v56 }
0x10af   :  { %v2023_v24 = vsub.f32 %v3771_v5, %v2019_v6 }
0x10b1   :  { %v2027_v7 = vmul.f32 %v2023_v24, %v2023_v24 }
0x10b3   :  { %v2031_v40 = vsel %vm106_vm1, %v2027_v7, 0.0 }
0x10b4   :  { %2032 = vadd.xlane.f32.xlu1 %v2031_v40  ;;  %v2012_v25 = vpop.xlane.xlu1 %2011 }
0x10b5   :  { %v2020_v26 = vmul.f32 %v2012_v25, %v3062_v56 }
0x10b7   :  { %v3795_v9 = vsub.f32 %v3776_v0, %v2020_v26 }
0x10b9   :  { %v2028_v29 = vmul.f32 %v3795_v9, %v3795_v9 }
0x10bb   :  { %v2034_v44 = vsel %vm106_vm1, %v2028_v29, 0.0 }
0x10bc   :  { %v2015_v33 = vpop.xlane.xlu0 %2014  ;;  %2035 = vadd.xlane.f32.xlu0 %v2034_v44 }
0x10bd   :  { %v2021_v34 = vmul.f32 %v2015_v33, %v3062_v56 }
0x10bf   :  { %v3802_v3 = vsub.f32 %v3781_v41, %v2021_v34 }
0x10c1   :  { %v2029_v38 = vmul.f32 %v3802_v3, %v3802_v3 }
0x10c3   :  { %v2037_v1 = vsel %vm106_vm1, %v2029_v38, 0.0 }
0x10c4   :  { %2038 = vadd.xlane.f32.xlu2 %v2037_v1  ;;  %v2018_v30 = vpop.xlane.xlu2 %2017 }
0x10c5   :  { %v2022_v39 = vmul.f32 %v2018_v30, %v3062_v56 }
0x10c7   :  { %v3809_v10 = vsub.f32 %v3786_v37, %v2022_v39 }
0x10c9   :  { %v2030_v42 = vmul.f32 %v3809_v10, %v3809_v10 }
0x10cb   :  { %v2040_v23 = vsel %vm106_vm1, %v2030_v42, 0.0 }
0x10cc   :  { %2041 = vadd.xlane.f32.xlu1 %v2040_v23 }
0x1127   :  { %v2033_v50 = vpop.xlane.xlu1 %2032 }
0x1128   :  { %v2043_v51 = vmul.f32 %v2033_v50, %v3062_v56 }
0x112a   :  { %v2047_v28 = vadd.f32 1e-05, %v2043_v51 }
0x112c   :  { %2799 = vrsqrt.f32 %v2047_v28  ;;  %vm2057_vm7 = vweird.f32 %v2047_v28 }
0x112f   :  { %v2036_v52 = vpop.xlane.xlu0 %2035 }
0x1130   :  { %v2044_v31 = vmul.f32 %v2036_v52, %v3062_v56  ;;  %v2658_v52 = vld [vmem:[%s3972_s10 + $0xd0] sm:$0xff] }
0x1132   :  { %v2800_v53 = vpop.eup %2799  ;;  %v2048_v27 = vadd.f32 1e-05, %v2044_v31  ;;  %v2657_v31 = vld [vmem:[%s3972_s10 + $0xc8] sm:$0xff] }
0x1133   :  { %v2052_v54 = vmul.f32 %v2800_v53, %v2047_v28  ;;  %vm2058_vm13 = vweird.f32 %v2800_v53 }
0x1134   :  { %2801 = vrsqrt.f32 %v2048_v27  ;;  %vm2059_vm8 = vmor %vm2057_vm7, %vm2058_vm13  ;;  %vm2067_vm10 = vweird.f32 %v2048_v27 }
0x1135   :  { %v2053_v45 = vmul.f32 %v2800_v53, %v2052_v54  ;;  %v2653_v54 = vld [vmem:[%s3972_s10 + $0xa8] sm:$0xff] }
0x1137   :  { %v2054_v35 = vmul.f32 0.5, %v2053_v45  ;;  %v2039_v22 = vpop.xlane.xlu2 %2038  ;;  %v2652_v45 = vld [vmem:[%s3972_s10 + $0xa0] sm:$0xff] }
0x1138   :  { %v2045_v55 = vmul.f32 %v2039_v22, %v3062_v56  ;;  %v2650_v22 = vld [vmem:[%s3972_s10 + $0x90] sm:$0xff] }
0x1139   :  { %v2055_v57 = vsub.f32 1.5, %v2054_v35  ;;  %v2651_v35 = vld [vmem:[%s3972_s10 + $0x98] sm:$0xff] }
0x113a   :  { %v2802_v14 = vpop.eup %2801  ;;  %v2049_v61 = vadd.f32 1e-05, %v2045_v55  ;;  %v2649_v55 = vld [vmem:[%s3972_s10 + $0x88] sm:$0xff] }
0x113b   :  { %v2056_v63 = vmul.f32 %v2800_v53, %v2055_v57  ;;  %v2062_v4 = vmul.f32 %v2802_v14, %v2048_v27  ;;  %vm2068_vm9 = vweird.f32 %v2802_v14  ;;  %v2654_v27 = vld [vmem:[%s3972_s10 + $0xb0] sm:$0xff]  ;;  %v2648_v57 = vld [vmem:[%s3972_s10 + $0x80] sm:$0xff] }
0x113c   :  { %2803 = vrsqrt.f32 %v2049_v61  ;;  %vm2069_vm11 = vmor %vm2067_vm10, %vm2068_vm9  ;;  %vm2077_vm14 = vweird.f32 %v2049_v61 }
0x113d   :  { %v2060_v59 = vsel %vm2059_vm8, %v2800_v53, %v2056_v63  ;;  %v2063_v43 = vmul.f32 %v2802_v14, %v2062_v4  ;;  %v2655_v53 = vld [vmem:[%s3972_s10 + $0xb8] sm:$0xff] }
0x113e   :  { %v2091_v13 = vmul.f32 %v2060_v59, %v2023_v24 }
0x113f   :  { %v2064_v15 = vmul.f32 0.5, %v2063_v43  ;;  %v2042_v32 = vpop.xlane.xlu1 %2041 }
0x1140   :  { %v2096_v12 = vmul.f32 %v2095_v36, %v2091_v13  ;;  %v2046_v16 = vmul.f32 %v2042_v32, %v3062_v56 }
0x1141   :  { %v2065_v18 = vsub.f32 1.5, %v2064_v15 }
0x1142   :  { %v2804_v49 = vpop.eup %2803  ;;  %v2101_v62 = vadd.f32 %v2100_v11, %v2096_v12  ;;  %v2050_v21 = vadd.f32 1e-05, %v2046_v16 }
0x1143   :  { %v2066_v6 = vmul.f32 %v2802_v14, %v2065_v18  ;;  %v2072_v24 = vmul.f32 %v2804_v49, %v2049_v61  ;;  %vm2078_vm12 = vweird.f32 %v2804_v49 }
0x1144   :  { %2805 = vrsqrt.f32 %v2050_v21  ;;  %2644 = vmatmul.msk.f32.vlgmr.msra.gmra.mxu3 %vm106_vm1, %v2101_v62  ;;  %vm2079_vm15 = vmor %vm2077_vm14, %vm2078_vm12  ;;  %vm2087_vm2 = vweird.f32 %v2050_v21 }
0x1145   :  { %v2070_v7 = vsel %vm2069_vm11, %v2802_v14, %v2066_v6  ;;  %v2073_v40 = vmul.f32 %v2804_v49, %v2072_v24  ;;  %v2692_v14 = vld [vmem:[%s3971_s9 + $0x1] ss:$0 sm:$0xff] }
0x1146   :  { %v2092_v25 = vmul.f32 %v2070_v7, %v3795_v9 }
0x1147   :  { %v2074_v26 = vmul.f32 0.5, %v2073_v40 }
0x1148   :  { %v2097_v29 = vmul.f32 %v2095_v36, %v2092_v25 }
0x1149   :  { %v2075_v44 = vsub.f32 1.5, %v2074_v26 }
0x114a   :  { %v2806_v33 = vpop.eup %2805  ;;  %v2102_v34 = vadd.f32 %v2100_v11, %v2097_v29 }
0x114b   :  { %v2076_v38 = vmul.f32 %v2804_v49, %v2075_v44  ;;  %v2082_v1 = vmul.f32 %v2806_v33, %v2050_v21  ;;  %vm2088_vm0 = vweird.f32 %v2806_v33 }
0x114c   :  { %2645 = vmatmul.msk.f32.gmra.mxu3 %vm106_vm1, %v2102_v34  ;;  %vm2089_vm3 = vmor %vm2087_vm2, %vm2088_vm0 }
0x114d   :  { %v2080_v30 = vsel %vm2079_vm15, %v2804_v49, %v2076_v38  ;;  %v2083_v39 = vmul.f32 %v2806_v33, %v2082_v1 }
0x114e   :  { %v2093_v42 = vmul.f32 %v2080_v30, %v3802_v3  ;;  %v2659_v3 = vld [vmem:[%s3972_s10 + $0xd8] sm:$0xff] }
0x114f   :  { %v2084_v23 = vmul.f32 0.5, %v2083_v39  ;;  %2213 = vmatpush.msra.mxu0 %v2659_v3 }
0x1150   :  { %v2098_v48 = vmul.f32 %v2095_v36, %v2093_v42 }
0x1151   :  { %v2085_v46 = vsub.f32 1.5, %v2084_v23  ;;  %2214 = vmatpush.msra.mxu0 %v2658_v52 }
0x1152   :  { %v2103_v9 = vadd.f32 %v2100_v11, %v2098_v48 }
0x1153   :  { %v2086_v47 = vmul.f32 %v2806_v33, %v2085_v46  ;;  %2215 = vmatpush.msra.mxu0 %v2657_v31 }
0x1154   :  { %2646 = vmatmul.msk.f32.gmra.mxu3 %vm106_vm1, %v2103_v9 }
0x1155   :  { %v2090_v17 = vsel %vm2089_vm3, %v2806_v33, %v2086_v47 }
0x1156   :  { %v2094_v50 = vmul.f32 %v2090_v17, %v3809_v10  ;;  %v2656_v10 = vld [vmem:[%s3972_s10 + $0xc0] sm:$0xff] }
0x1157   :  { %2216 = vmatpush.msra.mxu0 %v2656_v10  ;;  %v2828_v10 = vld [vmem:[%s3973_s11 + $0x8] sm:$0x3f] }
0x1158   :  { %v2099_v51 = vmul.f32 %v2095_v36, %v2094_v50 }
0x1159   :  { %2217 = vmatpush.msra.mxu0 %v2655_v53  ;;  %v2242_v53 = vperm.slane %v2828_v10, 5 }
0x115a   :  { %v2104_v28 = vadd.f32 %v2100_v11, %v2099_v51 }
0x115b   :  { %2218 = vmatpush.msra.mxu0 %v2654_v27 }
0x115c   :  { %2647 = vmatmul.msk.f32.gmra.mxu3 %vm106_vm1, %v2104_v28 }
0x115d   :  { %2219 = vmatpush.msra.mxu0 %v2653_v54 }
0x115f   :  { %2220 = vmatpush.msra.mxu0 %v2652_v45 }
0x1161   :  { %2221 = vmatpush.msra.mxu0 %v2651_v35 }
0x1163   :  { %2222 = vmatpush.msra.mxu0 %v2650_v22 }
0x1165   :  { %2223 = vmatpush.msra.mxu0 %v2649_v55 }
0x1167   :  { %2224 = vmatpush.msra.mxu0 %v2648_v57 }
0x11c7   :  { %v2144_v61 = vpop.f32.mrf.mxu3 }
0x11c8   :  { %v2145_v63 = vadd.f32 %v2692_v14, %v2144_v61 }
0x11ca   :  { %v2160_v4 = vmul.f32 0.044715, %v2145_v63  ;;  %v2156_v62 = vmul.f32 0.5, %v2145_v63 }
0x11cc   :  { %v2164_v36 = vmul.f32 %v2160_v4, %v2145_v63 }
0x11ce   :  { %v2168_v58 = vmul.f32 %v2164_v36, %v2145_v63 }
0x11cf   :  { %v2147_v8 = vpop.f32.mrf.mxu3 }
0x11d0   :  { %v2172_v59 = vadd.f32 %v2168_v58, %v2145_v63  ;;  %v2148_v43 = vadd.f32 %v2692_v14, %v2147_v8 }
0x11d2   :  { %v2176_v11 = vmul.f32 0.7978846, %v2172_v59  ;;  %v2161_v13 = vmul.f32 0.044715, %v2148_v43  ;;  %v2157_v34 = vmul.f32 0.5, %v2148_v43 }
0x11d4   :  { %2807 = vtanh.f32 %v2176_v11  ;;  %v2165_v60 = vmul.f32 %v2161_v13, %v2148_v43 }
0x11d6   :  { %v2169_v15 = vmul.f32 %v2165_v60, %v2148_v43 }
0x11d7   :  { %v2150_v32 = vpop.f32.mrf.mxu3 }
0x11d8   :  { %v2151_v12 = vadd.f32 %v2692_v14, %v2150_v32  ;;  %v2173_v16 = vadd.f32 %v2169_v15, %v2148_v43 }
0x11da   :  { %v2808_v2 = vpop.eup %2807  ;;  %v2162_v18 = vmul.f32 0.044715, %v2151_v12  ;;  %v2177_v49 = vmul.f32 0.7978846, %v2173_v16  ;;  %v2158_v46 = vmul.f32 0.5, %v2151_v12 }
0x11db   :  { %v2184_v21 = vadd.f32 1.0, %v2808_v2 }
0x11dc   :  { %2809 = vtanh.f32 %v2177_v49  ;;  %v2166_v6 = vmul.f32 %v2162_v18, %v2151_v12 }
0x11dd   :  { %v2188_v24 = vmul.f32 %v2184_v21, %v2156_v62 }
0x11de   :  { %v2170_v7 = vmul.f32 %v2166_v6, %v2151_v12 }
0x11df   :  { %v2153_v40 = vpop.f32.mrf.mxu3  ;;  %2225 = vmatmul.f32.vlgmr.msra.gmra.mxu0 %v2188_v24  ;;  %v3928_v24 = vld [vmem:[%s3974_s12] sm:$0x3f] }
0x11e0   :  { %v2154_v25 = vadd.f32 %v2692_v14, %v2153_v40  ;;  %v2174_v26 = vadd.f32 %v2170_v7, %v2151_v12  ;;  %v2345_v7 = vsub.f32 0.0, %v3928_v24 }
0x11e2   :  { %v2810_v29 = vpop.eup %2809  ;;  %v2163_v44 = vmul.f32 0.044715, %v2154_v25  ;;  %v2178_v33 = vmul.f32 0.7978846, %v2174_v26  ;;  %v2159_v50 = vmul.f32 0.5, %v2154_v25 }
0x11e3   :  { %v2185_v38 = vadd.f32 1.0, %v2810_v29  ;;  %v2346_v40 = vmul.f32 1.442695, %v2345_v7 }
0x11e4   :  { %2811 = vtanh.f32 %v2178_v33  ;;  %v2167_v1 = vmul.f32 %v2163_v44, %v2154_v25 }
0x11e5   :  { %v2189_v30 = vmul.f32 %v2185_v38, %v2157_v34 }
0x11e6   :  { %v2171_v39 = vmul.f32 %v2167_v1, %v2154_v25 }
0x11e7   :  { %2228 = vmatmul.f32.gmra.mxu0 %v2189_v30 }
0x11e8   :  { %v2175_v42 = vadd.f32 %v2171_v39, %v2154_v25 }
0x11ea   :  { %v2812_v23 = vpop.eup %2811  ;;  %v2179_v48 = vmul.f32 0.7978846, %v2175_v42 }
0x11eb   :  { %v2186_v9 = vadd.f32 1.0, %v2812_v23 }
0x11ec   :  { %2813 = vtanh.f32 %v2179_v48 }
0x11ed   :  { %v2190_v47 = vmul.f32 %v2186_v9, %v2158_v46  ;;  %2815 = vpow2.f32 %v2346_v40 }
0x11ef   :  { %2231 = vmatmul.f32.gmra.mxu0 %v2190_v47 }
0x11f2   :  { %v2814_v17 = vpop.eup %2813 }
0x11f3   :  { %v2187_v51 = vadd.f32 1.0, %v2814_v17  ;;  %v2816_v25 = vpop.eup %2815 }
0x11f4   :  { %v2348_v26 = vadd.f32 1.0, %v2816_v25 }
0x11f5   :  { %v2191_v28 = vmul.f32 %v2187_v51, %v2159_v50 }
0x11f6   :  { %2817 = vrcp.f32 %v2348_v26  ;;  %v2360_v38 = vand.u32 2147483648, %v2348_v26  ;;  %vm2354_vm4 = vweird.f32 %v2348_v26  ;;  %v2358_v30 = vand.u32 2147483647, %v2348_v26 }
0x11f7   :  { %2234 = vmatmul.f32.gmra.mxu0 %v2191_v28 }
0x11f8   :  { %v2361_v39 = vor.u32 1.1754944e-38, %v2360_v38  ;;  %vm2359_vm13 = vcmp.eq.f32.partialorder %v2358_v30, 8.507059e+37  ;;  %v2340_v38 = vperm.slane %v3928_v24, 1 }
0x11fc   :  { %v2818_v29 = vpop.eup %2817 }
0x11fd   :  { %v2350_v44 = vmul.f32 %v2818_v29, %v2348_v26  ;;  %vm2355_vm5 = vweird.f32 %v2818_v29  ;;  %v2335_v26 = vperm.slane %v3928_v24, 0 }
0x11fe   :  { %vm2356_vm6 = vmor %vm2354_vm4, %vm2355_vm5 }
0x11ff   :  { %v2351_v33 = vsub.f32 1.0, %v2350_v44 }
0x1201   :  { %v2352_v34 = vmul.f32 %v2818_v29, %v2351_v33 }
0x1203   :  { %v2353_v1 = vadd.f32 %v2818_v29, %v2352_v34 }
0x1205   :  { %v2357_v42 = vsel %vm2356_vm6, %v2818_v29, %v2353_v1 }
0x1206   :  { %v2362_v23 = vsel %vm2359_vm13, %v2361_v39, %v2357_v42  ;;  %vm2433_vm13 = vcmask 9216  }
0x1207   :  { %v2374_v48 = vsub.f32 1.0, %v2362_v23  ;;  %v2367_v46 = vrot.slane %v2362_v23, 5 }
0x1209   :  { %v2376_v9 = vrot.slane %v2374_v48, 5  ;;  %2667 = vpush %v2367_v46 }
0x120b   :  { %2669 = vpush %v2376_v9 }
0x125c   :  { %v2226_v3 = vpop.f32.mrf.mxu0 }
0x125d   :  { %v2238_v61 = vadd.f32 %v2226_v3, %v3771_v5 }
0x125f   :  { %v2243_v4 = vadd.f32 %v2242_v53, %v2238_v61 }
0x1261   :  { %v2247_v36 = vsel %vm106_vm1, %v2243_v4, 0.0 }
0x1264   :  { %v2229_v52 = vpop.f32.mrf.mxu0 }
0x1265   :  { %v2239_v31 = vadd.f32 %v2229_v52, %v3776_v0 }
0x1267   :  { %v2244_v27 = vadd.f32 %v2242_v53, %v2239_v31 }
0x1269   :  { %v2250_v54 = vsel %vm106_vm1, %v2244_v27, 0.0 }
0x126a   :  { %2251 = vadd.xlane.f32.xlu1 %v2250_v54 }
0x126c   :  { %v2232_v45 = vpop.f32.mrf.mxu0 }
0x126d   :  { %v2240_v35 = vadd.f32 %v2232_v45, %v3781_v41 }
0x126f   :  { %v2245_v22 = vadd.f32 %v2242_v53, %v2240_v35 }
0x1271   :  { %v2253_v55 = vsel %vm106_vm1, %v2245_v22, 0.0 }
0x1272   :  { %2254 = vadd.xlane.f32.xlu2 %v2253_v55  ;;  %v2408_v55 = vld [vmem:[%s3975_s13 + $0x18] sm:$0xff] }
0x1273   :  { %2425 = vmatpush.msra.mxu2 %v2408_v55 }
0x1274   :  { %v2235_v57 = vpop.f32.mrf.mxu0 }
0x1275   :  { %v2241_v14 = vadd.f32 %v2235_v57, %v3786_v37  ;;  %v2407_v57 = vld [vmem:[%s3975_s13 + $0x10] sm:$0xff] }
0x1276   :  { %2426 = vmatpush.msra.mxu2 %v2407_v57 }
0x1277   :  { %v2246_v0 = vadd.f32 %v2242_v53, %v2241_v14 }
0x1279   :  { %v2256_v63 = vsel %vm106_vm1, %v2246_v0, 0.0 }
0x127a   :  { %2257 = vadd.xlane.f32.xlu0 %v2256_v63  ;;  %v2406_v63 = vld [vmem:[%s3975_s13 + $0x8] sm:$0xff] }
0x127b   :  { %2427 = vmatpush.msra.mxu2 %v2406_v63 }
0x1282   :  { %2248 = vadd.xlane.f32.xlu0 %v2247_v36 }
0x12dd   :  { %v2252_v58 = vpop.xlane.xlu1 %2251 }
0x12de   :  { %v2260_v41 = vmul.f32 %v2252_v58, %v3062_v56  ;;  %v2405_v58 = vld [vmem:[%s3975_s13] sm:$0xff]  ;;  %s2668_s13 = spop %2667 }
0x12df   :  { %2428 = vmatpush.msra.mxu2 %v2405_v58  ;;  %s2670_s7 = spop %2669 }
0x12e0   :  { %v3902_v8 = vsub.f32 %v2244_v27, %v2260_v41 }
0x12e2   :  { %v2268_v59 = vmul.f32 %v3902_v8, %v3902_v8 }
0x12e4   :  { %v2274_v37 = vsel %vm106_vm1, %v2268_v59, 0.0 }
0x12e5   :  { %v2255_v43 = vpop.xlane.xlu2 %2254  ;;  %2275 = vadd.xlane.f32.xlu0 %v2274_v37 }
0x12e6   :  { %v2261_v5 = vmul.f32 %v2255_v43, %v3062_v56 }
0x12e8   :  { %v3908_v11 = vsub.f32 %v2245_v22, %v2261_v5 }
0x12ea   :  { %v2269_v13 = vmul.f32 %v3908_v11, %v3908_v11 }
0x12ec   :  { %v2277_v60 = vsel %vm106_vm1, %v2269_v13, 0.0 }
0x12ed   :  { %2278 = vadd.xlane.f32.xlu1 %v2277_v60  ;;  %v2258_v15 = vpop.xlane.xlu0 %2257 }
0x12ee   :  { %v2262_v32 = vmul.f32 %v2258_v15, %v3062_v56 }
0x12f0   :  { %v3914_v12 = vsub.f32 %v2246_v0, %v2262_v32 }
0x12f2   :  { %v2270_v16 = vmul.f32 %v3914_v12, %v3914_v12 }
0x12f4   :  { %v2280_v2 = vsel %vm106_vm1, %v2270_v16, 0.0 }
0x12f5   :  { %2281 = vadd.xlane.f32.xlu2 %v2280_v2  ;;  %v2249_v18 = vpop.xlane.xlu0 %2248  ;;  %v2363_v2 = vmul.u32 16, %v3018_v20 }
0x12f6   :  { %v2259_v49 = vmul.f32 %v2249_v18, %v3062_v56 }
0x12f7   :  { %v2364_v44 = vadd.s32 10, %v2363_v2  ;;  %v2372_v34 = vadd.s32 9, %v2363_v2 }
0x12f8   :  { %v3920_v62 = vsub.f32 %v2243_v4, %v2259_v49 }
0x12f9   :  { %vm2365_vm3 = vcmp.eq.s32.totalorder %v3016_v19, %v2364_v44  ;;  %vm2373_vm5 = vcmp.eq.s32.totalorder %v3016_v19, %v2372_v34  ;;  %v2409_v19 = vperm.slane %v3928_v24, 4 }
0x12fa   :  { %v2267_v21 = vmul.f32 %v3920_v62, %v3920_v62 }
0x12fc   :  { %v2271_v6 = vsel %vm106_vm1, %v2267_v21, 0.0 }
0x12fd   :  { %2272 = vadd.xlane.f32.xlu2 %v2271_v6 }
0x1358   :  { %v2276_v47 = vpop.xlane.xlu0 %2275 }
0x1359   :  { %v2284_v17 = vmul.f32 %v2276_v47, %v3062_v56 }
0x135b   :  { %v2288_v50 = vadd.f32 1e-05, %v2284_v17 }
0x135d   :  { %2819 = vrsqrt.f32 %v2288_v50  ;;  %vm2307_vm11 = vweird.f32 %v2288_v50 }
0x1360   :  { %v2279_v51 = vpop.xlane.xlu1 %2278 }
0x1361   :  { %v2285_v28 = vmul.f32 %v2279_v51, %v3062_v56 }
0x1363   :  { %v2289_v3 = vadd.f32 1e-05, %v2285_v28  ;;  %v2820_v52 = vpop.eup %2819 }
0x1364   :  { %v2302_v31 = vmul.f32 %v2820_v52, %v2288_v50  ;;  %vm2308_vm8 = vweird.f32 %v2820_v52 }
0x1365   :  { %2821 = vrsqrt.f32 %v2289_v3  ;;  %vm2317_vm9 = vweird.f32 %v2289_v3  ;;  %vm2309_vm14 = vmor %vm2307_vm11, %vm2308_vm8 }
0x1366   :  { %v2303_v45 = vmul.f32 %v2820_v52, %v2302_v31 }
0x1368   :  { %v2282_v10 = vpop.xlane.xlu2 %2281  ;;  %v2304_v14 = vmul.f32 0.5, %v2303_v45 }
0x1369   :  { %v2286_v53 = vmul.f32 %v2282_v10, %v3062_v56 }
0x136a   :  { %v2305_v37 = vsub.f32 1.5, %v2304_v14 }
0x136b   :  { %v2822_v27 = vpop.eup %2821  ;;  %v2290_v54 = vadd.f32 1e-05, %v2286_v53 }
0x136c   :  { %v2312_v35 = vmul.f32 %v2822_v27, %v2289_v3  ;;  %vm2318_vm7 = vweird.f32 %v2822_v27  ;;  %v2306_v60 = vmul.f32 %v2820_v52, %v2305_v37 }
0x136d   :  { %2823 = vrsqrt.f32 %v2290_v54  ;;  %vm2319_vm10 = vmor %vm2317_vm9, %vm2318_vm7  ;;  %vm2327_vm15 = vweird.f32 %v2290_v54 }
0x136e   :  { %v2313_v22 = vmul.f32 %v2822_v27, %v2312_v35  ;;  %v2310_v18 = vsel %vm2309_vm14, %v2820_v52, %v2306_v60 }
0x136f   :  { %v2332_v29 = vmul.f32 %v2310_v18, %v3902_v8  ;;  %v2378_v8 = vstv %s2670_s7 }
0x1370   :  { %v2314_v0 = vmul.f32 0.5, %v2313_v22  ;;  %v2273_v61 = vpop.xlane.xlu2 %2272  ;;  %v2380_v17 = vsel %vm2373_vm5, %v2378_v8, 0.0 }
0x1371   :  { %v2283_v4 = vmul.f32 %v2273_v61, %v3062_v56  ;;  %v2337_v39 = vmul.f32 %v2335_v26, %v2332_v29 }
0x1372   :  { %v2315_v36 = vsub.f32 1.5, %v2314_v0 }
0x1373   :  { %v2824_v41 = vpop.eup %2823  ;;  %v2287_v59 = vadd.f32 1e-05, %v2283_v4  ;;  %v2342_v46 = vadd.f32 %v2340_v38, %v2337_v39 }
0x1374   :  { %v2322_v43 = vmul.f32 %v2824_v41, %v2290_v54  ;;  %v2316_v5 = vmul.f32 %v2822_v27, %v2315_v36  ;;  %vm2328_vm12 = vweird.f32 %v2824_v41 }
0x1375   :  { %2825 = vrsqrt.f32 %v2287_v59  ;;  %vm2329_vm0 = vmor %vm2327_vm15, %vm2328_vm12  ;;  %vm2297_vm4 = vweird.f32 %v2287_v59 }
0x1376   :  { %v2323_v13 = vmul.f32 %v2824_v41, %v2322_v43  ;;  %v2320_v15 = vsel %vm2319_vm10, %v2822_v27, %v2316_v5 }
0x1377   :  { %v2333_v6 = vmul.f32 %v2320_v15, %v3908_v11 }
0x1378   :  { %v2324_v56 = vmul.f32 0.5, %v2323_v13 }
0x1379   :  { %v2338_v1 = vmul.f32 %v2335_v26, %v2333_v6 }
0x137a   :  { %v2325_v32 = vsub.f32 1.5, %v2324_v56 }
0x137b   :  { %v2826_v16 = vpop.eup %2825  ;;  %v2343_v23 = vadd.f32 %v2340_v38, %v2338_v1 }
0x137c   :  { %v2326_v49 = vmul.f32 %v2824_v41, %v2325_v32  ;;  %v2292_v21 = vmul.f32 %v2826_v16, %v2287_v59  ;;  %vm2298_vm2 = vweird.f32 %v2826_v16 }
0x137d   :  { %vm2299_vm6 = vmor %vm2297_vm4, %vm2298_vm2 }
0x137e   :  { %v2330_v7 = vsel %vm2329_vm0, %v2824_v41, %v2326_v49  ;;  %v2293_v40 = vmul.f32 %v2826_v16, %v2292_v21 }
0x137f   :  { %v2334_v25 = vmul.f32 %v2330_v7, %v3914_v12  ;;  %v2369_v12 = vstv %s2668_s13 }
0x1380   :  { %v2294_v33 = vmul.f32 0.5, %v2293_v40  ;;  %v2371_v47 = vsel %vm2365_vm3, %v2369_v12, 0.0 }
0x1381   :  { %v2339_v20 = vmul.f32 %v2335_v26, %v2334_v25  ;;  %v2381_v51 = vadd.f32 %v2380_v17, %v2371_v47 }
0x1382   :  { %v2295_v30 = vsub.f32 1.5, %v2294_v33 }
0x1383   :  { %v2344_v11 = vadd.f32 %v2340_v38, %v2339_v20 }
0x1384   :  { %v2296_v42 = vmul.f32 %v2826_v16, %v2295_v30 }
0x1385   :  { %2397 = vmatpush.msra.mxu1 %v2344_v11 }
0x1386   :  { %v2300_v48 = vsel %vm2299_vm6, %v2826_v16, %v2296_v42 }
0x1387   :  { %2398 = vmatpush.msra.mxu1 %v2343_v23  ;;  %v2331_v9 = vmul.f32 %v2300_v48, %v3920_v62 }
0x1389   :  { %2399 = vmatpush.msra.mxu1 %v2342_v46  ;;  %v2336_v50 = vmul.f32 %v2335_v26, %v2331_v9 }
0x138b   :  { %v2341_v28 = vadd.f32 %v2340_v38, %v2336_v50 }
0x138d   :  { %2400 = vmatpush.msra.mxu1 %v2341_v28 }
0x138e   :  { %2664 = vmatmul.msk.f32.vlgmr.msra.gmra.mxu1 %vm106_vm1, %v2381_v51 }
0x140b   :  { %v2402_v3 = vpop.f32.mrf.mxu1 }
0x140c   :  { %2665 = vmatmul.msk.f32.vlgmr.msra.gmra.mxu2 %vm106_vm1, %v2402_v3 }
0x148f   :  { %v2430_v62 = vpop.f32.mrf.mxu2 }
0x1490   :  { %v2431_v52 = vadd.f32 %v2430_v62, %v2409_v19 }
0x1492   :  { %2434 = vst.msk [vmem:[#allocation2] sm:$0x3] %vm2433_vm13, %v2431_v52 }
0x1493   :  { %2445 = dma.vmem_to_hbm [thread:$0]  %s2441_s18, 32, %s2443_s2, [#allocation3]  }
0x1494   :  { %2854 = dma.done.wait [#allocation3], 32  }
0x1495   :  { %2855 = vsyncadd [#allocation3], 4294967264 }
0x1496   :  { %2450 = vsyncpa [#allocation3], 1 }

</bundles_post_ra>
